<compile_context>
chip_gen: v7x
topology: tpu7x:2x2x1
jax: 0.10.0
libtpu: 0.0.40
codegen_flags: <defaults>
</compile_context>

<pallas_src>
import jax
import jax.numpy as jnp
from jax.experimental import pallas as pl
from jax.experimental.pallas import tpu as pltpu


# ----------------------------- hyper-params ---------------------------------
B = 2            # batch
L = 16           # number of spatial locations (e.g. 4x4 feature map)
ENC_IN = 32      # encoder input channels
ENC_OUT = 16     # encoder output channels (feature dim seen by attention)
DEC_HIDDEN = 32  # GRU hidden size
DEC_OUT = 32     # fc1 output size
ATTN_DIM = 16    # attention hidden size
EMB_DIM = 16     # word embedding dim
VOCAB = 32       # vocab.top_words
CAP_LEN = 8      # caption length
START_IDX = 1    # vocab.word_to_idx['<start>']


# ------------------------------ fused kernel ---------------------------------
def end2end_kernel(
    emb_ref, oh_ref, x_ref,
    w_enc_ref, b_enc_ref,
    w1_ref, b1_ref, w2_ref, b2_ref, v_ref, bv_ref,
    w_gru_ref, b_gru_ref, w_out_ref, b_out_ref,
    words_ref, loss_ref,
):
    # ---- one-shot encoder: Linear + ReLU over all spatial locations ----
    x = x_ref[...]                                            # (B, L, Ci)
    b0, l0, ci = x.shape
    feat2 = jnp.maximum(
        jnp.dot(x.reshape(b0 * l0, ci), w_enc_ref[...],
                preferred_element_type=jnp.float32) + b_enc_ref[...], 0.0)   # (B*L, E)

    # ---- hoisted loop-invariant attention term: W1 . feat + b1 ----
    w1f = (jnp.dot(feat2, w1_ref[...], preferred_element_type=jnp.float32)
           + b1_ref[...]).reshape(b0, l0, -1)                 # (B, L, A)
    feat = feat2.reshape(b0, l0, -1)                          # (B, L, E)

    # ---- weights / biases loaded once (biases broadcast once, not per step) ----
    w2 = w2_ref[...]; b2 = b2_ref[...]
    v_w = v_ref[...]; bv = bv_ref[...]
    w_gru = w_gru_ref[...]; b_gru = b_gru_ref[...]
    w_out = w_out_ref[...]; b_out = b_out_ref[...]

    h_ = DEC_HIDDEN
    n_steps = emb_ref.shape[0]
    vocab = oh_ref.shape[-1]

    hid = jnp.zeros((b0, h_), jnp.float32)
    total_loss = jnp.zeros((1, 1), jnp.float32)
    word_cols = []

    # ---- unrolled teacher-forced decode loop (sequential hidden-state carry) ----
    for t in range(n_steps):
        emb = emb_ref[t]                                      # (B, D)
        oh = oh_ref[t]                                        # (B, V)

        # Bahdanau attention: score = V . tanh(W1 f + W2 h)
        w2h = jnp.dot(hid, w2, preferred_element_type=jnp.float32) + b2      # (B, A)
        tnh = jnp.tanh(w1f + w2h[:, None, :])                 # (B, L, A)
        score = jnp.sum(tnh * v_w[None, :, :], axis=-1) + bv  # (B, L)
        m = jnp.max(score, axis=-1, keepdims=True)
        ex = jnp.exp(score - m)
        attn_w = ex / jnp.sum(ex, axis=-1, keepdims=True)     # exact softmax
        ctx = jnp.sum(attn_w[:, :, None] * feat, axis=1)      # (B, E)  VPU+XLU

        # fused GRU cell: one block-diagonal matmul gives [gi | gh]
        lhs = jnp.concatenate([ctx, emb, hid], axis=-1)       # (B, E+D+H)
        g = jnp.dot(lhs, w_gru, preferred_element_type=jnp.float32) + b_gru  # (B, 6H)
        gi = g[:, :3 * h_]
        gh = g[:, 3 * h_:]
        i_r, i_z, i_n = gi[:, :h_], gi[:, h_:2 * h_], gi[:, 2 * h_:]
        h_r, h_z, h_n = gh[:, :h_], gh[:, h_:2 * h_], gh[:, 2 * h_:]
        r = jax.nn.sigmoid(i_r + h_r)
        z = jax.nn.sigmoid(i_z + h_z)
        n = jnp.tanh(i_n + r * h_n)
        hid = (1.0 - z) * n + z * hid                         # (B, H)

        # folded fc1@fc2 output head -> vocab logits
        logits = jnp.dot(hid, w_out, preferred_element_type=jnp.float32) + b_out  # (B, V)

        # argmax over vocab (first max index, matches torch.argmax)
        mx = jnp.max(logits, axis=-1, keepdims=True)          # (B, 1)
        lane = jax.lax.broadcasted_iota(jnp.int32, logits.shape, 1)
        masked = jnp.where(logits == mx, lane, vocab)
        word_cols.append(jnp.min(masked, axis=-1, keepdims=True).astype(jnp.int32))

        # cross entropy (batch mean), accumulated across steps
        lse = mx + jnp.log(jnp.sum(jnp.exp(logits - mx), axis=-1, keepdims=True))
        logp = logits - lse
        per_ex = jnp.sum(logp * oh, axis=-1, keepdims=True)   # (B, 1)
        total_loss = total_loss - jnp.sum(per_ex, axis=0, keepdims=True) * (1.0 / b0)

    # ---- lane-dense, write-once outputs ----
    words_ref[...] = jnp.concatenate(word_cols, axis=-1)      # (B, T) int32
    loss_ref[...] = total_loss                                # (1, 1)


# ------------------------------- End2End forward ----------------------------
def end2end_forward(x, captions, params):
    """Mirrors End2End.forward: teacher-forced decoding + summed CE loss."""
    batch_size, caption_length = captions.shape
    captions = captions.astype(jnp.int32)

    # teacher-forced decoder inputs: [<start>, captions[:, :-1]]  (known up front)
    dec_in = jnp.concatenate(
        [jnp.full((batch_size, 1), START_IDX, jnp.int32), captions[:, :-1]], axis=1)
    emb_seq = params["embedding"][dec_in.T]                            # (T, B, D)
    onehot_tgt = jax.nn.one_hot(captions.T, VOCAB, dtype=jnp.float32)  # (T, B, V)

    E, D, H = ENC_OUT, EMB_DIM, DEC_HIDDEN

    # fused block-diagonal GRU weight: lhs = [ctx | emb | hid] -> [gi | gh]
    w_gru = jnp.zeros((E + D + H, 6 * H), jnp.float32)
    w_gru = w_gru.at[:E, :3 * H].set(params["w_ih_ctx"])
    w_gru = w_gru.at[E:E + D, :3 * H].set(params["w_ih_emb"])
    w_gru = w_gru.at[E + D:, 3 * H:].set(params["w_hh"])
    b_gru = jnp.concatenate([params["b_ih"], params["b_hh"]], axis=-1)  # (1, 6H)

    # fold fc1 @ fc2 offline (no nonlinearity between them)
    w_out = params["w_fc1"] @ params["w_fc2"]                           # (H, V)
    b_out = params["b_fc1"] @ params["w_fc2"] + params["b_fc2"]         # (1, V)

    operands = (
        emb_seq, onehot_tgt, x,
        params["w_enc"], params["b_enc"],
        params["w1"], params["b1"], params["w2"], params["b2"],
        params["v"], params["bv"],
        w_gru, b_gru, w_out, b_out,
    )

    vmem_spec = pl.BlockSpec(memory_space=pltpu.MemorySpace.VMEM)
    out_shapes = (
        jax.ShapeDtypeStruct((batch_size, caption_length), jnp.int32),  # argmax words
        jax.ShapeDtypeStruct((1, 1), jnp.float32),                      # total loss
    )

    words, loss = pl.pallas_call(
        end2end_kernel,
        in_specs=[vmem_spec] * len(operands),
        out_specs=(vmem_spec, vmem_spec),
        out_shape=out_shapes,
    )(*operands)

    out = words.astype(jnp.float32)          # torch.zeros default dtype
    total_loss = loss[0, 0]
    return out, total_loss


# ------------------------------- parameter init ------------------------------
def init_params(key):
    ks = jax.random.split(key, 18)
    s = 0.1

    def rnd(k, shape):
        return (s * jax.random.normal(k, shape)).astype(jnp.float32)

    return {
        # encoder
        "w_enc": rnd(ks[0], (ENC_IN, ENC_OUT)),
        "b_enc": rnd(ks[1], (1, ENC_OUT)),
        # embedding (gathered in the wrapper; teacher forcing -> inputs known up front)
        "embedding": rnd(ks[2], (VOCAB, EMB_DIM)),
        # attention
        "w1": rnd(ks[3], (ENC_OUT, ATTN_DIM)),
        "b1": rnd(ks[4], (1, ATTN_DIM)),
        "w2": rnd(ks[5], (DEC_HIDDEN, ATTN_DIM)),
        "b2": rnd(ks[6], (1, ATTN_DIM)),
        "v": rnd(ks[7], (1, ATTN_DIM)),
        "bv": rnd(ks[8], (1, 1)),
        # GRU cell (x @ W layout; import from PyTorch requires a transpose)
        "w_ih_ctx": rnd(ks[9], (ENC_OUT, 3 * DEC_HIDDEN)),
        "w_ih_emb": rnd(ks[10], (EMB_DIM, 3 * DEC_HIDDEN)),
        "b_ih": rnd(ks[11], (1, 3 * DEC_HIDDEN)),
        "w_hh": rnd(ks[12], (DEC_HIDDEN, 3 * DEC_HIDDEN)),
        "b_hh": rnd(ks[13], (1, 3 * DEC_HIDDEN)),
        # output MLP
        "w_fc1": rnd(ks[14], (DEC_HIDDEN, DEC_OUT)),
        "b_fc1": rnd(ks[15], (1, DEC_OUT)),
        "w_fc2": rnd(ks[16], (DEC_OUT, VOCAB)),
        "b_fc2": jnp.zeros((1, VOCAB), jnp.float32),
    }


if __name__ == "__main__":
    key = jax.random.PRNGKey(0)
    k_par, k_x, k_cap = jax.random.split(key, 3)
    params = init_params(k_par)

    # x: pre-extracted backbone features, (B, num_locations, enc_input)
    x = jax.random.normal(k_x, (B, L, ENC_IN), jnp.float32)
    captions = jax.random.randint(k_cap, (B, CAP_LEN), 0, VOCAB, jnp.int32)

    fwd = jax.jit(end2end_forward)
    out, total_loss = fwd(x, captions, params)
    jax.block_until_ready((out, total_loss))

    assert out.shape == (B, CAP_LEN)
    assert out.dtype == jnp.float32
    assert total_loss.shape == ()
    print("KERNEL_OK")
</pallas_src>

<mosaic_0001>
module attributes {stable_mosaic.version = 11 : i64} {
  func.func @end2end_kernel(%arg0: memref<8x2x16xf32, #tpu.memory_space<vmem>>, %arg1: memref<8x2x32xf32, #tpu.memory_space<vmem>>, %arg2: memref<2x16x32xf32, #tpu.memory_space<vmem>>, %arg3: memref<32x16xf32, #tpu.memory_space<vmem>>, %arg4: memref<1x16xf32, #tpu.memory_space<vmem>>, %arg5: memref<16x16xf32, #tpu.memory_space<vmem>>, %arg6: memref<1x16xf32, #tpu.memory_space<vmem>>, %arg7: memref<32x16xf32, #tpu.memory_space<vmem>>, %arg8: memref<1x16xf32, #tpu.memory_space<vmem>>, %arg9: memref<1x16xf32, #tpu.memory_space<vmem>>, %arg10: memref<1x1xf32, #tpu.memory_space<vmem>>, %arg11: memref<64x192xf32, #tpu.memory_space<vmem>>, %arg12: memref<1x192xf32, #tpu.memory_space<vmem>>, %arg13: memref<32x32xf32, #tpu.memory_space<vmem>>, %arg14: memref<1x32xf32, #tpu.memory_space<vmem>>, %arg15: memref<2x8xi32, #tpu.memory_space<vmem>>, %arg16: memref<1x1xf32, #tpu.memory_space<vmem>>) attributes {dimension_semantics = [], scalar_prefetch = 0 : i64, scratch_operands = 0 : i64, tpu.core_type = #tpu.core_type<tc>} {
    %c0 = arith.constant 0 : index
    %c0_0 = arith.constant 0 : index
    %c0_1 = arith.constant 0 : index
    %0 = vector.load %arg2[%c0, %c0_0, %c0_1] : memref<2x16x32xf32, #tpu.memory_space<vmem>>, vector<2x16x32xf32>
    %1 = vector.shape_cast %0 : vector<2x16x32xf32> to vector<32x32xf32>
    %c0_2 = arith.constant 0 : index
    %c0_3 = arith.constant 0 : index
    %2 = vector.load %arg3[%c0_2, %c0_3] : memref<32x16xf32, #tpu.memory_space<vmem>>, vector<32x16xf32>
    %cst = arith.constant dense<0.000000e+00> : vector<32x16xf32>
    %3 = tpu.matmul %1, %2, %cst {dimension_numbers = #tpu.dot_dimension_numbers<[1], [0], [0], [1], [0, 0, 1, 1], [], []>} : vector<32x32xf32>, vector<32x16xf32>, vector<32x16xf32> -> vector<32x16xf32>
    %c0_4 = arith.constant 0 : index
    %c0_5 = arith.constant 0 : index
    %4 = vector.load %arg4[%c0_4, %c0_5] : memref<1x16xf32, #tpu.memory_space<vmem>>, vector<1x16xf32>
    %5 = vector.broadcast %4 : vector<1x16xf32> to vector<32x16xf32>
    %6 = arith.addf %3, %5 : vector<32x16xf32>
    %cst_6 = arith.constant 0.000000e+00 : f32
    %7 = vector.broadcast %cst_6 : f32 to vector<32x16xf32>
    %8 = arith.maximumf %6, %7 : vector<32x16xf32>
    %c0_7 = arith.constant 0 : index
    %c0_8 = arith.constant 0 : index
    %9 = vector.load %arg5[%c0_7, %c0_8] : memref<16x16xf32, #tpu.memory_space<vmem>>, vector<16x16xf32>
    %cst_9 = arith.constant dense<0.000000e+00> : vector<32x16xf32>
    %10 = tpu.matmul %8, %9, %cst_9 {dimension_numbers = #tpu.dot_dimension_numbers<[1], [0], [0], [1], [0, 0, 1, 1], [], []>} : vector<32x16xf32>, vector<16x16xf32>, vector<32x16xf32> -> vector<32x16xf32>
    %c0_10 = arith.constant 0 : index
    %c0_11 = arith.constant 0 : index
    %11 = vector.load %arg6[%c0_10, %c0_11] : memref<1x16xf32, #tpu.memory_space<vmem>>, vector<1x16xf32>
    %12 = vector.broadcast %11 : vector<1x16xf32> to vector<32x16xf32>
    %13 = arith.addf %10, %12 : vector<32x16xf32>
    %14 = vector.shape_cast %13 : vector<32x16xf32> to vector<2x16x16xf32>
    %15 = vector.shape_cast %8 : vector<32x16xf32> to vector<2x16x16xf32>
    %c0_12 = arith.constant 0 : index
    %c0_13 = arith.constant 0 : index
    %16 = vector.load %arg7[%c0_12, %c0_13] : memref<32x16xf32, #tpu.memory_space<vmem>>, vector<32x16xf32>
    %c0_14 = arith.constant 0 : index
    %c0_15 = arith.constant 0 : index
    %17 = vector.load %arg8[%c0_14, %c0_15] : memref<1x16xf32, #tpu.memory_space<vmem>>, vector<1x16xf32>
    %c0_16 = arith.constant 0 : index
    %c0_17 = arith.constant 0 : index
    %18 = vector.load %arg9[%c0_16, %c0_17] : memref<1x16xf32, #tpu.memory_space<vmem>>, vector<1x16xf32>
    %c0_18 = arith.constant 0 : index
    %c0_19 = arith.constant 0 : index
    %19 = vector.load %arg10[%c0_18, %c0_19] : memref<1x1xf32, #tpu.memory_space<vmem>>, vector<1x1xf32>
    %c0_20 = arith.constant 0 : index
    %c0_21 = arith.constant 0 : index
    %20 = vector.load %arg11[%c0_20, %c0_21] : memref<64x192xf32, #tpu.memory_space<vmem>>, vector<64x192xf32>
    %c0_22 = arith.constant 0 : index
    %c0_23 = arith.constant 0 : index
    %21 = vector.load %arg12[%c0_22, %c0_23] : memref<1x192xf32, #tpu.memory_space<vmem>>, vector<1x192xf32>
    %c0_24 = arith.constant 0 : index
    %c0_25 = arith.constant 0 : index
    %22 = vector.load %arg13[%c0_24, %c0_25] : memref<32x32xf32, #tpu.memory_space<vmem>>, vector<32x32xf32>
    %c0_26 = arith.constant 0 : index
    %c0_27 = arith.constant 0 : index
    %23 = vector.load %arg14[%c0_26, %c0_27] : memref<1x32xf32, #tpu.memory_space<vmem>>, vector<1x32xf32>
    %cst_28 = arith.constant 0.000000e+00 : f32
    %24 = vector.broadcast %cst_28 : f32 to vector<2x32xf32>
    %cst_29 = arith.constant 0.000000e+00 : f32
    %25 = vector.broadcast %cst_29 : f32 to vector<1x1xf32>
    %c0_30 = arith.constant 0 : index
    %c0_31 = arith.constant 0 : index
    %c0_32 = arith.constant 0 : index
    %26 = vector.load %arg0[%c0_30, %c0_31, %c0_32] : memref<8x2x16xf32, #tpu.memory_space<vmem>>, vector<1x2x16xf32>
    %27 = vector.shape_cast %26 : vector<1x2x16xf32> to vector<2x16xf32>
    %c0_33 = arith.constant 0 : index
    %c0_34 = arith.constant 0 : index
    %c0_35 = arith.constant 0 : index
    %28 = vector.load %arg1[%c0_33, %c0_34, %c0_35] : memref<8x2x32xf32, #tpu.memory_space<vmem>>, vector<1x2x32xf32>
    %29 = vector.shape_cast %28 : vector<1x2x32xf32> to vector<2x32xf32>
    %cst_36 = arith.constant dense<0.000000e+00> : vector<2x16xf32>
    %30 = tpu.matmul %24, %16, %cst_36 {dimension_numbers = #tpu.dot_dimension_numbers<[1], [0], [0], [1], [0, 0, 1, 1], [], []>} : vector<2x32xf32>, vector<32x16xf32>, vector<2x16xf32> -> vector<2x16xf32>
    %31 = vector.broadcast %17 : vector<1x16xf32> to vector<2x16xf32>
    %32 = arith.addf %30, %31 : vector<2x16xf32>
    %33 = vector.shape_cast %32 : vector<2x16xf32> to vector<2x1x16xf32>
    %34 = vector.broadcast %33 : vector<2x1x16xf32> to vector<2x16x16xf32>
    %35 = arith.addf %14, %34 : vector<2x16x16xf32>
    %36 = math.tanh %35 : vector<2x16x16xf32>
    %37 = vector.shape_cast %18 : vector<1x16xf32> to vector<1x1x16xf32>
    %38 = vector.broadcast %37 : vector<1x1x16xf32> to vector<2x16x16xf32>
    %39 = arith.mulf %36, %38 : vector<2x16x16xf32>
    %cst_37 = arith.constant dense<0.000000e+00> : vector<2x16xf32>
    %40 = vector.multi_reduction <add>, %39, %cst_37 [2] : vector<2x16x16xf32> to vector<2x16xf32>
    %41 = vector.broadcast %19 : vector<1x1xf32> to vector<2x16xf32>
    %42 = arith.addf %40, %41 : vector<2x16xf32>
    %cst_38 = arith.constant dense<0xFF800000> : vector<2xf32>
    %43 = vector.multi_reduction <maximumf>, %42, %cst_38 [1] : vector<2x16xf32> to vector<2xf32>
    %44 = vector.shape_cast %43 : vector<2xf32> to vector<2x1xf32>
    %45 = vector.broadcast %44 : vector<2x1xf32> to vector<2x16xf32>
    %46 = arith.subf %42, %45 : vector<2x16xf32>
    %47 = math.exp %46 : vector<2x16xf32>
    %cst_39 = arith.constant dense<0.000000e+00> : vector<2xf32>
    %48 = vector.multi_reduction <add>, %47, %cst_39 [1] : vector<2x16xf32> to vector<2xf32>
    %49 = vector.shape_cast %48 : vector<2xf32> to vector<2x1xf32>
    %50 = vector.broadcast %49 : vector<2x1xf32> to vector<2x16xf32>
    %51 = arith.divf %47, %50 : vector<2x16xf32>
    %52 = vector.shape_cast %51 : vector<2x16xf32> to vector<2x16x1xf32>
    %53 = vector.broadcast %52 : vector<2x16x1xf32> to vector<2x16x16xf32>
    %54 = arith.mulf %53, %15 : vector<2x16x16xf32>
    %cst_40 = arith.constant dense<0.000000e+00> : vector<2x16xf32>
    %55 = vector.multi_reduction <add>, %54, %cst_40 [1] : vector<2x16x16xf32> to vector<2x16xf32>
    %56 = tpu.concatenate %55, %27, %24 in 1 : vector<2x16xf32>, vector<2x16xf32>, vector<2x32xf32> -> vector<2x64xf32>
    %cst_41 = arith.constant dense<0.000000e+00> : vector<2x192xf32>
    %57 = tpu.matmul %56, %20, %cst_41 {dimension_numbers = #tpu.dot_dimension_numbers<[1], [0], [0], [1], [0, 0, 1, 1], [], []>} : vector<2x64xf32>, vector<64x192xf32>, vector<2x192xf32> -> vector<2x192xf32>
    %58 = vector.broadcast %21 : vector<1x192xf32> to vector<2x192xf32>
    %59 = arith.addf %57, %58 : vector<2x192xf32>
    %60 = vector.extract_strided_slice %59 {offsets = [0, 0], sizes = [2, 96], strides = [1, 1]} : vector<2x192xf32> to vector<2x96xf32>
    %61 = vector.extract_strided_slice %59 {offsets = [0, 96], sizes = [2, 96], strides = [1, 1]} : vector<2x192xf32> to vector<2x96xf32>
    %62 = vector.extract_strided_slice %60 {offsets = [0, 0], sizes = [2, 32], strides = [1, 1]} : vector<2x96xf32> to vector<2x32xf32>
    %63 = vector.extract_strided_slice %60 {offsets = [0, 32], sizes = [2, 32], strides = [1, 1]} : vector<2x96xf32> to vector<2x32xf32>
    %64 = vector.extract_strided_slice %60 {offsets = [0, 64], sizes = [2, 32], strides = [1, 1]} : vector<2x96xf32> to vector<2x32xf32>
    %65 = vector.extract_strided_slice %61 {offsets = [0, 0], sizes = [2, 32], strides = [1, 1]} : vector<2x96xf32> to vector<2x32xf32>
    %66 = vector.extract_strided_slice %61 {offsets = [0, 32], sizes = [2, 32], strides = [1, 1]} : vector<2x96xf32> to vector<2x32xf32>
    %67 = vector.extract_strided_slice %61 {offsets = [0, 64], sizes = [2, 32], strides = [1, 1]} : vector<2x96xf32> to vector<2x32xf32>
    %68 = arith.addf %62, %65 : vector<2x32xf32>
    %69 = arith.negf %68 : vector<2x32xf32>
    %70 = math.exp %69 : vector<2x32xf32>
    %cst_42 = arith.constant 1.000000e+00 : f32
    %71 = vector.broadcast %cst_42 : f32 to vector<2x32xf32>
    %72 = arith.addf %71, %70 : vector<2x32xf32>
    %73 = arith.divf %71, %72 : vector<2x32xf32>
    %74 = arith.addf %63, %66 : vector<2x32xf32>
    %75 = arith.negf %74 : vector<2x32xf32>
    %76 = math.exp %75 : vector<2x32xf32>
    %cst_43 = arith.constant 1.000000e+00 : f32
    %77 = vector.broadcast %cst_43 : f32 to vector<2x32xf32>
    %78 = arith.addf %77, %76 : vector<2x32xf32>
    %79 = arith.divf %77, %78 : vector<2x32xf32>
    %80 = arith.mulf %73, %67 : vector<2x32xf32>
    %81 = arith.addf %64, %80 : vector<2x32xf32>
    %82 = math.tanh %81 : vector<2x32xf32>
    %cst_44 = arith.constant 1.000000e+00 : f32
    %83 = vector.broadcast %cst_44 : f32 to vector<2x32xf32>
    %84 = arith.subf %83, %79 : vector<2x32xf32>
    %85 = arith.mulf %84, %82 : vector<2x32xf32>
    %86 = arith.mulf %79, %24 : vector<2x32xf32>
    %87 = arith.addf %85, %86 : vector<2x32xf32>
    %cst_45 = arith.constant dense<0.000000e+00> : vector<2x32xf32>
    %88 = tpu.matmul %87, %22, %cst_45 {dimension_numbers = #tpu.dot_dimension_numbers<[1], [0], [0], [1], [0, 0, 1, 1], [], []>} : vector<2x32xf32>, vector<32x32xf32>, vector<2x32xf32> -> vector<2x32xf32>
    %89 = vector.broadcast %23 : vector<1x32xf32> to vector<2x32xf32>
    %90 = arith.addf %88, %89 : vector<2x32xf32>
    %cst_46 = arith.constant dense<0xFF800000> : vector<2xf32>
    %91 = vector.multi_reduction <maximumf>, %90, %cst_46 [1] : vector<2x32xf32> to vector<2xf32>
    %92 = vector.shape_cast %91 : vector<2xf32> to vector<2x1xf32>
    %93 = tpu.iota {dimensions = array<i32: 1>} : vector<2x32xi32>
    %94 = vector.broadcast %92 : vector<2x1xf32> to vector<2x32xf32>
    %95 = arith.cmpf oeq, %90, %94 : vector<2x32xf32>
    %c32_i32 = arith.constant 32 : i32
    %96 = vector.broadcast %c32_i32 : i32 to vector<2x32xi32>
    %97 = arith.select %95, %93, %96 : vector<2x32xi1>, vector<2x32xi32>
    %cst_47 = arith.constant dense<2147483647> : vector<2xi32>
    %98 = vector.multi_reduction <minsi>, %97, %cst_47 [1] : vector<2x32xi32> to vector<2xi32>
    %99 = vector.shape_cast %98 : vector<2xi32> to vector<2x1xi32>
    %100 = vector.broadcast %92 : vector<2x1xf32> to vector<2x32xf32>
    %101 = arith.subf %90, %100 : vector<2x32xf32>
    %102 = math.exp %101 : vector<2x32xf32>
    %cst_48 = arith.constant dense<0.000000e+00> : vector<2xf32>
    %103 = vector.multi_reduction <add>, %102, %cst_48 [1] : vector<2x32xf32> to vector<2xf32>
    %104 = vector.shape_cast %103 : vector<2xf32> to vector<2x1xf32>
    %105 = math.log %104 : vector<2x1xf32>
    %106 = arith.addf %92, %105 : vector<2x1xf32>
    %107 = vector.broadcast %106 : vector<2x1xf32> to vector<2x32xf32>
    %108 = arith.subf %90, %107 : vector<2x32xf32>
    %109 = arith.mulf %108, %29 : vector<2x32xf32>
    %cst_49 = arith.constant dense<0.000000e+00> : vector<2xf32>
    %110 = vector.multi_reduction <add>, %109, %cst_49 [1] : vector<2x32xf32> to vector<2xf32>
    %111 = vector.shape_cast %110 : vector<2xf32> to vector<2x1xf32>
    %cst_50 = arith.constant dense<0.000000e+00> : vector<1xf32>
    %112 = vector.multi_reduction <add>, %111, %cst_50 [0] : vector<2x1xf32> to vector<1xf32>
    %113 = vector.shape_cast %112 : vector<1xf32> to vector<1x1xf32>
    %cst_51 = arith.constant 5.000000e-01 : f32
    %114 = vector.broadcast %cst_51 : f32 to vector<1x1xf32>
    %115 = arith.mulf %113, %114 : vector<1x1xf32>
    %116 = arith.subf %25, %115 : vector<1x1xf32>
    %c1 = arith.constant 1 : index
    %c0_52 = arith.constant 0 : index
    %c0_53 = arith.constant 0 : index
    %117 = vector.load %arg0[%c1, %c0_52, %c0_53] : memref<8x2x16xf32, #tpu.memory_space<vmem>>, vector<1x2x16xf32>
    %118 = vector.shape_cast %117 : vector<1x2x16xf32> to vector<2x16xf32>
    %c1_54 = arith.constant 1 : index
    %c0_55 = arith.constant 0 : index
    %c0_56 = arith.constant 0 : index
    %119 = vector.load %arg1[%c1_54, %c0_55, %c0_56] : memref<8x2x32xf32, #tpu.memory_space<vmem>>, vector<1x2x32xf32>
    %120 = vector.shape_cast %119 : vector<1x2x32xf32> to vector<2x32xf32>
    %cst_57 = arith.constant dense<0.000000e+00> : vector<2x16xf32>
    %121 = tpu.matmul %87, %16, %cst_57 {dimension_numbers = #tpu.dot_dimension_numbers<[1], [0], [0], [1], [0, 0, 1, 1], [], []>} : vector<2x32xf32>, vector<32x16xf32>, vector<2x16xf32> -> vector<2x16xf32>
    %122 = vector.broadcast %17 : vector<1x16xf32> to vector<2x16xf32>
    %123 = arith.addf %121, %122 : vector<2x16xf32>
    %124 = vector.shape_cast %123 : vector<2x16xf32> to vector<2x1x16xf32>
    %125 = vector.broadcast %124 : vector<2x1x16xf32> to vector<2x16x16xf32>
    %126 = arith.addf %14, %125 : vector<2x16x16xf32>
    %127 = math.tanh %126 : vector<2x16x16xf32>
    %128 = vector.shape_cast %18 : vector<1x16xf32> to vector<1x1x16xf32>
    %129 = vector.broadcast %128 : vector<1x1x16xf32> to vector<2x16x16xf32>
    %130 = arith.mulf %127, %129 : vector<2x16x16xf32>
    %cst_58 = arith.constant dense<0.000000e+00> : vector<2x16xf32>
    %131 = vector.multi_reduction <add>, %130, %cst_58 [2] : vector<2x16x16xf32> to vector<2x16xf32>
    %132 = vector.broadcast %19 : vector<1x1xf32> to vector<2x16xf32>
    %133 = arith.addf %131, %132 : vector<2x16xf32>
    %cst_59 = arith.constant dense<0xFF800000> : vector<2xf32>
    %134 = vector.multi_reduction <maximumf>, %133, %cst_59 [1] : vector<2x16xf32> to vector<2xf32>
    %135 = vector.shape_cast %134 : vector<2xf32> to vector<2x1xf32>
    %136 = vector.broadcast %135 : vector<2x1xf32> to vector<2x16xf32>
    %137 = arith.subf %133, %136 : vector<2x16xf32>
    %138 = math.exp %137 : vector<2x16xf32>
    %cst_60 = arith.constant dense<0.000000e+00> : vector<2xf32>
    %139 = vector.multi_reduction <add>, %138, %cst_60 [1] : vector<2x16xf32> to vector<2xf32>
    %140 = vector.shape_cast %139 : vector<2xf32> to vector<2x1xf32>
    %141 = vector.broadcast %140 : vector<2x1xf32> to vector<2x16xf32>
    %142 = arith.divf %138, %141 : vector<2x16xf32>
    %143 = vector.shape_cast %142 : vector<2x16xf32> to vector<2x16x1xf32>
    %144 = vector.broadcast %143 : vector<2x16x1xf32> to vector<2x16x16xf32>
    %145 = arith.mulf %144, %15 : vector<2x16x16xf32>
    %cst_61 = arith.constant dense<0.000000e+00> : vector<2x16xf32>
    %146 = vector.multi_reduction <add>, %145, %cst_61 [1] : vector<2x16x16xf32> to vector<2x16xf32>
    %147 = tpu.concatenate %146, %118, %87 in 1 : vector<2x16xf32>, vector<2x16xf32>, vector<2x32xf32> -> vector<2x64xf32>
    %cst_62 = arith.constant dense<0.000000e+00> : vector<2x192xf32>
    %148 = tpu.matmul %147, %20, %cst_62 {dimension_numbers = #tpu.dot_dimension_numbers<[1], [0], [0], [1], [0, 0, 1, 1], [], []>} : vector<2x64xf32>, vector<64x192xf32>, vector<2x192xf32> -> vector<2x192xf32>
    %149 = vector.broadcast %21 : vector<1x192xf32> to vector<2x192xf32>
    %150 = arith.addf %148, %149 : vector<2x192xf32>
    %151 = vector.extract_strided_slice %150 {offsets = [0, 0], sizes = [2, 96], strides = [1, 1]} : vector<2x192xf32> to vector<2x96xf32>
    %152 = vector.extract_strided_slice %150 {offsets = [0, 96], sizes = [2, 96], strides = [1, 1]} : vector<2x192xf32> to vector<2x96xf32>
    %153 = vector.extract_strided_slice %151 {offsets = [0, 0], sizes = [2, 32], strides = [1, 1]} : vector<2x96xf32> to vector<2x32xf32>
    %154 = vector.extract_strided_slice %151 {offsets = [0, 32], sizes = [2, 32], strides = [1, 1]} : vector<2x96xf32> to vector<2x32xf32>
    %155 = vector.extract_strided_slice %151 {offsets = [0, 64], sizes = [2, 32], strides = [1, 1]} : vector<2x96xf32> to vector<2x32xf32>
    %156 = vector.extract_strided_slice %152 {offsets = [0, 0], sizes = [2, 32], strides = [1, 1]} : vector<2x96xf32> to vector<2x32xf32>
    %157 = vector.extract_strided_slice %152 {offsets = [0, 32], sizes = [2, 32], strides = [1, 1]} : vector<2x96xf32> to vector<2x32xf32>
    %158 = vector.extract_strided_slice %152 {offsets = [0, 64], sizes = [2, 32], strides = [1, 1]} : vector<2x96xf32> to vector<2x32xf32>
    %159 = arith.addf %153, %156 : vector<2x32xf32>
    %160 = arith.negf %159 : vector<2x32xf32>
    %161 = math.exp %160 : vector<2x32xf32>
    %cst_63 = arith.constant 1.000000e+00 : f32
    %162 = vector.broadcast %cst_63 : f32 to vector<2x32xf32>
    %163 = arith.addf %162, %161 : vector<2x32xf32>
    %164 = arith.divf %162, %163 : vector<2x32xf32>
    %165 = arith.addf %154, %157 : vector<2x32xf32>
    %166 = arith.negf %165 : vector<2x32xf32>
    %167 = math.exp %166 : vector<2x32xf32>
    %cst_64 = arith.constant 1.000000e+00 : f32
    %168 = vector.broadcast %cst_64 : f32 to vector<2x32xf32>
    %169 = arith.addf %168, %167 : vector<2x32xf32>
    %170 = arith.divf %168, %169 : vector<2x32xf32>
    %171 = arith.mulf %164, %158 : vector<2x32xf32>
    %172 = arith.addf %155, %171 : vector<2x32xf32>
    %173 = math.tanh %172 : vector<2x32xf32>
    %cst_65 = arith.constant 1.000000e+00 : f32
    %174 = vector.broadcast %cst_65 : f32 to vector<2x32xf32>
    %175 = arith.subf %174, %170 : vector<2x32xf32>
    %176 = arith.mulf %175, %173 : vector<2x32xf32>
    %177 = arith.mulf %170, %87 : vector<2x32xf32>
    %178 = arith.addf %176, %177 : vector<2x32xf32>
    %cst_66 = arith.constant dense<0.000000e+00> : vector<2x32xf32>
    %179 = tpu.matmul %178, %22, %cst_66 {dimension_numbers = #tpu.dot_dimension_numbers<[1], [0], [0], [1], [0, 0, 1, 1], [], []>} : vector<2x32xf32>, vector<32x32xf32>, vector<2x32xf32> -> vector<2x32xf32>
    %180 = vector.broadcast %23 : vector<1x32xf32> to vector<2x32xf32>
    %181 = arith.addf %179, %180 : vector<2x32xf32>
    %cst_67 = arith.constant dense<0xFF800000> : vector<2xf32>
    %182 = vector.multi_reduction <maximumf>, %181, %cst_67 [1] : vector<2x32xf32> to vector<2xf32>
    %183 = vector.shape_cast %182 : vector<2xf32> to vector<2x1xf32>
    %184 = tpu.iota {dimensions = array<i32: 1>} : vector<2x32xi32>
    %185 = vector.broadcast %183 : vector<2x1xf32> to vector<2x32xf32>
    %186 = arith.cmpf oeq, %181, %185 : vector<2x32xf32>
    %c32_i32_68 = arith.constant 32 : i32
    %187 = vector.broadcast %c32_i32_68 : i32 to vector<2x32xi32>
    %188 = arith.select %186, %184, %187 : vector<2x32xi1>, vector<2x32xi32>
    %cst_69 = arith.constant dense<2147483647> : vector<2xi32>
    %189 = vector.multi_reduction <minsi>, %188, %cst_69 [1] : vector<2x32xi32> to vector<2xi32>
    %190 = vector.shape_cast %189 : vector<2xi32> to vector<2x1xi32>
    %191 = vector.broadcast %183 : vector<2x1xf32> to vector<2x32xf32>
    %192 = arith.subf %181, %191 : vector<2x32xf32>
    %193 = math.exp %192 : vector<2x32xf32>
    %cst_70 = arith.constant dense<0.000000e+00> : vector<2xf32>
    %194 = vector.multi_reduction <add>, %193, %cst_70 [1] : vector<2x32xf32> to vector<2xf32>
    %195 = vector.shape_cast %194 : vector<2xf32> to vector<2x1xf32>
    %196 = math.log %195 : vector<2x1xf32>
    %197 = arith.addf %183, %196 : vector<2x1xf32>
    %198 = vector.broadcast %197 : vector<2x1xf32> to vector<2x32xf32>
    %199 = arith.subf %181, %198 : vector<2x32xf32>
    %200 = arith.mulf %199, %120 : vector<2x32xf32>
    %cst_71 = arith.constant dense<0.000000e+00> : vector<2xf32>
    %201 = vector.multi_reduction <add>, %200, %cst_71 [1] : vector<2x32xf32> to vector<2xf32>
    %202 = vector.shape_cast %201 : vector<2xf32> to vector<2x1xf32>
    %cst_72 = arith.constant dense<0.000000e+00> : vector<1xf32>
    %203 = vector.multi_reduction <add>, %202, %cst_72 [0] : vector<2x1xf32> to vector<1xf32>
    %204 = vector.shape_cast %203 : vector<1xf32> to vector<1x1xf32>
    %cst_73 = arith.constant 5.000000e-01 : f32
    %205 = vector.broadcast %cst_73 : f32 to vector<1x1xf32>
    %206 = arith.mulf %204, %205 : vector<1x1xf32>
    %207 = arith.subf %116, %206 : vector<1x1xf32>
    %c2 = arith.constant 2 : index
    %c0_74 = arith.constant 0 : index
    %c0_75 = arith.constant 0 : index
    %208 = vector.load %arg0[%c2, %c0_74, %c0_75] : memref<8x2x16xf32, #tpu.memory_space<vmem>>, vector<1x2x16xf32>
    %209 = vector.shape_cast %208 : vector<1x2x16xf32> to vector<2x16xf32>
    %c2_76 = arith.constant 2 : index
    %c0_77 = arith.constant 0 : index
    %c0_78 = arith.constant 0 : index
    %210 = vector.load %arg1[%c2_76, %c0_77, %c0_78] : memref<8x2x32xf32, #tpu.memory_space<vmem>>, vector<1x2x32xf32>
    %211 = vector.shape_cast %210 : vector<1x2x32xf32> to vector<2x32xf32>
    %cst_79 = arith.constant dense<0.000000e+00> : vector<2x16xf32>
    %212 = tpu.matmul %178, %16, %cst_79 {dimension_numbers = #tpu.dot_dimension_numbers<[1], [0], [0], [1], [0, 0, 1, 1], [], []>} : vector<2x32xf32>, vector<32x16xf32>, vector<2x16xf32> -> vector<2x16xf32>
    %213 = vector.broadcast %17 : vector<1x16xf32> to vector<2x16xf32>
    %214 = arith.addf %212, %213 : vector<2x16xf32>
    %215 = vector.shape_cast %214 : vector<2x16xf32> to vector<2x1x16xf32>
    %216 = vector.broadcast %215 : vector<2x1x16xf32> to vector<2x16x16xf32>
    %217 = arith.addf %14, %216 : vector<2x16x16xf32>
    %218 = math.tanh %217 : vector<2x16x16xf32>
    %219 = vector.shape_cast %18 : vector<1x16xf32> to vector<1x1x16xf32>
    %220 = vector.broadcast %219 : vector<1x1x16xf32> to vector<2x16x16xf32>
    %221 = arith.mulf %218, %220 : vector<2x16x16xf32>
    %cst_80 = arith.constant dense<0.000000e+00> : vector<2x16xf32>
    %222 = vector.multi_reduction <add>, %221, %cst_80 [2] : vector<2x16x16xf32> to vector<2x16xf32>
    %223 = vector.broadcast %19 : vector<1x1xf32> to vector<2x16xf32>
    %224 = arith.addf %222, %223 : vector<2x16xf32>
    %cst_81 = arith.constant dense<0xFF800000> : vector<2xf32>
    %225 = vector.multi_reduction <maximumf>, %224, %cst_81 [1] : vector<2x16xf32> to vector<2xf32>
    %226 = vector.shape_cast %225 : vector<2xf32> to vector<2x1xf32>
    %227 = vector.broadcast %226 : vector<2x1xf32> to vector<2x16xf32>
    %228 = arith.subf %224, %227 : vector<2x16xf32>
    %229 = math.exp %228 : vector<2x16xf32>
    %cst_82 = arith.constant dense<0.000000e+00> : vector<2xf32>
    %230 = vector.multi_reduction <add>, %229, %cst_82 [1] : vector<2x16xf32> to vector<2xf32>
    %231 = vector.shape_cast %230 : vector<2xf32> to vector<2x1xf32>
    %232 = vector.broadcast %231 : vector<2x1xf32> to vector<2x16xf32>
    %233 = arith.divf %229, %232 : vector<2x16xf32>
    %234 = vector.shape_cast %233 : vector<2x16xf32> to vector<2x16x1xf32>
    %235 = vector.broadcast %234 : vector<2x16x1xf32> to vector<2x16x16xf32>
    %236 = arith.mulf %235, %15 : vector<2x16x16xf32>
    %cst_83 = arith.constant dense<0.000000e+00> : vector<2x16xf32>
    %237 = vector.multi_reduction <add>, %236, %cst_83 [1] : vector<2x16x16xf32> to vector<2x16xf32>
    %238 = tpu.concatenate %237, %209, %178 in 1 : vector<2x16xf32>, vector<2x16xf32>, vector<2x32xf32> -> vector<2x64xf32>
    %cst_84 = arith.constant dense<0.000000e+00> : vector<2x192xf32>
    %239 = tpu.matmul %238, %20, %cst_84 {dimension_numbers = #tpu.dot_dimension_numbers<[1], [0], [0], [1], [0, 0, 1, 1], [], []>} : vector<2x64xf32>, vector<64x192xf32>, vector<2x192xf32> -> vector<2x192xf32>
    %240 = vector.broadcast %21 : vector<1x192xf32> to vector<2x192xf32>
    %241 = arith.addf %239, %240 : vector<2x192xf32>
    %242 = vector.extract_strided_slice %241 {offsets = [0, 0], sizes = [2, 96], strides = [1, 1]} : vector<2x192xf32> to vector<2x96xf32>
    %243 = vector.extract_strided_slice %241 {offsets = [0, 96], sizes = [2, 96], strides = [1, 1]} : vector<2x192xf32> to vector<2x96xf32>
    %244 = vector.extract_strided_slice %242 {offsets = [0, 0], sizes = [2, 32], strides = [1, 1]} : vector<2x96xf32> to vector<2x32xf32>
    %245 = vector.extract_strided_slice %242 {offsets = [0, 32], sizes = [2, 32], strides = [1, 1]} : vector<2x96xf32> to vector<2x32xf32>
    %246 = vector.extract_strided_slice %242 {offsets = [0, 64], sizes = [2, 32], strides = [1, 1]} : vector<2x96xf32> to vector<2x32xf32>
    %247 = vector.extract_strided_slice %243 {offsets = [0, 0], sizes = [2, 32], strides = [1, 1]} : vector<2x96xf32> to vector<2x32xf32>
    %248 = vector.extract_strided_slice %243 {offsets = [0, 32], sizes = [2, 32], strides = [1, 1]} : vector<2x96xf32> to vector<2x32xf32>
    %249 = vector.extract_strided_slice %243 {offsets = [0, 64], sizes = [2, 32], strides = [1, 1]} : vector<2x96xf32> to vector<2x32xf32>
    %250 = arith.addf %244, %247 : vector<2x32xf32>
    %251 = arith.negf %250 : vector<2x32xf32>
    %252 = math.exp %251 : vector<2x32xf32>
    %cst_85 = arith.constant 1.000000e+00 : f32
    %253 = vector.broadcast %cst_85 : f32 to vector<2x32xf32>
    %254 = arith.addf %253, %252 : vector<2x32xf32>
    %255 = arith.divf %253, %254 : vector<2x32xf32>
    %256 = arith.addf %245, %248 : vector<2x32xf32>
    %257 = arith.negf %256 : vector<2x32xf32>
    %258 = math.exp %257 : vector<2x32xf32>
    %cst_86 = arith.constant 1.000000e+00 : f32
    %259 = vector.broadcast %cst_86 : f32 to vector<2x32xf32>
    %260 = arith.addf %259, %258 : vector<2x32xf32>
    %261 = arith.divf %259, %260 : vector<2x32xf32>
    %262 = arith.mulf %255, %249 : vector<2x32xf32>
    %263 = arith.addf %246, %262 : vector<2x32xf32>
    %264 = math.tanh %263 : vector<2x32xf32>
    %cst_87 = arith.constant 1.000000e+00 : f32
    %265 = vector.broadcast %cst_87 : f32 to vector<2x32xf32>
    %266 = arith.subf %265, %261 : vector<2x32xf32>
    %267 = arith.mulf %266, %264 : vector<2x32xf32>
    %268 = arith.mulf %261, %178 : vector<2x32xf32>
    %269 = arith.addf %267, %268 : vector<2x32xf32>
    %cst_88 = arith.constant dense<0.000000e+00> : vector<2x32xf32>
    %270 = tpu.matmul %269, %22, %cst_88 {dimension_numbers = #tpu.dot_dimension_numbers<[1], [0], [0], [1], [0, 0, 1, 1], [], []>} : vector<2x32xf32>, vector<32x32xf32>, vector<2x32xf32> -> vector<2x32xf32>
    %271 = vector.broadcast %23 : vector<1x32xf32> to vector<2x32xf32>
    %272 = arith.addf %270, %271 : vector<2x32xf32>
    %cst_89 = arith.constant dense<0xFF800000> : vector<2xf32>
    %273 = vector.multi_reduction <maximumf>, %272, %cst_89 [1] : vector<2x32xf32> to vector<2xf32>
    %274 = vector.shape_cast %273 : vector<2xf32> to vector<2x1xf32>
    %275 = tpu.iota {dimensions = array<i32: 1>} : vector<2x32xi32>
    %276 = vector.broadcast %274 : vector<2x1xf32> to vector<2x32xf32>
    %277 = arith.cmpf oeq, %272, %276 : vector<2x32xf32>
    %c32_i32_90 = arith.constant 32 : i32
    %278 = vector.broadcast %c32_i32_90 : i32 to vector<2x32xi32>
    %279 = arith.select %277, %275, %278 : vector<2x32xi1>, vector<2x32xi32>
    %cst_91 = arith.constant dense<2147483647> : vector<2xi32>
    %280 = vector.multi_reduction <minsi>, %279, %cst_91 [1] : vector<2x32xi32> to vector<2xi32>
    %281 = vector.shape_cast %280 : vector<2xi32> to vector<2x1xi32>
    %282 = vector.broadcast %274 : vector<2x1xf32> to vector<2x32xf32>
    %283 = arith.subf %272, %282 : vector<2x32xf32>
    %284 = math.exp %283 : vector<2x32xf32>
    %cst_92 = arith.constant dense<0.000000e+00> : vector<2xf32>
    %285 = vector.multi_reduction <add>, %284, %cst_92 [1] : vector<2x32xf32> to vector<2xf32>
    %286 = vector.shape_cast %285 : vector<2xf32> to vector<2x1xf32>
    %287 = math.log %286 : vector<2x1xf32>
    %288 = arith.addf %274, %287 : vector<2x1xf32>
    %289 = vector.broadcast %288 : vector<2x1xf32> to vector<2x32xf32>
    %290 = arith.subf %272, %289 : vector<2x32xf32>
    %291 = arith.mulf %290, %211 : vector<2x32xf32>
    %cst_93 = arith.constant dense<0.000000e+00> : vector<2xf32>
    %292 = vector.multi_reduction <add>, %291, %cst_93 [1] : vector<2x32xf32> to vector<2xf32>
    %293 = vector.shape_cast %292 : vector<2xf32> to vector<2x1xf32>
    %cst_94 = arith.constant dense<0.000000e+00> : vector<1xf32>
    %294 = vector.multi_reduction <add>, %293, %cst_94 [0] : vector<2x1xf32> to vector<1xf32>
    %295 = vector.shape_cast %294 : vector<1xf32> to vector<1x1xf32>
    %cst_95 = arith.constant 5.000000e-01 : f32
    %296 = vector.broadcast %cst_95 : f32 to vector<1x1xf32>
    %297 = arith.mulf %295, %296 : vector<1x1xf32>
    %298 = arith.subf %207, %297 : vector<1x1xf32>
    %c3 = arith.constant 3 : index
    %c0_96 = arith.constant 0 : index
    %c0_97 = arith.constant 0 : index
    %299 = vector.load %arg0[%c3, %c0_96, %c0_97] : memref<8x2x16xf32, #tpu.memory_space<vmem>>, vector<1x2x16xf32>
    %300 = vector.shape_cast %299 : vector<1x2x16xf32> to vector<2x16xf32>
    %c3_98 = arith.constant 3 : index
    %c0_99 = arith.constant 0 : index
    %c0_100 = arith.constant 0 : index
    %301 = vector.load %arg1[%c3_98, %c0_99, %c0_100] : memref<8x2x32xf32, #tpu.memory_space<vmem>>, vector<1x2x32xf32>
    %302 = vector.shape_cast %301 : vector<1x2x32xf32> to vector<2x32xf32>
    %cst_101 = arith.constant dense<0.000000e+00> : vector<2x16xf32>
    %303 = tpu.matmul %269, %16, %cst_101 {dimension_numbers = #tpu.dot_dimension_numbers<[1], [0], [0], [1], [0, 0, 1, 1], [], []>} : vector<2x32xf32>, vector<32x16xf32>, vector<2x16xf32> -> vector<2x16xf32>
    %304 = vector.broadcast %17 : vector<1x16xf32> to vector<2x16xf32>
    %305 = arith.addf %303, %304 : vector<2x16xf32>
    %306 = vector.shape_cast %305 : vector<2x16xf32> to vector<2x1x16xf32>
    %307 = vector.broadcast %306 : vector<2x1x16xf32> to vector<2x16x16xf32>
    %308 = arith.addf %14, %307 : vector<2x16x16xf32>
    %309 = math.tanh %308 : vector<2x16x16xf32>
    %310 = vector.shape_cast %18 : vector<1x16xf32> to vector<1x1x16xf32>
    %311 = vector.broadcast %310 : vector<1x1x16xf32> to vector<2x16x16xf32>
    %312 = arith.mulf %309, %311 : vector<2x16x16xf32>
    %cst_102 = arith.constant dense<0.000000e+00> : vector<2x16xf32>
    %313 = vector.multi_reduction <add>, %312, %cst_102 [2] : vector<2x16x16xf32> to vector<2x16xf32>
    %314 = vector.broadcast %19 : vector<1x1xf32> to vector<2x16xf32>
    %315 = arith.addf %313, %314 : vector<2x16xf32>
    %cst_103 = arith.constant dense<0xFF800000> : vector<2xf32>
    %316 = vector.multi_reduction <maximumf>, %315, %cst_103 [1] : vector<2x16xf32> to vector<2xf32>
    %317 = vector.shape_cast %316 : vector<2xf32> to vector<2x1xf32>
    %318 = vector.broadcast %317 : vector<2x1xf32> to vector<2x16xf32>
    %319 = arith.subf %315, %318 : vector<2x16xf32>
    %320 = math.exp %319 : vector<2x16xf32>
    %cst_104 = arith.constant dense<0.000000e+00> : vector<2xf32>
    %321 = vector.multi_reduction <add>, %320, %cst_104 [1] : vector<2x16xf32> to vector<2xf32>
    %322 = vector.shape_cast %321 : vector<2xf32> to vector<2x1xf32>
    %323 = vector.broadcast %322 : vector<2x1xf32> to vector<2x16xf32>
    %324 = arith.divf %320, %323 : vector<2x16xf32>
    %325 = vector.shape_cast %324 : vector<2x16xf32> to vector<2x16x1xf32>
    %326 = vector.broadcast %325 : vector<2x16x1xf32> to vector<2x16x16xf32>
    %327 = arith.mulf %326, %15 : vector<2x16x16xf32>
    %cst_105 = arith.constant dense<0.000000e+00> : vector<2x16xf32>
    %328 = vector.multi_reduction <add>, %327, %cst_105 [1] : vector<2x16x16xf32> to vector<2x16xf32>
    %329 = tpu.concatenate %328, %300, %269 in 1 : vector<2x16xf32>, vector<2x16xf32>, vector<2x32xf32> -> vector<2x64xf32>
    %cst_106 = arith.constant dense<0.000000e+00> : vector<2x192xf32>
    %330 = tpu.matmul %329, %20, %cst_106 {dimension_numbers = #tpu.dot_dimension_numbers<[1], [0], [0], [1], [0, 0, 1, 1], [], []>} : vector<2x64xf32>, vector<64x192xf32>, vector<2x192xf32> -> vector<2x192xf32>
    %331 = vector.broadcast %21 : vector<1x192xf32> to vector<2x192xf32>
    %332 = arith.addf %330, %331 : vector<2x192xf32>
    %333 = vector.extract_strided_slice %332 {offsets = [0, 0], sizes = [2, 96], strides = [1, 1]} : vector<2x192xf32> to vector<2x96xf32>
    %334 = vector.extract_strided_slice %332 {offsets = [0, 96], sizes = [2, 96], strides = [1, 1]} : vector<2x192xf32> to vector<2x96xf32>
    %335 = vector.extract_strided_slice %333 {offsets = [0, 0], sizes = [2, 32], strides = [1, 1]} : vector<2x96xf32> to vector<2x32xf32>
    %336 = vector.extract_strided_slice %333 {offsets = [0, 32], sizes = [2, 32], strides = [1, 1]} : vector<2x96xf32> to vector<2x32xf32>
    %337 = vector.extract_strided_slice %333 {offsets = [0, 64], sizes = [2, 32], strides = [1, 1]} : vector<2x96xf32> to vector<2x32xf32>
    %338 = vector.extract_strided_slice %334 {offsets = [0, 0], sizes = [2, 32], strides = [1, 1]} : vector<2x96xf32> to vector<2x32xf32>
    %339 = vector.extract_strided_slice %334 {offsets = [0, 32], sizes = [2, 32], strides = [1, 1]} : vector<2x96xf32> to vector<2x32xf32>
    %340 = vector.extract_strided_slice %334 {offsets = [0, 64], sizes = [2, 32], strides = [1, 1]} : vector<2x96xf32> to vector<2x32xf32>
    %341 = arith.addf %335, %338 : vector<2x32xf32>
    %342 = arith.negf %341 : vector<2x32xf32>
    %343 = math.exp %342 : vector<2x32xf32>
    %cst_107 = arith.constant 1.000000e+00 : f32
    %344 = vector.broadcast %cst_107 : f32 to vector<2x32xf32>
    %345 = arith.addf %344, %343 : vector<2x32xf32>
    %346 = arith.divf %344, %345 : vector<2x32xf32>
    %347 = arith.addf %336, %339 : vector<2x32xf32>
    %348 = arith.negf %347 : vector<2x32xf32>
    %349 = math.exp %348 : vector<2x32xf32>
    %cst_108 = arith.constant 1.000000e+00 : f32
    %350 = vector.broadcast %cst_108 : f32 to vector<2x32xf32>
    %351 = arith.addf %350, %349 : vector<2x32xf32>
    %352 = arith.divf %350, %351 : vector<2x32xf32>
    %353 = arith.mulf %346, %340 : vector<2x32xf32>
    %354 = arith.addf %337, %353 : vector<2x32xf32>
    %355 = math.tanh %354 : vector<2x32xf32>
    %cst_109 = arith.constant 1.000000e+00 : f32
    %356 = vector.broadcast %cst_109 : f32 to vector<2x32xf32>
    %357 = arith.subf %356, %352 : vector<2x32xf32>
    %358 = arith.mulf %357, %355 : vector<2x32xf32>
    %359 = arith.mulf %352, %269 : vector<2x32xf32>
    %360 = arith.addf %358, %359 : vector<2x32xf32>
    %cst_110 = arith.constant dense<0.000000e+00> : vector<2x32xf32>
    %361 = tpu.matmul %360, %22, %cst_110 {dimension_numbers = #tpu.dot_dimension_numbers<[1], [0], [0], [1], [0, 0, 1, 1], [], []>} : vector<2x32xf32>, vector<32x32xf32>, vector<2x32xf32> -> vector<2x32xf32>
    %362 = vector.broadcast %23 : vector<1x32xf32> to vector<2x32xf32>
    %363 = arith.addf %361, %362 : vector<2x32xf32>
    %cst_111 = arith.constant dense<0xFF800000> : vector<2xf32>
    %364 = vector.multi_reduction <maximumf>, %363, %cst_111 [1] : vector<2x32xf32> to vector<2xf32>
    %365 = vector.shape_cast %364 : vector<2xf32> to vector<2x1xf32>
    %366 = tpu.iota {dimensions = array<i32: 1>} : vector<2x32xi32>
    %367 = vector.broadcast %365 : vector<2x1xf32> to vector<2x32xf32>
    %368 = arith.cmpf oeq, %363, %367 : vector<2x32xf32>
    %c32_i32_112 = arith.constant 32 : i32
    %369 = vector.broadcast %c32_i32_112 : i32 to vector<2x32xi32>
    %370 = arith.select %368, %366, %369 : vector<2x32xi1>, vector<2x32xi32>
    %cst_113 = arith.constant dense<2147483647> : vector<2xi32>
    %371 = vector.multi_reduction <minsi>, %370, %cst_113 [1] : vector<2x32xi32> to vector<2xi32>
    %372 = vector.shape_cast %371 : vector<2xi32> to vector<2x1xi32>
    %373 = vector.broadcast %365 : vector<2x1xf32> to vector<2x32xf32>
    %374 = arith.subf %363, %373 : vector<2x32xf32>
    %375 = math.exp %374 : vector<2x32xf32>
    %cst_114 = arith.constant dense<0.000000e+00> : vector<2xf32>
    %376 = vector.multi_reduction <add>, %375, %cst_114 [1] : vector<2x32xf32> to vector<2xf32>
    %377 = vector.shape_cast %376 : vector<2xf32> to vector<2x1xf32>
    %378 = math.log %377 : vector<2x1xf32>
    %379 = arith.addf %365, %378 : vector<2x1xf32>
    %380 = vector.broadcast %379 : vector<2x1xf32> to vector<2x32xf32>
    %381 = arith.subf %363, %380 : vector<2x32xf32>
    %382 = arith.mulf %381, %302 : vector<2x32xf32>
    %cst_115 = arith.constant dense<0.000000e+00> : vector<2xf32>
    %383 = vector.multi_reduction <add>, %382, %cst_115 [1] : vector<2x32xf32> to vector<2xf32>
    %384 = vector.shape_cast %383 : vector<2xf32> to vector<2x1xf32>
    %cst_116 = arith.constant dense<0.000000e+00> : vector<1xf32>
    %385 = vector.multi_reduction <add>, %384, %cst_116 [0] : vector<2x1xf32> to vector<1xf32>
    %386 = vector.shape_cast %385 : vector<1xf32> to vector<1x1xf32>
    %cst_117 = arith.constant 5.000000e-01 : f32
    %387 = vector.broadcast %cst_117 : f32 to vector<1x1xf32>
    %388 = arith.mulf %386, %387 : vector<1x1xf32>
    %389 = arith.subf %298, %388 : vector<1x1xf32>
    %c4 = arith.constant 4 : index
    %c0_118 = arith.constant 0 : index
    %c0_119 = arith.constant 0 : index
    %390 = vector.load %arg0[%c4, %c0_118, %c0_119] : memref<8x2x16xf32, #tpu.memory_space<vmem>>, vector<1x2x16xf32>
    %391 = vector.shape_cast %390 : vector<1x2x16xf32> to vector<2x16xf32>
    %c4_120 = arith.constant 4 : index
    %c0_121 = arith.constant 0 : index
    %c0_122 = arith.constant 0 : index
    %392 = vector.load %arg1[%c4_120, %c0_121, %c0_122] : memref<8x2x32xf32, #tpu.memory_space<vmem>>, vector<1x2x32xf32>
    %393 = vector.shape_cast %392 : vector<1x2x32xf32> to vector<2x32xf32>
    %cst_123 = arith.constant dense<0.000000e+00> : vector<2x16xf32>
    %394 = tpu.matmul %360, %16, %cst_123 {dimension_numbers = #tpu.dot_dimension_numbers<[1], [0], [0], [1], [0, 0, 1, 1], [], []>} : vector<2x32xf32>, vector<32x16xf32>, vector<2x16xf32> -> vector<2x16xf32>
    %395 = vector.broadcast %17 : vector<1x16xf32> to vector<2x16xf32>
    %396 = arith.addf %394, %395 : vector<2x16xf32>
    %397 = vector.shape_cast %396 : vector<2x16xf32> to vector<2x1x16xf32>
    %398 = vector.broadcast %397 : vector<2x1x16xf32> to vector<2x16x16xf32>
    %399 = arith.addf %14, %398 : vector<2x16x16xf32>
    %400 = math.tanh %399 : vector<2x16x16xf32>
    %401 = vector.shape_cast %18 : vector<1x16xf32> to vector<1x1x16xf32>
    %402 = vector.broadcast %401 : vector<1x1x16xf32> to vector<2x16x16xf32>
    %403 = arith.mulf %400, %402 : vector<2x16x16xf32>
    %cst_124 = arith.constant dense<0.000000e+00> : vector<2x16xf32>
    %404 = vector.multi_reduction <add>, %403, %cst_124 [2] : vector<2x16x16xf32> to vector<2x16xf32>
    %405 = vector.broadcast %19 : vector<1x1xf32> to vector<2x16xf32>
    %406 = arith.addf %404, %405 : vector<2x16xf32>
    %cst_125 = arith.constant dense<0xFF800000> : vector<2xf32>
    %407 = vector.multi_reduction <maximumf>, %406, %cst_125 [1] : vector<2x16xf32> to vector<2xf32>
    %408 = vector.shape_cast %407 : vector<2xf32> to vector<2x1xf32>
    %409 = vector.broadcast %408 : vector<2x1xf32> to vector<2x16xf32>
    %410 = arith.subf %406, %409 : vector<2x16xf32>
    %411 = math.exp %410 : vector<2x16xf32>
    %cst_126 = arith.constant dense<0.000000e+00> : vector<2xf32>
    %412 = vector.multi_reduction <add>, %411, %cst_126 [1] : vector<2x16xf32> to vector<2xf32>
    %413 = vector.shape_cast %412 : vector<2xf32> to vector<2x1xf32>
    %414 = vector.broadcast %413 : vector<2x1xf32> to vector<2x16xf32>
    %415 = arith.divf %411, %414 : vector<2x16xf32>
    %416 = vector.shape_cast %415 : vector<2x16xf32> to vector<2x16x1xf32>
    %417 = vector.broadcast %416 : vector<2x16x1xf32> to vector<2x16x16xf32>
    %418 = arith.mulf %417, %15 : vector<2x16x16xf32>
    %cst_127 = arith.constant dense<0.000000e+00> : vector<2x16xf32>
    %419 = vector.multi_reduction <add>, %418, %cst_127 [1] : vector<2x16x16xf32> to vector<2x16xf32>
    %420 = tpu.concatenate %419, %391, %360 in 1 : vector<2x16xf32>, vector<2x16xf32>, vector<2x32xf32> -> vector<2x64xf32>
    %cst_128 = arith.constant dense<0.000000e+00> : vector<2x192xf32>
    %421 = tpu.matmul %420, %20, %cst_128 {dimension_numbers = #tpu.dot_dimension_numbers<[1], [0], [0], [1], [0, 0, 1, 1], [], []>} : vector<2x64xf32>, vector<64x192xf32>, vector<2x192xf32> -> vector<2x192xf32>
    %422 = vector.broadcast %21 : vector<1x192xf32> to vector<2x192xf32>
    %423 = arith.addf %421, %422 : vector<2x192xf32>
    %424 = vector.extract_strided_slice %423 {offsets = [0, 0], sizes = [2, 96], strides = [1, 1]} : vector<2x192xf32> to vector<2x96xf32>
    %425 = vector.extract_strided_slice %423 {offsets = [0, 96], sizes = [2, 96], strides = [1, 1]} : vector<2x192xf32> to vector<2x96xf32>
    %426 = vector.extract_strided_slice %424 {offsets = [0, 0], sizes = [2, 32], strides = [1, 1]} : vector<2x96xf32> to vector<2x32xf32>
    %427 = vector.extract_strided_slice %424 {offsets = [0, 32], sizes = [2, 32], strides = [1, 1]} : vector<2x96xf32> to vector<2x32xf32>
    %428 = vector.extract_strided_slice %424 {offsets = [0, 64], sizes = [2, 32], strides = [1, 1]} : vector<2x96xf32> to vector<2x32xf32>
    %429 = vector.extract_strided_slice %425 {offsets = [0, 0], sizes = [2, 32], strides = [1, 1]} : vector<2x96xf32> to vector<2x32xf32>
    %430 = vector.extract_strided_slice %425 {offsets = [0, 32], sizes = [2, 32], strides = [1, 1]} : vector<2x96xf32> to vector<2x32xf32>
    %431 = vector.extract_strided_slice %425 {offsets = [0, 64], sizes = [2, 32], strides = [1, 1]} : vector<2x96xf32> to vector<2x32xf32>
    %432 = arith.addf %426, %429 : vector<2x32xf32>
    %433 = arith.negf %432 : vector<2x32xf32>
    %434 = math.exp %433 : vector<2x32xf32>
    %cst_129 = arith.constant 1.000000e+00 : f32
    %435 = vector.broadcast %cst_129 : f32 to vector<2x32xf32>
    %436 = arith.addf %435, %434 : vector<2x32xf32>
    %437 = arith.divf %435, %436 : vector<2x32xf32>
    %438 = arith.addf %427, %430 : vector<2x32xf32>
    %439 = arith.negf %438 : vector<2x32xf32>
    %440 = math.exp %439 : vector<2x32xf32>
    %cst_130 = arith.constant 1.000000e+00 : f32
    %441 = vector.broadcast %cst_130 : f32 to vector<2x32xf32>
    %442 = arith.addf %441, %440 : vector<2x32xf32>
    %443 = arith.divf %441, %442 : vector<2x32xf32>
    %444 = arith.mulf %437, %431 : vector<2x32xf32>
    %445 = arith.addf %428, %444 : vector<2x32xf32>
    %446 = math.tanh %445 : vector<2x32xf32>
    %cst_131 = arith.constant 1.000000e+00 : f32
    %447 = vector.broadcast %cst_131 : f32 to vector<2x32xf32>
    %448 = arith.subf %447, %443 : vector<2x32xf32>
    %449 = arith.mulf %448, %446 : vector<2x32xf32>
    %450 = arith.mulf %443, %360 : vector<2x32xf32>
    %451 = arith.addf %449, %450 : vector<2x32xf32>
    %cst_132 = arith.constant dense<0.000000e+00> : vector<2x32xf32>
    %452 = tpu.matmul %451, %22, %cst_132 {dimension_numbers = #tpu.dot_dimension_numbers<[1], [0], [0], [1], [0, 0, 1, 1], [], []>} : vector<2x32xf32>, vector<32x32xf32>, vector<2x32xf32> -> vector<2x32xf32>
    %453 = vector.broadcast %23 : vector<1x32xf32> to vector<2x32xf32>
    %454 = arith.addf %452, %453 : vector<2x32xf32>
    %cst_133 = arith.constant dense<0xFF800000> : vector<2xf32>
    %455 = vector.multi_reduction <maximumf>, %454, %cst_133 [1] : vector<2x32xf32> to vector<2xf32>
    %456 = vector.shape_cast %455 : vector<2xf32> to vector<2x1xf32>
    %457 = tpu.iota {dimensions = array<i32: 1>} : vector<2x32xi32>
    %458 = vector.broadcast %456 : vector<2x1xf32> to vector<2x32xf32>
    %459 = arith.cmpf oeq, %454, %458 : vector<2x32xf32>
    %c32_i32_134 = arith.constant 32 : i32
    %460 = vector.broadcast %c32_i32_134 : i32 to vector<2x32xi32>
    %461 = arith.select %459, %457, %460 : vector<2x32xi1>, vector<2x32xi32>
    %cst_135 = arith.constant dense<2147483647> : vector<2xi32>
    %462 = vector.multi_reduction <minsi>, %461, %cst_135 [1] : vector<2x32xi32> to vector<2xi32>
    %463 = vector.shape_cast %462 : vector<2xi32> to vector<2x1xi32>
    %464 = vector.broadcast %456 : vector<2x1xf32> to vector<2x32xf32>
    %465 = arith.subf %454, %464 : vector<2x32xf32>
    %466 = math.exp %465 : vector<2x32xf32>
    %cst_136 = arith.constant dense<0.000000e+00> : vector<2xf32>
    %467 = vector.multi_reduction <add>, %466, %cst_136 [1] : vector<2x32xf32> to vector<2xf32>
    %468 = vector.shape_cast %467 : vector<2xf32> to vector<2x1xf32>
    %469 = math.log %468 : vector<2x1xf32>
    %470 = arith.addf %456, %469 : vector<2x1xf32>
    %471 = vector.broadcast %470 : vector<2x1xf32> to vector<2x32xf32>
    %472 = arith.subf %454, %471 : vector<2x32xf32>
    %473 = arith.mulf %472, %393 : vector<2x32xf32>
    %cst_137 = arith.constant dense<0.000000e+00> : vector<2xf32>
    %474 = vector.multi_reduction <add>, %473, %cst_137 [1] : vector<2x32xf32> to vector<2xf32>
    %475 = vector.shape_cast %474 : vector<2xf32> to vector<2x1xf32>
    %cst_138 = arith.constant dense<0.000000e+00> : vector<1xf32>
    %476 = vector.multi_reduction <add>, %475, %cst_138 [0] : vector<2x1xf32> to vector<1xf32>
    %477 = vector.shape_cast %476 : vector<1xf32> to vector<1x1xf32>
    %cst_139 = arith.constant 5.000000e-01 : f32
    %478 = vector.broadcast %cst_139 : f32 to vector<1x1xf32>
    %479 = arith.mulf %477, %478 : vector<1x1xf32>
    %480 = arith.subf %389, %479 : vector<1x1xf32>
    %c5 = arith.constant 5 : index
    %c0_140 = arith.constant 0 : index
    %c0_141 = arith.constant 0 : index
    %481 = vector.load %arg0[%c5, %c0_140, %c0_141] : memref<8x2x16xf32, #tpu.memory_space<vmem>>, vector<1x2x16xf32>
    %482 = vector.shape_cast %481 : vector<1x2x16xf32> to vector<2x16xf32>
    %c5_142 = arith.constant 5 : index
    %c0_143 = arith.constant 0 : index
    %c0_144 = arith.constant 0 : index
    %483 = vector.load %arg1[%c5_142, %c0_143, %c0_144] : memref<8x2x32xf32, #tpu.memory_space<vmem>>, vector<1x2x32xf32>
    %484 = vector.shape_cast %483 : vector<1x2x32xf32> to vector<2x32xf32>
    %cst_145 = arith.constant dense<0.000000e+00> : vector<2x16xf32>
    %485 = tpu.matmul %451, %16, %cst_145 {dimension_numbers = #tpu.dot_dimension_numbers<[1], [0], [0], [1], [0, 0, 1, 1], [], []>} : vector<2x32xf32>, vector<32x16xf32>, vector<2x16xf32> -> vector<2x16xf32>
    %486 = vector.broadcast %17 : vector<1x16xf32> to vector<2x16xf32>
    %487 = arith.addf %485, %486 : vector<2x16xf32>
    %488 = vector.shape_cast %487 : vector<2x16xf32> to vector<2x1x16xf32>
    %489 = vector.broadcast %488 : vector<2x1x16xf32> to vector<2x16x16xf32>
    %490 = arith.addf %14, %489 : vector<2x16x16xf32>
    %491 = math.tanh %490 : vector<2x16x16xf32>
    %492 = vector.shape_cast %18 : vector<1x16xf32> to vector<1x1x16xf32>
    %493 = vector.broadcast %492 : vector<1x1x16xf32> to vector<2x16x16xf32>
    %494 = arith.mulf %491, %493 : vector<2x16x16xf32>
    %cst_146 = arith.constant dense<0.000000e+00> : vector<2x16xf32>
    %495 = vector.multi_reduction <add>, %494, %cst_146 [2] : vector<2x16x16xf32> to vector<2x16xf32>
    %496 = vector.broadcast %19 : vector<1x1xf32> to vector<2x16xf32>
    %497 = arith.addf %495, %496 : vector<2x16xf32>
    %cst_147 = arith.constant dense<0xFF800000> : vector<2xf32>
    %498 = vector.multi_reduction <maximumf>, %497, %cst_147 [1] : vector<2x16xf32> to vector<2xf32>
    %499 = vector.shape_cast %498 : vector<2xf32> to vector<2x1xf32>
    %500 = vector.broadcast %499 : vector<2x1xf32> to vector<2x16xf32>
    %501 = arith.subf %497, %500 : vector<2x16xf32>
    %502 = math.exp %501 : vector<2x16xf32>
    %cst_148 = arith.constant dense<0.000000e+00> : vector<2xf32>
    %503 = vector.multi_reduction <add>, %502, %cst_148 [1] : vector<2x16xf32> to vector<2xf32>
    %504 = vector.shape_cast %503 : vector<2xf32> to vector<2x1xf32>
    %505 = vector.broadcast %504 : vector<2x1xf32> to vector<2x16xf32>
    %506 = arith.divf %502, %505 : vector<2x16xf32>
    %507 = vector.shape_cast %506 : vector<2x16xf32> to vector<2x16x1xf32>
    %508 = vector.broadcast %507 : vector<2x16x1xf32> to vector<2x16x16xf32>
    %509 = arith.mulf %508, %15 : vector<2x16x16xf32>
    %cst_149 = arith.constant dense<0.000000e+00> : vector<2x16xf32>
    %510 = vector.multi_reduction <add>, %509, %cst_149 [1] : vector<2x16x16xf32> to vector<2x16xf32>
    %511 = tpu.concatenate %510, %482, %451 in 1 : vector<2x16xf32>, vector<2x16xf32>, vector<2x32xf32> -> vector<2x64xf32>
    %cst_150 = arith.constant dense<0.000000e+00> : vector<2x192xf32>
    %512 = tpu.matmul %511, %20, %cst_150 {dimension_numbers = #tpu.dot_dimension_numbers<[1], [0], [0], [1], [0, 0, 1, 1], [], []>} : vector<2x64xf32>, vector<64x192xf32>, vector<2x192xf32> -> vector<2x192xf32>
    %513 = vector.broadcast %21 : vector<1x192xf32> to vector<2x192xf32>
    %514 = arith.addf %512, %513 : vector<2x192xf32>
    %515 = vector.extract_strided_slice %514 {offsets = [0, 0], sizes = [2, 96], strides = [1, 1]} : vector<2x192xf32> to vector<2x96xf32>
    %516 = vector.extract_strided_slice %514 {offsets = [0, 96], sizes = [2, 96], strides = [1, 1]} : vector<2x192xf32> to vector<2x96xf32>
    %517 = vector.extract_strided_slice %515 {offsets = [0, 0], sizes = [2, 32], strides = [1, 1]} : vector<2x96xf32> to vector<2x32xf32>
    %518 = vector.extract_strided_slice %515 {offsets = [0, 32], sizes = [2, 32], strides = [1, 1]} : vector<2x96xf32> to vector<2x32xf32>
    %519 = vector.extract_strided_slice %515 {offsets = [0, 64], sizes = [2, 32], strides = [1, 1]} : vector<2x96xf32> to vector<2x32xf32>
    %520 = vector.extract_strided_slice %516 {offsets = [0, 0], sizes = [2, 32], strides = [1, 1]} : vector<2x96xf32> to vector<2x32xf32>
    %521 = vector.extract_strided_slice %516 {offsets = [0, 32], sizes = [2, 32], strides = [1, 1]} : vector<2x96xf32> to vector<2x32xf32>
    %522 = vector.extract_strided_slice %516 {offsets = [0, 64], sizes = [2, 32], strides = [1, 1]} : vector<2x96xf32> to vector<2x32xf32>
    %523 = arith.addf %517, %520 : vector<2x32xf32>
    %524 = arith.negf %523 : vector<2x32xf32>
    %525 = math.exp %524 : vector<2x32xf32>
    %cst_151 = arith.constant 1.000000e+00 : f32
    %526 = vector.broadcast %cst_151 : f32 to vector<2x32xf32>
    %527 = arith.addf %526, %525 : vector<2x32xf32>
    %528 = arith.divf %526, %527 : vector<2x32xf32>
    %529 = arith.addf %518, %521 : vector<2x32xf32>
    %530 = arith.negf %529 : vector<2x32xf32>
    %531 = math.exp %530 : vector<2x32xf32>
    %cst_152 = arith.constant 1.000000e+00 : f32
    %532 = vector.broadcast %cst_152 : f32 to vector<2x32xf32>
    %533 = arith.addf %532, %531 : vector<2x32xf32>
    %534 = arith.divf %532, %533 : vector<2x32xf32>
    %535 = arith.mulf %528, %522 : vector<2x32xf32>
    %536 = arith.addf %519, %535 : vector<2x32xf32>
    %537 = math.tanh %536 : vector<2x32xf32>
    %cst_153 = arith.constant 1.000000e+00 : f32
    %538 = vector.broadcast %cst_153 : f32 to vector<2x32xf32>
    %539 = arith.subf %538, %534 : vector<2x32xf32>
    %540 = arith.mulf %539, %537 : vector<2x32xf32>
    %541 = arith.mulf %534, %451 : vector<2x32xf32>
    %542 = arith.addf %540, %541 : vector<2x32xf32>
    %cst_154 = arith.constant dense<0.000000e+00> : vector<2x32xf32>
    %543 = tpu.matmul %542, %22, %cst_154 {dimension_numbers = #tpu.dot_dimension_numbers<[1], [0], [0], [1], [0, 0, 1, 1], [], []>} : vector<2x32xf32>, vector<32x32xf32>, vector<2x32xf32> -> vector<2x32xf32>
    %544 = vector.broadcast %23 : vector<1x32xf32> to vector<2x32xf32>
    %545 = arith.addf %543, %544 : vector<2x32xf32>
    %cst_155 = arith.constant dense<0xFF800000> : vector<2xf32>
    %546 = vector.multi_reduction <maximumf>, %545, %cst_155 [1] : vector<2x32xf32> to vector<2xf32>
    %547 = vector.shape_cast %546 : vector<2xf32> to vector<2x1xf32>
    %548 = tpu.iota {dimensions = array<i32: 1>} : vector<2x32xi32>
    %549 = vector.broadcast %547 : vector<2x1xf32> to vector<2x32xf32>
    %550 = arith.cmpf oeq, %545, %549 : vector<2x32xf32>
    %c32_i32_156 = arith.constant 32 : i32
    %551 = vector.broadcast %c32_i32_156 : i32 to vector<2x32xi32>
    %552 = arith.select %550, %548, %551 : vector<2x32xi1>, vector<2x32xi32>
    %cst_157 = arith.constant dense<2147483647> : vector<2xi32>
    %553 = vector.multi_reduction <minsi>, %552, %cst_157 [1] : vector<2x32xi32> to vector<2xi32>
    %554 = vector.shape_cast %553 : vector<2xi32> to vector<2x1xi32>
    %555 = vector.broadcast %547 : vector<2x1xf32> to vector<2x32xf32>
    %556 = arith.subf %545, %555 : vector<2x32xf32>
    %557 = math.exp %556 : vector<2x32xf32>
    %cst_158 = arith.constant dense<0.000000e+00> : vector<2xf32>
    %558 = vector.multi_reduction <add>, %557, %cst_158 [1] : vector<2x32xf32> to vector<2xf32>
    %559 = vector.shape_cast %558 : vector<2xf32> to vector<2x1xf32>
    %560 = math.log %559 : vector<2x1xf32>
    %561 = arith.addf %547, %560 : vector<2x1xf32>
    %562 = vector.broadcast %561 : vector<2x1xf32> to vector<2x32xf32>
    %563 = arith.subf %545, %562 : vector<2x32xf32>
    %564 = arith.mulf %563, %484 : vector<2x32xf32>
    %cst_159 = arith.constant dense<0.000000e+00> : vector<2xf32>
    %565 = vector.multi_reduction <add>, %564, %cst_159 [1] : vector<2x32xf32> to vector<2xf32>
    %566 = vector.shape_cast %565 : vector<2xf32> to vector<2x1xf32>
    %cst_160 = arith.constant dense<0.000000e+00> : vector<1xf32>
    %567 = vector.multi_reduction <add>, %566, %cst_160 [0] : vector<2x1xf32> to vector<1xf32>
    %568 = vector.shape_cast %567 : vector<1xf32> to vector<1x1xf32>
    %cst_161 = arith.constant 5.000000e-01 : f32
    %569 = vector.broadcast %cst_161 : f32 to vector<1x1xf32>
    %570 = arith.mulf %568, %569 : vector<1x1xf32>
    %571 = arith.subf %480, %570 : vector<1x1xf32>
    %c6 = arith.constant 6 : index
    %c0_162 = arith.constant 0 : index
    %c0_163 = arith.constant 0 : index
    %572 = vector.load %arg0[%c6, %c0_162, %c0_163] : memref<8x2x16xf32, #tpu.memory_space<vmem>>, vector<1x2x16xf32>
    %573 = vector.shape_cast %572 : vector<1x2x16xf32> to vector<2x16xf32>
    %c6_164 = arith.constant 6 : index
    %c0_165 = arith.constant 0 : index
    %c0_166 = arith.constant 0 : index
    %574 = vector.load %arg1[%c6_164, %c0_165, %c0_166] : memref<8x2x32xf32, #tpu.memory_space<vmem>>, vector<1x2x32xf32>
    %575 = vector.shape_cast %574 : vector<1x2x32xf32> to vector<2x32xf32>
    %cst_167 = arith.constant dense<0.000000e+00> : vector<2x16xf32>
    %576 = tpu.matmul %542, %16, %cst_167 {dimension_numbers = #tpu.dot_dimension_numbers<[1], [0], [0], [1], [0, 0, 1, 1], [], []>} : vector<2x32xf32>, vector<32x16xf32>, vector<2x16xf32> -> vector<2x16xf32>
    %577 = vector.broadcast %17 : vector<1x16xf32> to vector<2x16xf32>
    %578 = arith.addf %576, %577 : vector<2x16xf32>
    %579 = vector.shape_cast %578 : vector<2x16xf32> to vector<2x1x16xf32>
    %580 = vector.broadcast %579 : vector<2x1x16xf32> to vector<2x16x16xf32>
    %581 = arith.addf %14, %580 : vector<2x16x16xf32>
    %582 = math.tanh %581 : vector<2x16x16xf32>
    %583 = vector.shape_cast %18 : vector<1x16xf32> to vector<1x1x16xf32>
    %584 = vector.broadcast %583 : vector<1x1x16xf32> to vector<2x16x16xf32>
    %585 = arith.mulf %582, %584 : vector<2x16x16xf32>
    %cst_168 = arith.constant dense<0.000000e+00> : vector<2x16xf32>
    %586 = vector.multi_reduction <add>, %585, %cst_168 [2] : vector<2x16x16xf32> to vector<2x16xf32>
    %587 = vector.broadcast %19 : vector<1x1xf32> to vector<2x16xf32>
    %588 = arith.addf %586, %587 : vector<2x16xf32>
    %cst_169 = arith.constant dense<0xFF800000> : vector<2xf32>
    %589 = vector.multi_reduction <maximumf>, %588, %cst_169 [1] : vector<2x16xf32> to vector<2xf32>
    %590 = vector.shape_cast %589 : vector<2xf32> to vector<2x1xf32>
    %591 = vector.broadcast %590 : vector<2x1xf32> to vector<2x16xf32>
    %592 = arith.subf %588, %591 : vector<2x16xf32>
    %593 = math.exp %592 : vector<2x16xf32>
    %cst_170 = arith.constant dense<0.000000e+00> : vector<2xf32>
    %594 = vector.multi_reduction <add>, %593, %cst_170 [1] : vector<2x16xf32> to vector<2xf32>
    %595 = vector.shape_cast %594 : vector<2xf32> to vector<2x1xf32>
    %596 = vector.broadcast %595 : vector<2x1xf32> to vector<2x16xf32>
    %597 = arith.divf %593, %596 : vector<2x16xf32>
    %598 = vector.shape_cast %597 : vector<2x16xf32> to vector<2x16x1xf32>
    %599 = vector.broadcast %598 : vector<2x16x1xf32> to vector<2x16x16xf32>
    %600 = arith.mulf %599, %15 : vector<2x16x16xf32>
    %cst_171 = arith.constant dense<0.000000e+00> : vector<2x16xf32>
    %601 = vector.multi_reduction <add>, %600, %cst_171 [1] : vector<2x16x16xf32> to vector<2x16xf32>
    %602 = tpu.concatenate %601, %573, %542 in 1 : vector<2x16xf32>, vector<2x16xf32>, vector<2x32xf32> -> vector<2x64xf32>
    %cst_172 = arith.constant dense<0.000000e+00> : vector<2x192xf32>
    %603 = tpu.matmul %602, %20, %cst_172 {dimension_numbers = #tpu.dot_dimension_numbers<[1], [0], [0], [1], [0, 0, 1, 1], [], []>} : vector<2x64xf32>, vector<64x192xf32>, vector<2x192xf32> -> vector<2x192xf32>
    %604 = vector.broadcast %21 : vector<1x192xf32> to vector<2x192xf32>
    %605 = arith.addf %603, %604 : vector<2x192xf32>
    %606 = vector.extract_strided_slice %605 {offsets = [0, 0], sizes = [2, 96], strides = [1, 1]} : vector<2x192xf32> to vector<2x96xf32>
    %607 = vector.extract_strided_slice %605 {offsets = [0, 96], sizes = [2, 96], strides = [1, 1]} : vector<2x192xf32> to vector<2x96xf32>
    %608 = vector.extract_strided_slice %606 {offsets = [0, 0], sizes = [2, 32], strides = [1, 1]} : vector<2x96xf32> to vector<2x32xf32>
    %609 = vector.extract_strided_slice %606 {offsets = [0, 32], sizes = [2, 32], strides = [1, 1]} : vector<2x96xf32> to vector<2x32xf32>
    %610 = vector.extract_strided_slice %606 {offsets = [0, 64], sizes = [2, 32], strides = [1, 1]} : vector<2x96xf32> to vector<2x32xf32>
    %611 = vector.extract_strided_slice %607 {offsets = [0, 0], sizes = [2, 32], strides = [1, 1]} : vector<2x96xf32> to vector<2x32xf32>
    %612 = vector.extract_strided_slice %607 {offsets = [0, 32], sizes = [2, 32], strides = [1, 1]} : vector<2x96xf32> to vector<2x32xf32>
    %613 = vector.extract_strided_slice %607 {offsets = [0, 64], sizes = [2, 32], strides = [1, 1]} : vector<2x96xf32> to vector<2x32xf32>
    %614 = arith.addf %608, %611 : vector<2x32xf32>
    %615 = arith.negf %614 : vector<2x32xf32>
    %616 = math.exp %615 : vector<2x32xf32>
    %cst_173 = arith.constant 1.000000e+00 : f32
    %617 = vector.broadcast %cst_173 : f32 to vector<2x32xf32>
    %618 = arith.addf %617, %616 : vector<2x32xf32>
    %619 = arith.divf %617, %618 : vector<2x32xf32>
    %620 = arith.addf %609, %612 : vector<2x32xf32>
    %621 = arith.negf %620 : vector<2x32xf32>
    %622 = math.exp %621 : vector<2x32xf32>
    %cst_174 = arith.constant 1.000000e+00 : f32
    %623 = vector.broadcast %cst_174 : f32 to vector<2x32xf32>
    %624 = arith.addf %623, %622 : vector<2x32xf32>
    %625 = arith.divf %623, %624 : vector<2x32xf32>
    %626 = arith.mulf %619, %613 : vector<2x32xf32>
    %627 = arith.addf %610, %626 : vector<2x32xf32>
    %628 = math.tanh %627 : vector<2x32xf32>
    %cst_175 = arith.constant 1.000000e+00 : f32
    %629 = vector.broadcast %cst_175 : f32 to vector<2x32xf32>
    %630 = arith.subf %629, %625 : vector<2x32xf32>
    %631 = arith.mulf %630, %628 : vector<2x32xf32>
    %632 = arith.mulf %625, %542 : vector<2x32xf32>
    %633 = arith.addf %631, %632 : vector<2x32xf32>
    %cst_176 = arith.constant dense<0.000000e+00> : vector<2x32xf32>
    %634 = tpu.matmul %633, %22, %cst_176 {dimension_numbers = #tpu.dot_dimension_numbers<[1], [0], [0], [1], [0, 0, 1, 1], [], []>} : vector<2x32xf32>, vector<32x32xf32>, vector<2x32xf32> -> vector<2x32xf32>
    %635 = vector.broadcast %23 : vector<1x32xf32> to vector<2x32xf32>
    %636 = arith.addf %634, %635 : vector<2x32xf32>
    %cst_177 = arith.constant dense<0xFF800000> : vector<2xf32>
    %637 = vector.multi_reduction <maximumf>, %636, %cst_177 [1] : vector<2x32xf32> to vector<2xf32>
    %638 = vector.shape_cast %637 : vector<2xf32> to vector<2x1xf32>
    %639 = tpu.iota {dimensions = array<i32: 1>} : vector<2x32xi32>
    %640 = vector.broadcast %638 : vector<2x1xf32> to vector<2x32xf32>
    %641 = arith.cmpf oeq, %636, %640 : vector<2x32xf32>
    %c32_i32_178 = arith.constant 32 : i32
    %642 = vector.broadcast %c32_i32_178 : i32 to vector<2x32xi32>
    %643 = arith.select %641, %639, %642 : vector<2x32xi1>, vector<2x32xi32>
    %cst_179 = arith.constant dense<2147483647> : vector<2xi32>
    %644 = vector.multi_reduction <minsi>, %643, %cst_179 [1] : vector<2x32xi32> to vector<2xi32>
    %645 = vector.shape_cast %644 : vector<2xi32> to vector<2x1xi32>
    %646 = vector.broadcast %638 : vector<2x1xf32> to vector<2x32xf32>
    %647 = arith.subf %636, %646 : vector<2x32xf32>
    %648 = math.exp %647 : vector<2x32xf32>
    %cst_180 = arith.constant dense<0.000000e+00> : vector<2xf32>
    %649 = vector.multi_reduction <add>, %648, %cst_180 [1] : vector<2x32xf32> to vector<2xf32>
    %650 = vector.shape_cast %649 : vector<2xf32> to vector<2x1xf32>
    %651 = math.log %650 : vector<2x1xf32>
    %652 = arith.addf %638, %651 : vector<2x1xf32>
    %653 = vector.broadcast %652 : vector<2x1xf32> to vector<2x32xf32>
    %654 = arith.subf %636, %653 : vector<2x32xf32>
    %655 = arith.mulf %654, %575 : vector<2x32xf32>
    %cst_181 = arith.constant dense<0.000000e+00> : vector<2xf32>
    %656 = vector.multi_reduction <add>, %655, %cst_181 [1] : vector<2x32xf32> to vector<2xf32>
    %657 = vector.shape_cast %656 : vector<2xf32> to vector<2x1xf32>
    %cst_182 = arith.constant dense<0.000000e+00> : vector<1xf32>
    %658 = vector.multi_reduction <add>, %657, %cst_182 [0] : vector<2x1xf32> to vector<1xf32>
    %659 = vector.shape_cast %658 : vector<1xf32> to vector<1x1xf32>
    %cst_183 = arith.constant 5.000000e-01 : f32
    %660 = vector.broadcast %cst_183 : f32 to vector<1x1xf32>
    %661 = arith.mulf %659, %660 : vector<1x1xf32>
    %662 = arith.subf %571, %661 : vector<1x1xf32>
    %c7 = arith.constant 7 : index
    %c0_184 = arith.constant 0 : index
    %c0_185 = arith.constant 0 : index
    %663 = vector.load %arg0[%c7, %c0_184, %c0_185] : memref<8x2x16xf32, #tpu.memory_space<vmem>>, vector<1x2x16xf32>
    %664 = vector.shape_cast %663 : vector<1x2x16xf32> to vector<2x16xf32>
    %c7_186 = arith.constant 7 : index
    %c0_187 = arith.constant 0 : index
    %c0_188 = arith.constant 0 : index
    %665 = vector.load %arg1[%c7_186, %c0_187, %c0_188] : memref<8x2x32xf32, #tpu.memory_space<vmem>>, vector<1x2x32xf32>
    %666 = vector.shape_cast %665 : vector<1x2x32xf32> to vector<2x32xf32>
    %cst_189 = arith.constant dense<0.000000e+00> : vector<2x16xf32>
    %667 = tpu.matmul %633, %16, %cst_189 {dimension_numbers = #tpu.dot_dimension_numbers<[1], [0], [0], [1], [0, 0, 1, 1], [], []>} : vector<2x32xf32>, vector<32x16xf32>, vector<2x16xf32> -> vector<2x16xf32>
    %668 = vector.broadcast %17 : vector<1x16xf32> to vector<2x16xf32>
    %669 = arith.addf %667, %668 : vector<2x16xf32>
    %670 = vector.shape_cast %669 : vector<2x16xf32> to vector<2x1x16xf32>
    %671 = vector.broadcast %670 : vector<2x1x16xf32> to vector<2x16x16xf32>
    %672 = arith.addf %14, %671 : vector<2x16x16xf32>
    %673 = math.tanh %672 : vector<2x16x16xf32>
    %674 = vector.shape_cast %18 : vector<1x16xf32> to vector<1x1x16xf32>
    %675 = vector.broadcast %674 : vector<1x1x16xf32> to vector<2x16x16xf32>
    %676 = arith.mulf %673, %675 : vector<2x16x16xf32>
    %cst_190 = arith.constant dense<0.000000e+00> : vector<2x16xf32>
    %677 = vector.multi_reduction <add>, %676, %cst_190 [2] : vector<2x16x16xf32> to vector<2x16xf32>
    %678 = vector.broadcast %19 : vector<1x1xf32> to vector<2x16xf32>
    %679 = arith.addf %677, %678 : vector<2x16xf32>
    %cst_191 = arith.constant dense<0xFF800000> : vector<2xf32>
    %680 = vector.multi_reduction <maximumf>, %679, %cst_191 [1] : vector<2x16xf32> to vector<2xf32>
    %681 = vector.shape_cast %680 : vector<2xf32> to vector<2x1xf32>
    %682 = vector.broadcast %681 : vector<2x1xf32> to vector<2x16xf32>
    %683 = arith.subf %679, %682 : vector<2x16xf32>
    %684 = math.exp %683 : vector<2x16xf32>
    %cst_192 = arith.constant dense<0.000000e+00> : vector<2xf32>
    %685 = vector.multi_reduction <add>, %684, %cst_192 [1] : vector<2x16xf32> to vector<2xf32>
    %686 = vector.shape_cast %685 : vector<2xf32> to vector<2x1xf32>
    %687 = vector.broadcast %686 : vector<2x1xf32> to vector<2x16xf32>
    %688 = arith.divf %684, %687 : vector<2x16xf32>
    %689 = vector.shape_cast %688 : vector<2x16xf32> to vector<2x16x1xf32>
    %690 = vector.broadcast %689 : vector<2x16x1xf32> to vector<2x16x16xf32>
    %691 = arith.mulf %690, %15 : vector<2x16x16xf32>
    %cst_193 = arith.constant dense<0.000000e+00> : vector<2x16xf32>
    %692 = vector.multi_reduction <add>, %691, %cst_193 [1] : vector<2x16x16xf32> to vector<2x16xf32>
    %693 = tpu.concatenate %692, %664, %633 in 1 : vector<2x16xf32>, vector<2x16xf32>, vector<2x32xf32> -> vector<2x64xf32>
    %cst_194 = arith.constant dense<0.000000e+00> : vector<2x192xf32>
    %694 = tpu.matmul %693, %20, %cst_194 {dimension_numbers = #tpu.dot_dimension_numbers<[1], [0], [0], [1], [0, 0, 1, 1], [], []>} : vector<2x64xf32>, vector<64x192xf32>, vector<2x192xf32> -> vector<2x192xf32>
    %695 = vector.broadcast %21 : vector<1x192xf32> to vector<2x192xf32>
    %696 = arith.addf %694, %695 : vector<2x192xf32>
    %697 = vector.extract_strided_slice %696 {offsets = [0, 0], sizes = [2, 96], strides = [1, 1]} : vector<2x192xf32> to vector<2x96xf32>
    %698 = vector.extract_strided_slice %696 {offsets = [0, 96], sizes = [2, 96], strides = [1, 1]} : vector<2x192xf32> to vector<2x96xf32>
    %699 = vector.extract_strided_slice %697 {offsets = [0, 0], sizes = [2, 32], strides = [1, 1]} : vector<2x96xf32> to vector<2x32xf32>
    %700 = vector.extract_strided_slice %697 {offsets = [0, 32], sizes = [2, 32], strides = [1, 1]} : vector<2x96xf32> to vector<2x32xf32>
    %701 = vector.extract_strided_slice %697 {offsets = [0, 64], sizes = [2, 32], strides = [1, 1]} : vector<2x96xf32> to vector<2x32xf32>
    %702 = vector.extract_strided_slice %698 {offsets = [0, 0], sizes = [2, 32], strides = [1, 1]} : vector<2x96xf32> to vector<2x32xf32>
    %703 = vector.extract_strided_slice %698 {offsets = [0, 32], sizes = [2, 32], strides = [1, 1]} : vector<2x96xf32> to vector<2x32xf32>
    %704 = vector.extract_strided_slice %698 {offsets = [0, 64], sizes = [2, 32], strides = [1, 1]} : vector<2x96xf32> to vector<2x32xf32>
    %705 = arith.addf %699, %702 : vector<2x32xf32>
    %706 = arith.negf %705 : vector<2x32xf32>
    %707 = math.exp %706 : vector<2x32xf32>
    %cst_195 = arith.constant 1.000000e+00 : f32
    %708 = vector.broadcast %cst_195 : f32 to vector<2x32xf32>
    %709 = arith.addf %708, %707 : vector<2x32xf32>
    %710 = arith.divf %708, %709 : vector<2x32xf32>
    %711 = arith.addf %700, %703 : vector<2x32xf32>
    %712 = arith.negf %711 : vector<2x32xf32>
    %713 = math.exp %712 : vector<2x32xf32>
    %cst_196 = arith.constant 1.000000e+00 : f32
    %714 = vector.broadcast %cst_196 : f32 to vector<2x32xf32>
    %715 = arith.addf %714, %713 : vector<2x32xf32>
    %716 = arith.divf %714, %715 : vector<2x32xf32>
    %717 = arith.mulf %710, %704 : vector<2x32xf32>
    %718 = arith.addf %701, %717 : vector<2x32xf32>
    %719 = math.tanh %718 : vector<2x32xf32>
    %cst_197 = arith.constant 1.000000e+00 : f32
    %720 = vector.broadcast %cst_197 : f32 to vector<2x32xf32>
    %721 = arith.subf %720, %716 : vector<2x32xf32>
    %722 = arith.mulf %721, %719 : vector<2x32xf32>
    %723 = arith.mulf %716, %633 : vector<2x32xf32>
    %724 = arith.addf %722, %723 : vector<2x32xf32>
    %cst_198 = arith.constant dense<0.000000e+00> : vector<2x32xf32>
    %725 = tpu.matmul %724, %22, %cst_198 {dimension_numbers = #tpu.dot_dimension_numbers<[1], [0], [0], [1], [0, 0, 1, 1], [], []>} : vector<2x32xf32>, vector<32x32xf32>, vector<2x32xf32> -> vector<2x32xf32>
    %726 = vector.broadcast %23 : vector<1x32xf32> to vector<2x32xf32>
    %727 = arith.addf %725, %726 : vector<2x32xf32>
    %cst_199 = arith.constant dense<0xFF800000> : vector<2xf32>
    %728 = vector.multi_reduction <maximumf>, %727, %cst_199 [1] : vector<2x32xf32> to vector<2xf32>
    %729 = vector.shape_cast %728 : vector<2xf32> to vector<2x1xf32>
    %730 = tpu.iota {dimensions = array<i32: 1>} : vector<2x32xi32>
    %731 = vector.broadcast %729 : vector<2x1xf32> to vector<2x32xf32>
    %732 = arith.cmpf oeq, %727, %731 : vector<2x32xf32>
    %c32_i32_200 = arith.constant 32 : i32
    %733 = vector.broadcast %c32_i32_200 : i32 to vector<2x32xi32>
    %734 = arith.select %732, %730, %733 : vector<2x32xi1>, vector<2x32xi32>
    %cst_201 = arith.constant dense<2147483647> : vector<2xi32>
    %735 = vector.multi_reduction <minsi>, %734, %cst_201 [1] : vector<2x32xi32> to vector<2xi32>
    %736 = vector.shape_cast %735 : vector<2xi32> to vector<2x1xi32>
    %737 = vector.broadcast %729 : vector<2x1xf32> to vector<2x32xf32>
    %738 = arith.subf %727, %737 : vector<2x32xf32>
    %739 = math.exp %738 : vector<2x32xf32>
    %cst_202 = arith.constant dense<0.000000e+00> : vector<2xf32>
    %740 = vector.multi_reduction <add>, %739, %cst_202 [1] : vector<2x32xf32> to vector<2xf32>
    %741 = vector.shape_cast %740 : vector<2xf32> to vector<2x1xf32>
    %742 = math.log %741 : vector<2x1xf32>
    %743 = arith.addf %729, %742 : vector<2x1xf32>
    %744 = vector.broadcast %743 : vector<2x1xf32> to vector<2x32xf32>
    %745 = arith.subf %727, %744 : vector<2x32xf32>
    %746 = arith.mulf %745, %666 : vector<2x32xf32>
    %cst_203 = arith.constant dense<0.000000e+00> : vector<2xf32>
    %747 = vector.multi_reduction <add>, %746, %cst_203 [1] : vector<2x32xf32> to vector<2xf32>
    %748 = vector.shape_cast %747 : vector<2xf32> to vector<2x1xf32>
    %cst_204 = arith.constant dense<0.000000e+00> : vector<1xf32>
    %749 = vector.multi_reduction <add>, %748, %cst_204 [0] : vector<2x1xf32> to vector<1xf32>
    %750 = vector.shape_cast %749 : vector<1xf32> to vector<1x1xf32>
    %cst_205 = arith.constant 5.000000e-01 : f32
    %751 = vector.broadcast %cst_205 : f32 to vector<1x1xf32>
    %752 = arith.mulf %750, %751 : vector<1x1xf32>
    %753 = arith.subf %662, %752 : vector<1x1xf32>
    %754 = tpu.concatenate %99, %190, %281, %372, %463, %554, %645, %736 in 1 : vector<2x1xi32>, vector<2x1xi32>, vector<2x1xi32>, vector<2x1xi32>, vector<2x1xi32>, vector<2x1xi32>, vector<2x1xi32>, vector<2x1xi32> -> vector<2x8xi32>
    %c0_206 = arith.constant 0 : index
    %c0_207 = arith.constant 0 : index
    %755 = vector.load %arg15[%c0_206, %c0_207] : memref<2x8xi32, #tpu.memory_space<vmem>>, vector<2x8xi32>
    tpu.vector_store %arg15[%c0_206, %c0_207], %754 {strides = array<i32>} : memref<2x8xi32, #tpu.memory_space<vmem>>, vector<2x8xi32>,
    %c0_208 = arith.constant 0 : index
    %c0_209 = arith.constant 0 : index
    %756 = vector.load %arg16[%c0_208, %c0_209] : memref<1x1xf32, #tpu.memory_space<vmem>>, vector<1x1xf32>
    tpu.vector_store %arg16[%c0_208, %c0_209], %753 {strides = array<i32>} : memref<1x1xf32, #tpu.memory_space<vmem>>, vector<1x1xf32>,
    return
  }
}

</mosaic_0001>

<bundles_post_ra>
// kernel: end2end_forward.1
= control target key start
LH: loop header
LB: loop body
LE: loop exit
PB: predicated region body
PF: predicated region fallthrough
CT: control target
= control target key end

     0   :  { %s6848_s0 = inlined_call_operand.vmem [shape: f32[8,2,16], index: 0, kind: input, shape index: {}]   ;;  %s6849_s1 = inlined_call_operand.vmem [shape: f32[8,2,32], index: 1, kind: input, shape index: {}]   ;;  %s6850_s2 = inlined_call_operand.vmem [shape: f32[2,16,32], index: 2, kind: input, shape index: {}]   ;;  %s6851_s3 = inlined_call_operand.vmem [shape: f32[32,16], index: 3, kind: input, shape index: {}]   ;;  %s6852_s4 = inlined_call_operand.vmem [shape: f32[1,16], index: 4, kind: input, shape index: {}]   ;;  %s6853_s5 = inlined_call_operand.vmem [shape: f32[16,16], index: 5, kind: input, shape index: {}]   ;;  %s6854_s6 = inlined_call_operand.vmem [shape: f32[1,16], index: 6, kind: input, shape index: {}]   ;;  %s6855_s7 = inlined_call_operand.vmem [shape: f32[32,16], index: 7, kind: input, shape index: {}]   ;;  %s6856_s8 = inlined_call_operand.vmem [shape: f32[1,16], index: 8, kind: input, shape index: {}]   ;;  %s6857_s9 = inlined_call_operand.vmem [shape: f32[1,16], index: 9, kind: input, shape index: {}]   ;;  %s6858_s10 = inlined_call_operand.<no memory space> [shape: f32[1,1], index: 10, kind: input, shape index: {}]   ;;  %s6859_s11 = inlined_call_operand.vmem [shape: f32[64,192], index: 11, kind: input, shape index: {}]   ;;  %s6860_s12 = inlined_call_operand.vmem [shape: f32[1,192], index: 12, kind: input, shape index: {}]   ;;  %s6861_s13 = inlined_call_operand.vmem [shape: f32[32,32], index: 13, kind: input, shape index: {}]   ;;  %s6862_s14 = inlined_call_operand.vmem [shape: f32[1,32], index: 14, kind: input, shape index: {}]   ;;  %s6863_s15 = inlined_call_operand.vmem [shape: s32[2,8], index: 15, kind: output, shape index: {0}]   ;;  %s6864_s16 = inlined_call_operand.hbm [shape: f32[1,1], index: 16, kind: output, shape index: {1}]  }
   0x1   :  { %6866 = sst [smem:[#allocation6_spill]] %s6848_s0  ;;  %v22_v0 = vstv %s6858_s10 }
   0x2   :  { %23 = vst [vmem:[#allocation2] sm:$0x1] %v22_v0 }
   0x3   :  { %v59_v1 = vld [vmem:[%s6851_s3] sm:$0xff]  ;;  %v60_v2 = vld [vmem:[%s6851_s3 + $0x8] sm:$0xff]  ;;  %v61_v3 = vld [vmem:[%s6851_s3 + $0x10] sm:$0xff]  ;;  %vm70_vm0 = vcmask 261120  }
   0x4   :  { %v4953_v4 = vpack.c.bf16 %v60_v2, %v59_v1  ;;  %v62_v5 = vld [vmem:[%s6851_s3 + $0x18] sm:$0xff]  ;;  %v55_v6 = vld [vmem:[%s6850_s2] sm:$0xff] }
   0x5   :  { %v4957_v7 = vpack.c.bf16 %v62_v5, %v61_v3  ;;  %4761 = vmatprep.mubr.msk.f32.mxu0 %vm70_vm0, %v55_v6 }
   0x6   :  { %24 = vsyncpa [#allocation4], 0  ;;  %4954 = vmatprep.subr.bf16.mxu0 %v4953_v4  ;;  %v56_v8 = vld [vmem:[%s6850_s2 + $0x8] sm:$0xff]  ;;  %v57_v9 = vld [vmem:[%s6850_s2 + $0x10] sm:$0xff]  ;;  %v5501_v14 = vmov 0.0|0.0   ;;  %v5502_v15 = vmov 0.0   ;;  %v393_v38 = vlaneseq }
   0x7   :  { %4956 = vmatpush3.bf16.msra.mxu0 %v4953_v4  ;;  %v58_v10 = vld [vmem:[%s6850_s2 + $0x18] sm:$0xff]  ;;  %v172_v11 = vld [vmem:[%s6853_s5] sm:$0xff]  ;;  %v173_v12 = vld [vmem:[%s6853_s5 + $0x8] sm:$0xff]  ;;  %vm181_vm1 = vcmask 130048   ;;  %vm5503_vm2 = vmmov 0   ;;  %v5504_v35 = vmov 0  }
   0x8   :  { %4958 = vmatprep.subr.bf16.mxu0 %v4957_v7  ;;  %v4961_v13 = vpack.c.bf16 %v173_v12, %v172_v11  ;;  %v4592_v16 = vld [vmem:[%s6852_s4] ss:$0 sm:$0xff]  ;;  %v280_v21 = vld [vmem:[%s6855_s7 + $0x8] sm:$0xff]  ;;  %v281_v29 = vld [vmem:[%s6855_s7 + $0x10] sm:$0xff]  ;;  %5199 = vset.pattern.permute.xlu0 %v5504_v35  ;;  %v5505_v36 = vmov 1966171168  }
   0x9   :  { %v279_v20 = vld [vmem:[%s6855_s7] sm:$0xff]  ;;  %v282_v30 = vld [vmem:[%s6855_s7 + $0x18] sm:$0xff]  ;;  %5200 = vset.pattern.permute.xlu1 %v5504_v35  ;;  %v391_v37 = vunpack.c.l.s4 %v5505_v36  ;;  %v5679_v42 = vshrl.u32 %v393_v38, 7  ;;  %vm480_vm3 = vcmask 130112   ;;  %vm491_vm4 = vcmask 1041409   ;;  %s6867_s22 = sld [smem:[#allocation6_spill]] }
   0xa   :  { %4962 = vmatprep.subr.bf16.mxu1 %v4961_v13  ;;  %v5646_v25 = vpack.c.bf16 %v280_v21, %v279_v20  ;;  %v5663_v33 = vpack.c.bf16 %v282_v30, %v281_v29  ;;  %v5684_v45 = vld [vmem:[%s6856_s8] ss:$0 sm:$0xff]  ;;  %vm494_vm5 = vcmask 123904   ;;  %s5506_s23 = smov 16   ;;  %vm640_vm6 = vcmask 523264   ;;  %s5507_s17 = smov 32  }
   0xb   :  { %4960 = vmatpush3.bf16.msra.mxu0 %v4957_v7  ;;  %4964 = vmatpush3.bf16.msra.mxu1 %v4961_v13  ;;  %v392_v41 = vunpack.c.0.s8 %v391_v37  ;;  %v5692_v51 = vsub.s32 0, %v5679_v42  ;;  %v4597_v52 = vld [vmem:[%s6854_s6] ss:$0 sm:$0xff]  ;;  %s5508_s18 = smov 96   ;;  %vm836_vm7 = vcmask 254976  }
   0xc   :  { %4965 = vmatprep.subr.bf16.mxu1 %v5501_v14  ;;  %v5716_v2 = vld [vmem:[%s6857_s9] ss:$0 sm:$0xff] }
   0xd   :  { %v5687_v46 = vsub.s32 %v392_v41, %v5679_v42 }
   0xe   :  { %4762 = vmatmul.mubr.msk.f32.vlgmr.msra.gmra.mrb[0].mxu0 %vm70_vm0, %v56_v8 }
   0xf   :  { %4764 = vmatprep.mubr.msk.f32.mxu0 %vm70_vm0, %v57_v9 }
  0x12   :  { %4765 = vmatmul.mubr.msk.f32.gmra.mrb[2].mxu0 %vm70_vm0, %v58_v10 }
  0x13   :  { %708 = vmatprep.mubr.f32.mxu0 %v5502_v15 }
  0xe1   :  { %v4763_v17 = vpop.f32.mrb[0].mxu0 }
  0xe2   :  { %v155_v18 = vadd.f32 %v4763_v17, %v4592_v16  ;;  %v149_v19 = vpop.f32.mrb[1].mxu0  ;;  %v4604_v17 = vld [vmem:[#allocation2] ss:$0 sm:$0xff] }
  0xe3   :  { %v150_v22 = vadd.f32 %v4592_v16, %v149_v19  ;;  %v5726_v19 = vand.u32 127, %v393_v38 }
  0xe4   :  { %v5648_v26 = vmax.f32 %v155_v18, 0.0 }
  0xe5   :  { %v5644_v23 = vmax.f32 %v150_v22, 0.0  ;;  %v4766_v24 = vpop.f32.mrb[2].mxu0  ;;  %v475_v21 = vadd.s32 4294967288, %v5726_v19 }
  0xe6   :  { %v165_v27 = vadd.f32 %v4766_v24, %v4592_v16  ;;  %v159_v28 = vpop.f32.mrb[3].mxu0  ;;  %v5731_v24 = vsub.s32 %v5726_v19, %v5679_v42 }
  0xe7   :  { %v160_v31 = vadd.f32 %v4592_v16, %v159_v28  ;;  %4771 = vmatprep.mubr.msk.f32.mxu1 %vm181_vm1, %v5644_v23 }
  0xe8   :  { %4772 = vmatmul.mubr.msk.f32.vlgmr.msra.gmra.mrb[0].mxu1 %vm181_vm1, %v5648_v26  ;;  %v5665_v34 = vmax.f32 %v165_v27, 0.0  ;;  %v5734_v27 = vsub.s32 %v475_v21, %v5679_v42 }
  0xe9   :  { %v5660_v32 = vmax.f32 %v160_v31, 0.0  ;;  %4967 = vmatpush3.bf16.msra.mxu1 %v5646_v25 }
  0xea   :  { %4968 = vmatprep.subr.bf16.mxu1 %v5501_v14 }
  0xeb   :  { %4774 = vmatprep.mubr.msk.f32.mxu1 %vm181_vm1, %v5660_v32 }
  0xec   :  { %4775 = vmatmul.mubr.msk.f32.gmra.mrb[2].mxu1 %vm181_vm1, %v5665_v34 }
  0xed   :  { %4970 = vmatpush3.bf16.msra.mxu1 %v5663_v33  ;;  %4785 = vmatprep.mubr.msk.f32.mxu1 %vm5503_vm2, %v5502_v15 }
  0xee   :  { %4987 = vmatprep.subr.bf16.mxu1 %v5501_v14 }
  0xf0   :  { %4786 = vmatmul.mubr.f32.vlgmr.msra.gmra.mrb[4].mxu1 %v5502_v15 }
  0xf1   :  { %4796 = vmatprep.mubr.msk.f32.mxu1 %vm5503_vm2, %v5502_v15 }
 0x1bb   :  { %v4773_v39 = vpop.f32.mrb[0].mxu1 }
 0x1bc   :  { %v260_v40 = vpop.f32.mrb[1].mxu1  ;;  %v5698_v55 = vadd.f32 %v4773_v39, %v4597_v52 }
 0x1bd   :  { %v5700_v56 = vadd.f32 %v4597_v52, %v260_v40 }
 0x1bf   :  { %v4776_v43 = vpop.f32.mrb[2].mxu1 }
 0x1c0   :  { %v270_v44 = vpop.f32.mrb[3].mxu1  ;;  %v5704_v59 = vadd.f32 %v4776_v43, %v4597_v52 }
 0x1c1   :  { %v5706_v60 = vadd.f32 %v4597_v52, %v270_v44 }
 0x1c3   :  { %v385_v47 = vpop.f32.mrb[4].mxu1 }
 0x1c4   :  { %v386_v48 = vadd.f32 %v5684_v45, %v385_v47  ;;  %v4787_v49 = vpop.f32.mrb[5].mxu1 }
 0x1c6   :  { %v396_v50 = vrot.slane %v386_v48, %v5687_v46  ;;  %v5751_v48 = vsub.s32 1, %v5679_v42 }
 0x1c8   :  { %v397_v53 = vcombine.high %v396_v50, %v396_v50  ;;  %v404_v54 = vrot.slane %v396_v50, %v5687_v46 }
 0x1ca   :  { %v411_v57 = vrot.slane %v397_v53, %v5687_v46  ;;  %v415_v58 = vrot.slane %v404_v54, %v5692_v51 }
 0x1cc   :  { %v419_v61 = vrot.slane %v411_v57, %v5692_v51  ;;  %v422_v62 = vadd.f32 %v415_v58, %v5700_v56  ;;  %v423_v63 = vadd.f32 %v415_v58, %v5698_v55 }
 0x1ce   :  { %v424_v0 = vadd.f32 %v419_v61, %v5706_v60  ;;  %v425_v1 = vadd.f32 %v419_v61, %v5704_v59  ;;  %5201 = vtanh.f32 %v422_v62 }
 0x1cf   :  { %5203 = vtanh.f32 %v423_v63 }
 0x1d0   :  { %5205 = vtanh.f32 %v424_v0 }
 0x1d1   :  { %5207 = vtanh.f32 %v425_v1 }
 0x1d8   :  { %v5202_v3 = vpop.eup %5201 }
 0x1d9   :  { %v5204_v4 = vpop.eup %5203  ;;  %v436_v5 = vmul.f32 %v5202_v3, %v5716_v2 }
 0x1da   :  { %v5206_v6 = vpop.eup %5205  ;;  %v437_v10 = vmul.f32 %v5204_v4, %v5716_v2 }
 0x1db   :  { %v5208_v7 = vpop.eup %5207  ;;  %v440_v8 = vsel %vm181_vm1, %v436_v5, 0.0  ;;  %v438_v9 = vmul.f32 %v5206_v6, %v5716_v2 }
 0x1dc   :  { %441 = vadd.xlane.f32.xlu0 %v440_v8  ;;  %v439_v12 = vmul.f32 %v5208_v7, %v5716_v2  ;;  %v443_v13 = vsel %vm181_vm1, %v437_v10, 0.0 }
 0x1dd   :  { %v446_v11 = vsel %vm181_vm1, %v438_v9, 0.0 }
 0x1de   :  { %447 = vadd.xlane.f32.xlu1 %v446_v11  ;;  %v449_v16 = vsel %vm181_vm1, %v439_v12, 0.0 }
 0x1e0   :  { %444 = vadd.xlane.f32.xlu0 %v443_v13 }
 0x1e2   :  { %450 = vadd.xlane.f32.xlu1 %v449_v16 }
 0x1f6   :  { %458 = vperm.xlu0 %5199, %v4604_v17  }
 0x269   :  { %v442_v18 = vpop.xlane.xlu0 %441 }
 0x26b   :  { %v448_v20 = vpop.xlane.xlu1 %447 }
 0x26d   :  { %v445_v22 = vpop.xlane.xlu0 %444 }
 0x26f   :  { %v451_v28 = vpop.xlane.xlu1 %450 }
 0x275   :  { %v5736_v29 = vpop.permute.xlu0 %458 }
 0x276   :  { %v461_v30 = vadd.f32 %v5736_v29, %v442_v18  ;;  %v462_v31 = vadd.f32 %v5736_v29, %v445_v22  ;;  %v463_v35 = vadd.f32 %v5736_v29, %v448_v20  ;;  %v464_v36 = vadd.f32 %v5736_v29, %v451_v28 }
 0x278   :  { %v474_v37 = vrot.slane %v461_v30, %v5731_v24  ;;  %v479_v38 = vrot.slane %v462_v31, %v5734_v27  ;;  %v485_v39 = vrot.slane %v463_v35, %v5731_v24  ;;  %v489_v40 = vrot.slane %v464_v36, %v5734_v27 }
 0x27a   :  { %v481_v41 = vsel %vm480_vm3, %v479_v38, %v474_v37  ;;  %v490_v43 = vsel %vm480_vm3, %v489_v40, %v485_v39  ;;  %v308_v38 = vld [vmem:[%s6867_s22] sm:$0x3]  ;;  %v287_v39 = vld [vmem:[%s6859_s11 + $0x8] sm:$0xff]  ;;  %v289_v40 = vld [vmem:[%s6859_s11 + $0x18] sm:$0xff] }
 0x27b   :  { %v492_v44 = vsel %vm491_vm4, %v490_v43, %v481_v41  ;;  %v5775_v41 = vpack.c.bf16 %v289_v40, %v287_v39  ;;  %v286_v43 = vld [vmem:[%s6859_s11] sm:$0xff] }
 0x27c   :  { %v495_v47 = vsel %vm494_vm5, %v492_v44, -inf  ;;  %v288_v44 = vld [vmem:[%s6859_s11 + $0x10] sm:$0xff] }
 0x27d   :  { %496 = vmax.xlane.f32.xlu1 %v495_v47  ;;  %v5783_v47 = vpack.c.bf16 %v288_v44, %v286_v43  ;;  %4972 = vmatprep.subr.bf16.mxu0 %v5775_v41 }
 0x27f   :  { %4974 = vmatpush1.bf16.msra.mxu0 %v5783_v47 }
 0x30a   :  { %v497_v49 = vpop.xlane.xlu1 %496 }
 0x30b   :  { %v502_v50 = vrot.slane %v497_v49, %v5692_v51  ;;  %v506_v52 = vrot.slane %v497_v49, %v5751_v48  ;;  %v291_v49 = vld [vmem:[%s6859_s11 + $0x28] sm:$0xff] }
 0x30d   :  { %v509_v53 = vsub.f32 %v461_v30, %v502_v50  ;;  %v510_v54 = vsub.f32 %v462_v31, %v502_v50  ;;  %v511_v58 = vsub.f32 %v463_v35, %v506_v52  ;;  %v512_v62 = vsub.f32 %v464_v36, %v506_v52  ;;  %v293_v50 = vld [vmem:[%s6859_s11 + $0x38] sm:$0xff] }
 0x30e   :  { %v5793_v52 = vpack.c.bf16 %v293_v50, %v291_v49 }
 0x30f   :  { %v513_v57 = vmul.f32 1.442695, %v509_v53  ;;  %v515_v61 = vmul.f32 1.442695, %v510_v54  ;;  %v517_v63 = vmul.f32 1.442695, %v511_v58 }
 0x310   :  { %v519_v0 = vmul.f32 1.442695, %v512_v62  ;;  %v290_v53 = vld [vmem:[%s6859_s11 + $0x20] sm:$0xff]  ;;  %v292_v54 = vld [vmem:[%s6859_s11 + $0x30] sm:$0xff]  ;;  %4976 = vmatprep.subr.bf16.mxu0 %v5793_v52  ;;  %v295_v58 = vld [vmem:[%s6859_s11 + $0x48] sm:$0xff] }
 0x311   :  { %5209 = vpow2.f32 %v513_v57  ;;  %v5801_v57 = vpack.c.bf16 %v292_v54, %v290_v53  ;;  %v294_v62 = vld [vmem:[%s6859_s11 + $0x40] sm:$0xff] }
 0x312   :  { %5211 = vpow2.f32 %v515_v61  ;;  %v297_v61 = vld [vmem:[%s6859_s11 + $0x58] sm:$0xff] }
 0x313   :  { %5213 = vpow2.f32 %v517_v63  ;;  %4978 = vmatpush1.bf16.msra.mxu0 %v5801_v57  ;;  %v5814_v63 = vpack.c.bf16 %v297_v61, %v295_v58 }
 0x314   :  { %5215 = vpow2.f32 %v519_v0  ;;  %v296_v0 = vld [vmem:[%s6859_s11 + $0x50] sm:$0xff] }
 0x315   :  { %4980 = vmatprep.subr.bf16.mxu0 %v5814_v63 }
 0x31b   :  { %v5210_v1 = vpop.eup %5209 }
 0x31c   :  { %526 = vperm.xlu1 %5200, %v5210_v1   ;;  %v5212_v42 = vpop.eup %5211 }
 0x31d   :  { %v5214_v3 = vpop.eup %5213 }
 0x31e   :  { %v5216_v4 = vpop.eup %5215 }
 0x320   :  { %529 = vperm.xlu1 %5200, %v5212_v42  }
 0x324   :  { %532 = vperm.xlu1 %5200, %v5214_v3  }
 0x328   :  { %535 = vperm.xlu1 %5200, %v5216_v4  }
 0x39b   :  { %v527_v5 = vpop.permute.xlu1 %526 }
 0x39c   :  { %v540_v10 = vrot.slane %v527_v5, %v5731_v24  ;;  %v298_v5 = vld [vmem:[%s6859_s11 + $0x60] sm:$0xff] }
 0x39f   :  { %v530_v6 = vpop.permute.xlu1 %529 }
 0x3a0   :  { %v544_v8 = vrot.slane %v530_v6, %v5734_v27  ;;  %v300_v6 = vld [vmem:[%s6859_s11 + $0x70] sm:$0xff] }
 0x3a2   :  { %v545_v13 = vsel %vm480_vm3, %v544_v8, %v540_v10 }
 0x3a3   :  { %v533_v7 = vpop.permute.xlu1 %532 }
 0x3a4   :  { %v549_v11 = vrot.slane %v533_v7, %v5731_v24  ;;  %v5837_v7 = vpack.c.bf16 %v300_v6, %v298_v5 }
 0x3a7   :  { %v536_v9 = vpop.permute.xlu1 %535 }
 0x3a8   :  { %v553_v12 = vrot.slane %v536_v9, %v5734_v27 }
 0x3aa   :  { %v554_v16 = vsel %vm480_vm3, %v553_v12, %v549_v11 }
 0x3ab   :  { %v555_v17 = vsel %vm491_vm4, %v554_v16, %v545_v13 }
 0x3ac   :  { %v557_v18 = vsel %vm494_vm5, %v555_v17, 0.0 }
 0x3ad   :  { %558 = vadd.xlane.f32.xlu1 %v557_v18 }
 0x43a   :  { %v559_v20 = vpop.xlane.xlu1 %558 }
 0x43b   :  { %v564_v21 = vrot.slane %v559_v20, %v5692_v51  ;;  %v568_v22 = vrot.slane %v559_v20, %v5751_v48 }
 0x43d   :  { %5217 = vrcp.f32 %v564_v21 }
 0x43e   :  { %5219 = vrcp.f32 %v568_v22 }
 0x447   :  { %v5218_v28 = vpop.eup %5217 }
 0x448   :  { %v572_v30 = vmul.f32 %v5218_v28, %v5210_v1  ;;  %v573_v31 = vmul.f32 %v5218_v28, %v5212_v42  ;;  %v5220_v35 = vpop.eup %5219  ;;  %v299_v1 = vld [vmem:[%s6859_s11 + $0x68] sm:$0xff]  ;;  %v301_v42 = vld [vmem:[%s6859_s11 + $0x78] sm:$0xff] }
 0x449   :  { %v575_v36 = vmul.f32 %v5220_v35, %v5214_v3  ;;  %v576_v37 = vmul.f32 %v5220_v35, %v5216_v4  ;;  %v5825_v3 = vpack.c.bf16 %v296_v0, %v294_v62  ;;  %v5827_v4 = vpack.c.bf16 %v301_v42, %v299_v1  ;;  %v302_v0 = vld [vmem:[%s6860_s12] sm:$0x3]  ;;  %s5509_s12 = smov 64  }
 0x44a   :  { %579 = vperm.xlu0 %5199, %v572_v30   ;;  %v5867_v1 = vrot.slane %v302_v0, %v5692_v51  ;;  %v5871_v6 = vrot.slane %v302_v0, %v5751_v48 }
 0x44b   :  { %4982 = vmatpush1.bf16.msra.mxu0 %v5825_v3 }
 0x44c   :  { %4984 = vmatprep.subr.bf16.mxu0 %v5827_v4 }
 0x44e   :  { %584 = vperm.xlu0 %5199, %v573_v31  }
 0x44f   :  { %4986 = vmatpush1.bf16.msra.mxu0 %v5837_v7 }
 0x450   :  { %5000 = vmatprep.subr.bf16.mxu0 %v5775_v41 }
 0x452   :  { %589 = vperm.xlu0 %5199, %v575_v36  }
 0x456   :  { %594 = vperm.xlu0 %5199, %v576_v37  }
 0x45a   :  { %624 = vrot.lane.b32.xlu0 %v308_v38, %s5506_s23 }
 0x4c9   :  { %v580_v8 = vpop.permute.xlu0 %579 }
 0x4ca   :  { %v597_v9 = vmul.f32 %v580_v8, %v5644_v23 }
 0x4cc   :  { %v601_v12 = vsel %vm181_vm1, %v597_v9, 0.0 }
 0x4cd   :  { %v585_v10 = vpop.permute.xlu0 %584 }
 0x4ce   :  { %v598_v11 = vmul.f32 %v585_v10, %v5648_v26 }
 0x4d0   :  { %v602_v13 = vsel %vm181_vm1, %v598_v11, 0.0 }
 0x4d1   :  { %v603_v16 = vadd.f32 %v602_v13, %v601_v12  ;;  %v590_v17 = vpop.permute.xlu0 %589 }
 0x4d2   :  { %v599_v20 = vmul.f32 %v590_v17, %v5660_v32 }
 0x4d3   :  { %v604_v18 = vrot.slane %v603_v16, 4 }
 0x4d4   :  { %v610_v30 = vsel %vm181_vm1, %v599_v20, 0.0 }
 0x4d5   :  { %v605_v21 = vadd.f32 %v604_v18, %v603_v16  ;;  %v595_v22 = vpop.permute.xlu0 %594 }
 0x4d6   :  { %v600_v28 = vmul.f32 %v595_v22, %v5665_v34 }
 0x4d7   :  { %v606_v35 = vrot.slane %v605_v21, 2 }
 0x4d8   :  { %v611_v31 = vsel %vm181_vm1, %v600_v28, 0.0  ;;  %v303_v28 = vld [vmem:[%s6861_s13] sm:$0xff] }
 0x4d9   :  { %v612_v36 = vadd.f32 %v611_v31, %v610_v30  ;;  %v607_v38 = vadd.f32 %v606_v35, %v605_v21  ;;  %v625_v54 = vpop.permute.xlu0 %624  ;;  %v304_v30 = vld [vmem:[%s6861_s13 + $0x8] sm:$0xff]  ;;  %v305_v31 = vld [vmem:[%s6861_s13 + $0x10] sm:$0xff] }
 0x4da   :  { %v5887_v35 = vpack.c.bf16 %v304_v30, %v303_v28 }
 0x4db   :  { %v613_v37 = vrot.slane %v612_v36, 4  ;;  %v608_v44 = vrot.slane %v607_v38, 1 }
 0x4dc   :  { %4989 = vmatpush3.bf16.msra.mxu1 %v5887_v35 }
 0x4dd   :  { %v614_v39 = vadd.f32 %v613_v37, %v612_v36  ;;  %v609_v50 = vadd.f32 %v608_v44, %v607_v38  ;;  %v306_v36 = vld [vmem:[%s6861_s13 + $0x18] sm:$0xff]  ;;  %4990 = vmatprep.subr.bf16.mxu1 %v5501_v14 }
 0x4de   :  { %v5893_v37 = vpack.c.bf16 %v306_v36, %v305_v31 }
 0x4df   :  { %v615_v40 = vrot.slane %v614_v39, 2 }
 0x4e0   :  { %4992 = vmatpush3.bf16.msra.mxu1 %v5893_v37 }
 0x4e1   :  { %v616_v43 = vadd.f32 %v615_v40, %v614_v39  ;;  %4993 = vmatprep.subr.bf16.mxu1 %v5501_v14 }
 0x4e3   :  { %v617_v49 = vrot.slane %v616_v43, 1 }
 0x4e5   :  { %v618_v53 = vadd.f32 %v617_v49, %v616_v43 }
 0x4e7   :  { %v621_v58 = vsel %vm491_vm4, %v618_v53, %v609_v50 }
 0x4e8   :  { %v627_v61 = vsel %vm181_vm1, %v621_v58, %v625_v54 }
 0x4e9   :  { %v628_v62 = vsel %vm70_vm0, %v627_v61, 0.0 }
 0x4ea   :  { %4605 = vmatmul.mubr.msk.f32.vlgmr.msra.gmra.mrb[4].mxu0 %vm640_vm6, %v628_v62 }
 0x4eb   :  { %5002 = vmatpush1.bf16.msra.mxu0 %v5783_v47  ;;  %1241 = vmatprep.mubr.f32.mxu0 %v5502_v15 }
 0x4ec   :  { %5004 = vmatprep.subr.bf16.mxu0 %v5793_v52 }
 0x4ef   :  { %5006 = vmatpush1.bf16.msra.mxu0 %v5801_v57 }
 0x4f0   :  { %5008 = vmatprep.subr.bf16.mxu0 %v5814_v63 }
 0x4f3   :  { %5010 = vmatpush1.bf16.msra.mxu0 %v5825_v3 }
 0x4f4   :  { %5012 = vmatprep.subr.bf16.mxu0 %v5827_v4 }
 0x4f7   :  { %5014 = vmatpush1.bf16.msra.mxu0 %v5837_v7 }
 0x4f8   :  { %5028 = vmatprep.subr.bf16.mxu0 %v5775_v41 }
 0x5bd   :  { %v710_v42 = vpop.f32.mrb[4].mxu0 }
 0x5be   :  { %v711_v5 = vadd.f32 %v710_v42, %v5867_v1  ;;  %v712_v8 = vpop.f32.mrb[5].mxu0 }
 0x5bf   :  { %v713_v9 = vadd.f32 %v712_v8, %v5871_v6 }
 0x5c0   :  { %716 = vrot.lane.b32.xlu0 %v711_v5, %s5507_s17 }
 0x5c4   :  { %737 = vrot.lane.b32.xlu0 %v713_v9, %s5508_s18 }
 0x5c8   :  { %727 = vrot.lane.b32.xlu0 %v713_v9, %s5507_s17 }
 0x632   :  { %v717_v10 = vpop.permute.xlu0 %716 }
 0x633   :  { %v719_v11 = vadd.f32 %v717_v10, %v711_v5 }
 0x635   :  { %v4606_v12 = vmul.f32 -1.442695, %v719_v11 }
 0x636   :  { %v738_v18 = vpop.permute.xlu0 %737 }
 0x637   :  { %5221 = vpow2.f32 %v4606_v12 }
 0x63a   :  { %v728_v39 = vpop.permute.xlu0 %727 }
 0x63b   :  { %v730_v40 = vadd.f32 %v728_v39, %v711_v5 }
 0x63d   :  { %v4607_v43 = vmul.f32 -1.442695, %v730_v40 }
 0x641   :  { %v5222_v13 = vpop.eup %5221 }
 0x642   :  { %v723_v16 = vadd.f32 1.0, %v5222_v13 }
 0x644   :  { %5223 = vrcp.f32 %v723_v16 }
 0x64e   :  { %v5224_v17 = vpop.eup %5223 }
 0x64f   :  { %v740_v20 = vmul.f32 %v5224_v17, %v738_v18 }
 0x651   :  { %742 = vrot.lane.b32.xlu1 %v740_v20, %s5509_s12 }
 0x6c3   :  { %v743_v21 = vpop.permute.xlu1 %742 }
 0x6c4   :  { %v745_v22 = vadd.f32 %v743_v21, %v711_v5 }
 0x6c6   :  { %5225 = vtanh.f32 %v745_v22 }
 0x6c7   :  { %5227 = vpow2.f32 %v4607_v43 }
 0x6d0   :  { %v5226_v38 = vpop.eup %5225 }
 0x6d1   :  { %749 = vrot.lane.b32.xlu0 %v5226_v38, %s5508_s18  ;;  %v5228_v44 = vpop.eup %5227 }
 0x6d2   :  { %v734_v49 = vadd.f32 1.0, %v5228_v44 }
 0x6d4   :  { %5229 = vrcp.f32 %v734_v49 }
 0x6de   :  { %v5230_v50 = vpop.eup %5229 }
 0x6df   :  { %v747_v53 = vsub.f32 1.0, %v5230_v50  ;;  %v753_v58 = vmul.f32 0.0, %v5230_v50 }
 0x743   :  { %v750_v54 = vpop.permute.xlu0 %749 }
 0x744   :  { %v752_v61 = vmul.f32 %v750_v54, %v747_v53 }
 0x746   :  { %v5899_v62 = vadd.f32 %v753_v58, %v752_v61 }
 0x748   :  { %762 = vrot.lane.b32.xlu0 %v5899_v62, %s5508_s18 }
 0x7ba   :  { %v763_v0 = vpop.permute.xlu0 %762 }
 0x7bb   :  { %4797 = vmatmul.mubr.msk.f32.vlgmr.msra.gmra.mrb[6].mxu1 %vm70_vm0, %v763_v0 }
 0x7bc   :  { %4995 = vmatpush3.bf16.msra.mxu1 %v5646_v25  ;;  %4807 = vmatprep.mubr.msk.f32.mxu1 %vm5503_vm2, %v5502_v15 }
 0x7bd   :  { %4996 = vmatprep.subr.bf16.mxu1 %v5501_v14 }
 0x7c0   :  { %4998 = vmatpush3.bf16.msra.mxu1 %v5663_v33 }
 0x7c1   :  { %5015 = vmatprep.subr.bf16.mxu1 %v5501_v14 }
 0x7c3   :  { %4808 = vmatmul.mubr.msk.f32.vlgmr.msra.gmra.mrb[8].mxu1 %vm70_vm0, %v763_v0 }
 0x7c4   :  { %5017 = vmatpush3.bf16.msra.mxu1 %v5887_v35  ;;  %4818 = vmatprep.mubr.msk.f32.mxu1 %vm5503_vm2, %v5502_v15 }
 0x7c5   :  { %5018 = vmatprep.subr.bf16.mxu1 %v5501_v14 }
 0x7c8   :  { %5020 = vmatpush3.bf16.msra.mxu1 %v5893_v37 }
 0x7c9   :  { %5021 = vmatprep.subr.bf16.mxu1 %v5501_v14 }
 0x88e   :  { %v5917_v42 = vpop.f32.mrb[6].mxu1 }
 0x88f   :  { %v4798_v5 = vpop.f32.mrb[7].mxu1 }
 0x896   :  { %v951_v8 = vpop.f32.mrb[8].mxu1 }
 0x897   :  { %v952_v9 = vadd.f32 %v5684_v45, %v951_v8  ;;  %v4809_v10 = vpop.f32.mrb[9].mxu1 }
 0x899   :  { %v962_v11 = vrot.slane %v952_v9, %v5687_v46 }
 0x89b   :  { %v963_v12 = vcombine.high %v962_v11, %v962_v11  ;;  %v970_v13 = vrot.slane %v962_v11, %v5687_v46 }
 0x89d   :  { %v977_v16 = vrot.slane %v963_v12, %v5687_v46  ;;  %v981_v17 = vrot.slane %v970_v13, %v5692_v51 }
 0x89f   :  { %v985_v18 = vrot.slane %v977_v16, %v5692_v51  ;;  %v988_v20 = vadd.f32 %v981_v17, %v5700_v56  ;;  %v989_v21 = vadd.f32 %v981_v17, %v5698_v55 }
 0x8a1   :  { %v990_v22 = vadd.f32 %v985_v18, %v5706_v60  ;;  %v991_v28 = vadd.f32 %v985_v18, %v5704_v59  ;;  %5231 = vtanh.f32 %v988_v20 }
 0x8a2   :  { %5233 = vtanh.f32 %v989_v21 }
 0x8a3   :  { %5235 = vtanh.f32 %v990_v22 }
 0x8a4   :  { %5237 = vtanh.f32 %v991_v28 }
 0x8ab   :  { %v5232_v30 = vpop.eup %5231 }
 0x8ac   :  { %v5234_v31 = vpop.eup %5233  ;;  %v996_v36 = vmul.f32 %v5232_v30, %v5716_v2 }
 0x8ad   :  { %v5236_v38 = vpop.eup %5235  ;;  %v997_v39 = vmul.f32 %v5234_v31, %v5716_v2 }
 0x8ae   :  { %v1000_v40 = vsel %vm181_vm1, %v996_v36, 0.0  ;;  %v998_v43 = vmul.f32 %v5236_v38, %v5716_v2  ;;  %v5238_v44 = vpop.eup %5237 }
 0x8af   :  { %v1003_v49 = vsel %vm181_vm1, %v997_v39, 0.0  ;;  %1001 = vadd.xlane.f32.xlu0 %v1000_v40  ;;  %v999_v53 = vmul.f32 %v5238_v44, %v5716_v2 }
 0x8b0   :  { %1004 = vadd.xlane.f32.xlu1 %v1003_v49  ;;  %v1006_v50 = vsel %vm181_vm1, %v998_v43, 0.0 }
 0x8b1   :  { %v1009_v54 = vsel %vm181_vm1, %v999_v53, 0.0 }
 0x8b3   :  { %1007 = vadd.xlane.f32.xlu0 %v1006_v50 }
 0x8b7   :  { %1010 = vadd.xlane.f32.xlu0 %v1009_v54 }
 0x93c   :  { %v1002_v58 = vpop.xlane.xlu0 %1001 }
 0x93d   :  { %v1005_v61 = vpop.xlane.xlu1 %1004  ;;  %v1012_v8 = vadd.f32 %v1002_v58, %v5736_v29 }
 0x93e   :  { %v1013_v5 = vadd.f32 %v1005_v61, %v5736_v29 }
 0x93f   :  { %v1023_v12 = vrot.slane %v1012_v8, %v5731_v24 }
 0x940   :  { %v1008_v0 = vpop.xlane.xlu0 %1007  ;;  %v1027_v11 = vrot.slane %v1013_v5, %v5734_v27 }
 0x941   :  { %v1014_v9 = vadd.f32 %v1008_v0, %v5736_v29 }
 0x942   :  { %v1028_v18 = vsel %vm480_vm3, %v1027_v11, %v1023_v12 }
 0x943   :  { %v1032_v16 = vrot.slane %v1014_v9, %v5731_v24 }
 0x944   :  { %v1011_v10 = vpop.xlane.xlu0 %1010 }
 0x945   :  { %v1015_v13 = vadd.f32 %v1011_v10, %v5736_v29 }
 0x947   :  { %v1036_v17 = vrot.slane %v1015_v13, %v5734_v27 }
 0x949   :  { %v1037_v20 = vsel %vm480_vm3, %v1036_v17, %v1032_v16 }
 0x94a   :  { %v1038_v21 = vsel %vm491_vm4, %v1037_v20, %v1028_v18 }
 0x94b   :  { %v1040_v22 = vsel %vm494_vm5, %v1038_v21, -inf }
 0x94c   :  { %1041 = vmax.xlane.f32.xlu1 %v1040_v22 }
 0x9d9   :  { %v1042_v28 = vpop.xlane.xlu1 %1041 }
 0x9da   :  { %v1047_v30 = vrot.slane %v1042_v28, %v5692_v51  ;;  %v1051_v31 = vrot.slane %v1042_v28, %v5751_v48 }
 0x9dc   :  { %v1054_v36 = vsub.f32 %v1012_v8, %v1047_v30  ;;  %v1055_v38 = vsub.f32 %v1013_v5, %v1047_v30  ;;  %v1057_v39 = vsub.f32 %v1015_v13, %v1051_v31  ;;  %v1056_v40 = vsub.f32 %v1014_v9, %v1051_v31 }
 0x9de   :  { %v1058_v43 = vmul.f32 1.442695, %v1054_v36  ;;  %v1060_v44 = vmul.f32 1.442695, %v1055_v38  ;;  %v1064_v49 = vmul.f32 1.442695, %v1057_v39 }
 0x9df   :  { %v1062_v50 = vmul.f32 1.442695, %v1056_v40 }
 0x9e0   :  { %5239 = vpow2.f32 %v1058_v43  ;;  %v4610_v43 = vld [vmem:[%s6867_s22 + $0x2] sm:$0x3] }
 0x9e1   :  { %5241 = vpow2.f32 %v1060_v44 }
 0x9e2   :  { %5243 = vpow2.f32 %v1064_v49 }
 0x9e3   :  { %5245 = vpow2.f32 %v1062_v50 }
 0x9ea   :  { %v5240_v53 = vpop.eup %5239 }
 0x9eb   :  { %v5242_v54 = vpop.eup %5241  ;;  %1071 = vperm.xlu0 %5199, %v5240_v53  }
 0x9ec   :  { %1074 = vperm.xlu1 %5200, %v5242_v54   ;;  %v5244_v58 = vpop.eup %5243 }
 0x9ed   :  { %v5246_v61 = vpop.eup %5245 }
 0x9ef   :  { %1080 = vperm.xlu0 %5199, %v5244_v58  }
 0x9f0   :  { %1077 = vperm.xlu1 %5200, %v5246_v61  }
 0xa6a   :  { %v1072_v0 = vpop.permute.xlu0 %1071 }
 0xa6b   :  { %v1075_v5 = vpop.permute.xlu1 %1074  ;;  %v1085_v9 = vrot.slane %v1072_v0, %v5731_v24 }
 0xa6c   :  { %v1089_v8 = vrot.slane %v1075_v5, %v5734_v27 }
 0xa6e   :  { %v1081_v10 = vpop.permute.xlu0 %1080  ;;  %v1090_v16 = vsel %vm480_vm3, %v1089_v8, %v1085_v9 }
 0xa6f   :  { %v1078_v11 = vpop.permute.xlu1 %1077  ;;  %v1098_v12 = vrot.slane %v1081_v10, %v5734_v27 }
 0xa70   :  { %v1094_v13 = vrot.slane %v1078_v11, %v5731_v24 }
 0xa72   :  { %v1099_v17 = vsel %vm480_vm3, %v1098_v12, %v1094_v13 }
 0xa73   :  { %v1100_v18 = vsel %vm491_vm4, %v1099_v17, %v1090_v16 }
 0xa74   :  { %v1102_v20 = vsel %vm494_vm5, %v1100_v18, 0.0 }
 0xa75   :  { %1103 = vadd.xlane.f32.xlu1 %v1102_v20 }
 0xb02   :  { %v1104_v21 = vpop.xlane.xlu1 %1103 }
 0xb03   :  { %v1109_v22 = vrot.slane %v1104_v21, %v5692_v51  ;;  %v1113_v28 = vrot.slane %v1104_v21, %v5751_v48 }
 0xb05   :  { %5247 = vrcp.f32 %v1109_v22 }
 0xb06   :  { %5249 = vrcp.f32 %v1113_v28 }
 0xb0f   :  { %v5248_v30 = vpop.eup %5247 }
 0xb10   :  { %v1117_v31 = vmul.f32 %v5248_v30, %v5240_v53  ;;  %v1118_v36 = vmul.f32 %v5248_v30, %v5242_v54  ;;  %v5250_v38 = vpop.eup %5249 }
 0xb11   :  { %v1120_v39 = vmul.f32 %v5250_v38, %v5246_v61  ;;  %v1121_v40 = vmul.f32 %v5250_v38, %v5244_v58 }
 0xb12   :  { %1124 = vperm.xlu0 %5199, %v1117_v31  }
 0xb16   :  { %1129 = vperm.xlu0 %5199, %v1118_v36  }
 0xb1a   :  { %1134 = vperm.xlu0 %5199, %v1120_v39  }
 0xb1e   :  { %1139 = vperm.xlu0 %5199, %v1121_v40  }
 0xb22   :  { %1169 = vrot.lane.b32.xlu0 %v4610_v43, %s5506_s23 }
 0xb91   :  { %v1125_v44 = vpop.permute.xlu0 %1124 }
 0xb92   :  { %v1142_v49 = vmul.f32 %v1125_v44, %v5644_v23 }
 0xb94   :  { %v1146_v54 = vsel %vm181_vm1, %v1142_v49, 0.0 }
 0xb95   :  { %v1130_v50 = vpop.permute.xlu0 %1129 }
 0xb96   :  { %v1143_v53 = vmul.f32 %v1130_v50, %v5648_v26 }
 0xb98   :  { %v1147_v0 = vsel %vm181_vm1, %v1143_v53, 0.0 }
 0xb99   :  { %v1148_v61 = vadd.f32 %v1147_v0, %v1146_v54  ;;  %v1135_v5 = vpop.permute.xlu0 %1134 }
 0xb9a   :  { %v1144_v8 = vmul.f32 %v1135_v5, %v5660_v32 }
 0xb9b   :  { %v1149_v58 = vrot.slane %v1148_v61, 4 }
 0xb9c   :  { %v1155_v12 = vsel %vm181_vm1, %v1144_v8, 0.0 }
 0xb9d   :  { %v1150_v9 = vadd.f32 %v1149_v58, %v1148_v61  ;;  %v1140_v10 = vpop.permute.xlu0 %1139 }
 0xb9e   :  { %v1145_v11 = vmul.f32 %v1140_v10, %v5665_v34 }
 0xb9f   :  { %v1151_v16 = vrot.slane %v1150_v9, 2 }
 0xba0   :  { %v1156_v13 = vsel %vm181_vm1, %v1145_v11, 0.0 }
 0xba1   :  { %v1157_v17 = vadd.f32 %v1156_v13, %v1155_v12  ;;  %v1152_v20 = vadd.f32 %v1151_v16, %v1150_v9  ;;  %v1170_v39 = vpop.permute.xlu0 %1169 }
 0xba3   :  { %v1158_v18 = vrot.slane %v1157_v17, 4  ;;  %v1153_v30 = vrot.slane %v1152_v20, 1 }
 0xba5   :  { %v1159_v21 = vadd.f32 %v1158_v18, %v1157_v17  ;;  %v1154_v36 = vadd.f32 %v1153_v30, %v1152_v20 }
 0xba7   :  { %v1160_v22 = vrot.slane %v1159_v21, 2 }
 0xba9   :  { %v1161_v28 = vadd.f32 %v1160_v22, %v1159_v21 }
 0xbab   :  { %v1162_v31 = vrot.slane %v1161_v28, 1 }
 0xbad   :  { %v1163_v38 = vadd.f32 %v1162_v31, %v1161_v28 }
 0xbaf   :  { %v1166_v40 = vsel %vm491_vm4, %v1163_v38, %v1154_v36 }
 0xbb0   :  { %v1172_v43 = vsel %vm181_vm1, %v1166_v40, %v1170_v39 }
 0xbb1   :  { %v1173_v44 = vsel %vm70_vm0, %v1172_v43, %v5899_v62 }
 0xbb2   :  { %4613 = vmatmul.mubr.msk.f32.vlgmr.msra.gmra.mrb[6].mxu0 %vm640_vm6, %v1173_v44 }
 0xbb3   :  { %5030 = vmatpush1.bf16.msra.mxu0 %v5783_v47  ;;  %1766 = vmatprep.mubr.f32.mxu0 %v5502_v15 }
 0xbb4   :  { %5032 = vmatprep.subr.bf16.mxu0 %v5793_v52 }
 0xbb7   :  { %5034 = vmatpush1.bf16.msra.mxu0 %v5801_v57 }
 0xbb8   :  { %5036 = vmatprep.subr.bf16.mxu0 %v5814_v63 }
 0xbbb   :  { %5038 = vmatpush1.bf16.msra.mxu0 %v5825_v3 }
 0xbbc   :  { %5040 = vmatprep.subr.bf16.mxu0 %v5827_v4 }
 0xbbf   :  { %5042 = vmatpush1.bf16.msra.mxu0 %v5837_v7 }
 0xbc0   :  { %5056 = vmatprep.subr.bf16.mxu0 %v5775_v41 }
 0xc85   :  { %v1243_v49 = vpop.f32.mrb[6].mxu0 }
 0xc86   :  { %v1244_v50 = vadd.f32 %v1243_v49, %v5867_v1  ;;  %v1245_v53 = vpop.f32.mrb[7].mxu0 }
 0xc87   :  { %v1246_v54 = vadd.f32 %v1245_v53, %v5871_v6 }
 0xc88   :  { %1249 = vrot.lane.b32.xlu0 %v1244_v50, %s5507_s17 }
 0xc8c   :  { %1270 = vrot.lane.b32.xlu0 %v1246_v54, %s5508_s18 }
 0xcfa   :  { %v1250_v0 = vpop.permute.xlu0 %1249 }
 0xcfb   :  { %v1252_v61 = vadd.f32 %v1250_v0, %v1244_v50 }
 0xcfd   :  { %v4614_v5 = vmul.f32 -1.442695, %v1252_v61 }
 0xcfe   :  { %v1271_v10 = vpop.permute.xlu0 %1270 }
 0xcff   :  { %5251 = vpow2.f32 %v4614_v5 }
 0xd09   :  { %v5252_v58 = vpop.eup %5251 }
 0xd0a   :  { %v1256_v8 = vadd.f32 1.0, %v5252_v58 }
 0xd0c   :  { %5253 = vrcp.f32 %v1256_v8 }
 0xd16   :  { %v5254_v9 = vpop.eup %5253 }
 0xd17   :  { %v1273_v11 = vmul.f32 %v5254_v9, %v1271_v10 }
 0xd19   :  { %1275 = vrot.lane.b32.xlu0 %v1273_v11, %s5509_s12 }
 0xd1d   :  { %1260 = vrot.lane.b32.xlu0 %v1246_v54, %s5507_s17 }
 0xd8b   :  { %v1276_v12 = vpop.permute.xlu0 %1275 }
 0xd8c   :  { %v1278_v13 = vadd.f32 %v1276_v12, %v1244_v50 }
 0xd8e   :  { %5255 = vtanh.f32 %v1278_v13 }
 0xd8f   :  { %v1261_v17 = vpop.permute.xlu0 %1260 }
 0xd90   :  { %v1263_v18 = vadd.f32 %v1261_v17, %v1244_v50 }
 0xd92   :  { %v4615_v20 = vmul.f32 -1.442695, %v1263_v18 }
 0xd94   :  { %5257 = vpow2.f32 %v4615_v20 }
 0xd98   :  { %v5256_v16 = vpop.eup %5255 }
 0xd99   :  { %1282 = vrot.lane.b32.xlu1 %v5256_v16, %s5508_s18 }
 0xd9e   :  { %v5258_v21 = vpop.eup %5257 }
 0xd9f   :  { %v1267_v22 = vadd.f32 1.0, %v5258_v21 }
 0xda1   :  { %5259 = vrcp.f32 %v1267_v22 }
 0xdab   :  { %v5260_v28 = vpop.eup %5259 }
 0xdac   :  { %v1280_v30 = vsub.f32 1.0, %v5260_v28  ;;  %v1286_v38 = vmul.f32 %v5260_v28, %v5899_v62 }
 0xe0b   :  { %v1283_v31 = vpop.permute.xlu1 %1282 }
 0xe0c   :  { %v1285_v36 = vmul.f32 %v1283_v31, %v1280_v30 }
 0xe0e   :  { %v5995_v39 = vadd.f32 %v1286_v38, %v1285_v36 }
 0xe10   :  { %1289 = vrot.lane.b32.xlu0 %v5995_v39, %s5508_s18 }
 0xe82   :  { %v1290_v40 = vpop.permute.xlu0 %1289 }
 0xe83   :  { %4819 = vmatmul.mubr.msk.f32.vlgmr.msra.gmra.mrb[10].mxu1 %vm70_vm0, %v1290_v40 }
 0xe84   :  { %5023 = vmatpush3.bf16.msra.mxu1 %v5646_v25  ;;  %4829 = vmatprep.mubr.msk.f32.mxu1 %vm5503_vm2, %v5502_v15 }
 0xe85   :  { %5024 = vmatprep.subr.bf16.mxu1 %v5501_v14 }
 0xe88   :  { %5026 = vmatpush3.bf16.msra.mxu1 %v5663_v33 }
 0xe89   :  { %5043 = vmatprep.subr.bf16.mxu1 %v5501_v14 }
 0xe8b   :  { %4830 = vmatmul.mubr.msk.f32.vlgmr.msra.gmra.mrb[12].mxu1 %vm70_vm0, %v1290_v40 }
 0xe8c   :  { %5045 = vmatpush3.bf16.msra.mxu1 %v5887_v35  ;;  %4840 = vmatprep.mubr.msk.f32.mxu1 %vm5503_vm2, %v5502_v15 }
 0xe8d   :  { %5046 = vmatprep.subr.bf16.mxu1 %v5501_v14 }
 0xe90   :  { %5048 = vmatpush3.bf16.msra.mxu1 %v5893_v37 }
 0xe91   :  { %5049 = vmatprep.subr.bf16.mxu1 %v5501_v14 }
 0xf56   :  { %v6013_v62 = vpop.f32.mrb[10].mxu1 }
 0xf57   :  { %v4820_v43 = vpop.f32.mrb[11].mxu1 }
 0xf5e   :  { %v1476_v44 = vpop.f32.mrb[12].mxu1 }
 0xf5f   :  { %v1477_v49 = vadd.f32 %v5684_v45, %v1476_v44  ;;  %v4831_v50 = vpop.f32.mrb[13].mxu1 }
 0xf61   :  { %v1487_v53 = vrot.slane %v1477_v49, %v5687_v46 }
 0xf63   :  { %v1488_v54 = vcombine.high %v1487_v53, %v1487_v53  ;;  %v1495_v0 = vrot.slane %v1487_v53, %v5687_v46 }
 0xf65   :  { %v1502_v61 = vrot.slane %v1488_v54, %v5687_v46  ;;  %v1506_v5 = vrot.slane %v1495_v0, %v5692_v51 }
 0xf67   :  { %v1510_v58 = vrot.slane %v1502_v61, %v5692_v51  ;;  %v1513_v8 = vadd.f32 %v1506_v5, %v5700_v56  ;;  %v1514_v9 = vadd.f32 %v1506_v5, %v5698_v55 }
 0xf69   :  { %v1515_v10 = vadd.f32 %v1510_v58, %v5706_v60  ;;  %v1516_v45 = vadd.f32 %v1510_v58, %v5704_v59  ;;  %5261 = vtanh.f32 %v1513_v8 }
 0xf6a   :  { %5263 = vtanh.f32 %v1514_v9 }
 0xf6b   :  { %5265 = vtanh.f32 %v1515_v10 }
 0xf6c   :  { %5267 = vtanh.f32 %v1516_v45 }
 0xf73   :  { %v5262_v11 = vpop.eup %5261 }
 0xf74   :  { %v5264_v12 = vpop.eup %5263  ;;  %v1521_v13 = vmul.f32 %v5262_v11, %v5716_v2 }
 0xf75   :  { %v5266_v16 = vpop.eup %5265  ;;  %v1522_v17 = vmul.f32 %v5264_v12, %v5716_v2 }
 0xf76   :  { %v1525_v18 = vsel %vm181_vm1, %v1521_v13, 0.0  ;;  %v1523_v20 = vmul.f32 %v5266_v16, %v5716_v2  ;;  %v5268_v21 = vpop.eup %5267 }
 0xf77   :  { %v1528_v22 = vsel %vm181_vm1, %v1522_v17, 0.0  ;;  %1526 = vadd.xlane.f32.xlu0 %v1525_v18  ;;  %v1524_v30 = vmul.f32 %v5268_v21, %v5716_v2 }
 0xf78   :  { %1529 = vadd.xlane.f32.xlu1 %v1528_v22  ;;  %v1531_v28 = vsel %vm181_vm1, %v1523_v20, 0.0 }
 0xf79   :  { %v1534_v31 = vsel %vm181_vm1, %v1524_v30, 0.0 }
 0xf7b   :  { %1532 = vadd.xlane.f32.xlu0 %v1531_v28 }
 0xf7f   :  { %1535 = vadd.xlane.f32.xlu0 %v1534_v31 }
0x1004   :  { %v1527_v36 = vpop.xlane.xlu0 %1526 }
0x1005   :  { %v1530_v38 = vpop.xlane.xlu1 %1529  ;;  %v1537_v44 = vadd.f32 %v1527_v36, %v5736_v29 }
0x1006   :  { %v1538_v43 = vadd.f32 %v1530_v38, %v5736_v29 }
0x1007   :  { %v1548_v54 = vrot.slane %v1537_v44, %v5731_v24 }
0x1008   :  { %v1533_v40 = vpop.xlane.xlu0 %1532  ;;  %v1552_v53 = vrot.slane %v1538_v43, %v5734_v27 }
0x1009   :  { %v1539_v49 = vadd.f32 %v1533_v40, %v5736_v29 }
0x100a   :  { %v1553_v5 = vsel %vm480_vm3, %v1552_v53, %v1548_v54 }
0x100b   :  { %v1557_v0 = vrot.slane %v1539_v49, %v5731_v24 }
0x100c   :  { %v1536_v50 = vpop.xlane.xlu0 %1535 }
0x100d   :  { %v1540_v2 = vadd.f32 %v1536_v50, %v5736_v29 }
0x100f   :  { %v1561_v61 = vrot.slane %v1540_v2, %v5734_v27 }
0x1011   :  { %v1562_v58 = vsel %vm480_vm3, %v1561_v61, %v1557_v0 }
0x1012   :  { %v1563_v8 = vsel %vm491_vm4, %v1562_v58, %v1553_v5 }
0x1013   :  { %v1565_v9 = vsel %vm494_vm5, %v1563_v8, -inf }
0x1014   :  { %1566 = vmax.xlane.f32.xlu0 %v1565_v9 }
0x10a1   :  { %v1567_v10 = vpop.xlane.xlu0 %1566 }
0x10a2   :  { %v1572_v45 = vrot.slane %v1567_v10, %v5692_v51  ;;  %v1576_v11 = vrot.slane %v1567_v10, %v5751_v48 }
0x10a4   :  { %v1579_v12 = vsub.f32 %v1537_v44, %v1572_v45  ;;  %v1580_v13 = vsub.f32 %v1538_v43, %v1572_v45  ;;  %v1582_v16 = vsub.f32 %v1540_v2, %v1576_v11  ;;  %v1581_v17 = vsub.f32 %v1539_v49, %v1576_v11 }
0x10a6   :  { %v1583_v18 = vmul.f32 1.442695, %v1579_v12  ;;  %v1585_v20 = vmul.f32 1.442695, %v1580_v13  ;;  %v1589_v21 = vmul.f32 1.442695, %v1582_v16 }
0x10a7   :  { %v1587_v22 = vmul.f32 1.442695, %v1581_v17  ;;  %v4617_v17 = vld [vmem:[%s6867_s22 + $0x4] sm:$0x3] }
0x10a8   :  { %5269 = vpow2.f32 %v1583_v18 }
0x10a9   :  { %5271 = vpow2.f32 %v1585_v20 }
0x10aa   :  { %5273 = vpow2.f32 %v1589_v21 }
0x10ab   :  { %5275 = vpow2.f32 %v1587_v22 }
0x10b2   :  { %v5270_v28 = vpop.eup %5269 }
0x10b3   :  { %v5272_v30 = vpop.eup %5271  ;;  %1596 = vperm.xlu0 %5199, %v5270_v28  }
0x10b4   :  { %1599 = vperm.xlu1 %5200, %v5272_v30   ;;  %v5274_v31 = vpop.eup %5273 }
0x10b5   :  { %v5276_v36 = vpop.eup %5275 }
0x10b7   :  { %1605 = vperm.xlu0 %5199, %v5274_v31  }
0x10b8   :  { %1602 = vperm.xlu1 %5200, %v5276_v36  }
0x1132   :  { %v1597_v38 = vpop.permute.xlu0 %1596 }
0x1133   :  { %v1600_v40 = vpop.permute.xlu1 %1599  ;;  %v1610_v44 = vrot.slane %v1597_v38, %v5731_v24 }
0x1134   :  { %v1614_v43 = vrot.slane %v1600_v40, %v5734_v27 }
0x1136   :  { %v1606_v49 = vpop.permute.xlu0 %1605  ;;  %v1615_v2 = vsel %vm480_vm3, %v1614_v43, %v1610_v44 }
0x1137   :  { %v1603_v50 = vpop.permute.xlu1 %1602  ;;  %v1623_v53 = vrot.slane %v1606_v49, %v5734_v27 }
0x1138   :  { %v1619_v54 = vrot.slane %v1603_v50, %v5731_v24 }
0x113a   :  { %v1624_v0 = vsel %vm480_vm3, %v1623_v53, %v1619_v54 }
0x113b   :  { %v1625_v61 = vsel %vm491_vm4, %v1624_v0, %v1615_v2 }
0x113c   :  { %v1627_v5 = vsel %vm494_vm5, %v1625_v61, 0.0 }
0x113d   :  { %1628 = vadd.xlane.f32.xlu1 %v1627_v5 }
0x11ca   :  { %v1629_v58 = vpop.xlane.xlu1 %1628 }
0x11cb   :  { %v1634_v8 = vrot.slane %v1629_v58, %v5692_v51  ;;  %v1638_v9 = vrot.slane %v1629_v58, %v5751_v48 }
0x11cd   :  { %5277 = vrcp.f32 %v1634_v8 }
0x11ce   :  { %5279 = vrcp.f32 %v1638_v9 }
0x11d7   :  { %v5278_v10 = vpop.eup %5277 }
0x11d8   :  { %v1642_v45 = vmul.f32 %v5278_v10, %v5270_v28  ;;  %v1643_v11 = vmul.f32 %v5278_v10, %v5272_v30  ;;  %v5280_v12 = vpop.eup %5279 }
0x11d9   :  { %v1645_v13 = vmul.f32 %v5280_v12, %v5276_v36  ;;  %v1646_v16 = vmul.f32 %v5280_v12, %v5274_v31 }
0x11da   :  { %1649 = vperm.xlu0 %5199, %v1642_v45  }
0x11de   :  { %1654 = vperm.xlu0 %5199, %v1643_v11  }
0x11e2   :  { %1659 = vperm.xlu0 %5199, %v1645_v13  }
0x11e6   :  { %1664 = vperm.xlu0 %5199, %v1646_v16  }
0x11ea   :  { %1694 = vrot.lane.b32.xlu0 %v4617_v17, %s5506_s23 }
0x1259   :  { %v1650_v18 = vpop.permute.xlu0 %1649 }
0x125a   :  { %v1667_v20 = vmul.f32 %v1650_v18, %v5644_v23 }
0x125c   :  { %v1671_v28 = vsel %vm181_vm1, %v1667_v20, 0.0 }
0x125d   :  { %v1655_v21 = vpop.permute.xlu0 %1654 }
0x125e   :  { %v1668_v22 = vmul.f32 %v1655_v21, %v5648_v26 }
0x1260   :  { %v1672_v30 = vsel %vm181_vm1, %v1668_v22, 0.0 }
0x1261   :  { %v1673_v36 = vadd.f32 %v1672_v30, %v1671_v28  ;;  %v1660_v38 = vpop.permute.xlu0 %1659 }
0x1262   :  { %v1669_v40 = vmul.f32 %v1660_v38, %v5660_v32 }
0x1263   :  { %v1674_v31 = vrot.slane %v1673_v36, 4 }
0x1264   :  { %v1680_v50 = vsel %vm181_vm1, %v1669_v40, 0.0 }
0x1265   :  { %v1675_v43 = vadd.f32 %v1674_v31, %v1673_v36  ;;  %v1665_v44 = vpop.permute.xlu0 %1664 }
0x1266   :  { %v1670_v49 = vmul.f32 %v1665_v44, %v5665_v34 }
0x1267   :  { %v1676_v54 = vrot.slane %v1675_v43, 2 }
0x1268   :  { %v1681_v53 = vsel %vm181_vm1, %v1670_v49, 0.0 }
0x1269   :  { %v1682_v2 = vadd.f32 %v1681_v53, %v1680_v50  ;;  %v1677_v61 = vadd.f32 %v1676_v54, %v1675_v43  ;;  %v1695_v12 = vpop.permute.xlu0 %1694 }
0x126b   :  { %v1683_v0 = vrot.slane %v1682_v2, 4  ;;  %v1678_v9 = vrot.slane %v1677_v61, 1 }
0x126d   :  { %v1684_v5 = vadd.f32 %v1683_v0, %v1682_v2  ;;  %v1679_v45 = vadd.f32 %v1678_v9, %v1677_v61 }
0x126f   :  { %v1685_v58 = vrot.slane %v1684_v5, 2 }
0x1271   :  { %v1686_v8 = vadd.f32 %v1685_v58, %v1684_v5 }
0x1273   :  { %v1687_v10 = vrot.slane %v1686_v8, 1 }
0x1275   :  { %v1688_v11 = vadd.f32 %v1687_v10, %v1686_v8 }
0x1277   :  { %v1691_v13 = vsel %vm491_vm4, %v1688_v11, %v1679_v45 }
0x1278   :  { %v1697_v16 = vsel %vm181_vm1, %v1691_v13, %v1695_v12 }
0x1279   :  { %v1698_v17 = vsel %vm70_vm0, %v1697_v16, %v5995_v39 }
0x127a   :  { %4620 = vmatmul.mubr.msk.f32.vlgmr.msra.gmra.mrb[8].mxu0 %vm640_vm6, %v1698_v17  ;;  %v6114_v17 = vld [vmem:[%s6856_s8] ss:$0 sm:$0xff] }
0x127b   :  { %5058 = vmatpush1.bf16.msra.mxu0 %v5783_v47  ;;  %2291 = vmatprep.mubr.f32.mxu0 %v5502_v15 }
0x127c   :  { %5060 = vmatprep.subr.bf16.mxu0 %v5793_v52 }
0x127f   :  { %5062 = vmatpush1.bf16.msra.mxu0 %v5801_v57 }
0x1280   :  { %5064 = vmatprep.subr.bf16.mxu0 %v5814_v63 }
0x1283   :  { %5066 = vmatpush1.bf16.msra.mxu0 %v5825_v3 }
0x1284   :  { %5068 = vmatprep.subr.bf16.mxu0 %v5827_v4 }
0x1287   :  { %5070 = vmatpush1.bf16.msra.mxu0 %v5837_v7 }
0x1288   :  { %5084 = vmatprep.subr.bf16.mxu0 %v5775_v41 }
0x134d   :  { %v1768_v18 = vpop.f32.mrb[8].mxu0 }
0x134e   :  { %v1769_v20 = vadd.f32 %v1768_v18, %v5867_v1  ;;  %v1770_v21 = vpop.f32.mrb[9].mxu0 }
0x134f   :  { %v1771_v22 = vadd.f32 %v1770_v21, %v5871_v6 }
0x1350   :  { %1774 = vrot.lane.b32.xlu0 %v1769_v20, %s5507_s17 }
0x1354   :  { %1795 = vrot.lane.b32.xlu0 %v1771_v22, %s5508_s18 }
0x13c2   :  { %v1775_v28 = vpop.permute.xlu0 %1774 }
0x13c3   :  { %v1777_v30 = vadd.f32 %v1775_v28, %v1769_v20 }
0x13c5   :  { %v4621_v36 = vmul.f32 -1.442695, %v1777_v30 }
0x13c6   :  { %v1796_v43 = vpop.permute.xlu0 %1795 }
0x13c7   :  { %5281 = vpow2.f32 %v4621_v36 }
0x13d1   :  { %v5282_v38 = vpop.eup %5281 }
0x13d2   :  { %v1781_v31 = vadd.f32 1.0, %v5282_v38 }
0x13d4   :  { %5283 = vrcp.f32 %v1781_v31 }
0x13de   :  { %v5284_v40 = vpop.eup %5283 }
0x13df   :  { %v1798_v44 = vmul.f32 %v5284_v40, %v1796_v43 }
0x13e1   :  { %1800 = vrot.lane.b32.xlu0 %v1798_v44, %s5509_s12 }
0x13e5   :  { %1785 = vrot.lane.b32.xlu0 %v1771_v22, %s5507_s17 }
0x1453   :  { %v1801_v49 = vpop.permute.xlu0 %1800 }
0x1454   :  { %v1803_v50 = vadd.f32 %v1801_v49, %v1769_v20 }
0x1456   :  { %5285 = vtanh.f32 %v1803_v50 }
0x1457   :  { %v1786_v54 = vpop.permute.xlu0 %1785 }
0x1458   :  { %v1788_v2 = vadd.f32 %v1786_v54, %v1769_v20 }
0x145a   :  { %v4622_v0 = vmul.f32 -1.442695, %v1788_v2 }
0x145c   :  { %5287 = vpow2.f32 %v4622_v0 }
0x1460   :  { %v5286_v53 = vpop.eup %5285 }
0x1461   :  { %1807 = vrot.lane.b32.xlu1 %v5286_v53, %s5508_s18  ;;  %v6129_v53 = vld [vmem:[%s6857_s9] ss:$0 sm:$0xff] }
0x1466   :  { %v5288_v61 = vpop.eup %5287 }
0x1467   :  { %v1792_v5 = vadd.f32 1.0, %v5288_v61 }
0x1469   :  { %5289 = vrcp.f32 %v1792_v5 }
0x1473   :  { %v5290_v58 = vpop.eup %5289 }
0x1474   :  { %v1805_v8 = vsub.f32 1.0, %v5290_v58  ;;  %v1811_v45 = vmul.f32 %v5290_v58, %v5995_v39 }
0x14d3   :  { %v1808_v9 = vpop.permute.xlu1 %1807 }
0x14d4   :  { %v1810_v10 = vmul.f32 %v1808_v9, %v1805_v8 }
0x14d6   :  { %v6091_v11 = vadd.f32 %v1811_v45, %v1810_v10 }
0x14d8   :  { %1814 = vrot.lane.b32.xlu0 %v6091_v11, %s5508_s18 }
0x154a   :  { %v1815_v12 = vpop.permute.xlu0 %1814 }
0x154b   :  { %4841 = vmatmul.mubr.msk.f32.vlgmr.msra.gmra.mrb[14].mxu1 %vm70_vm0, %v1815_v12 }
0x154c   :  { %5051 = vmatpush3.bf16.msra.mxu1 %v5646_v25  ;;  %4851 = vmatprep.mubr.msk.f32.mxu1 %vm5503_vm2, %v5502_v15 }
0x154d   :  { %5052 = vmatprep.subr.bf16.mxu1 %v5501_v14 }
0x1550   :  { %5054 = vmatpush3.bf16.msra.mxu1 %v5663_v33 }
0x1551   :  { %5071 = vmatprep.subr.bf16.mxu1 %v5501_v14 }
0x1553   :  { %4852 = vmatmul.mubr.msk.f32.vlgmr.msra.gmra.mrb[16].mxu1 %vm70_vm0, %v1815_v12 }
0x1554   :  { %5073 = vmatpush3.bf16.msra.mxu1 %v5887_v35  ;;  %4862 = vmatprep.mubr.msk.f32.mxu1 %vm5503_vm2, %v5502_v15 }
0x1555   :  { %5074 = vmatprep.subr.bf16.mxu1 %v5501_v14 }
0x1558   :  { %5076 = vmatpush3.bf16.msra.mxu1 %v5893_v37 }
0x1559   :  { %5077 = vmatprep.subr.bf16.mxu1 %v5501_v14 }
0x161e   :  { %v6109_v39 = vpop.f32.mrb[14].mxu1 }
0x161f   :  { %v4842_v13 = vpop.f32.mrb[15].mxu1 }
0x1626   :  { %v2001_v16 = vpop.f32.mrb[16].mxu1 }
0x1627   :  { %v2002_v18 = vadd.f32 %v6114_v17, %v2001_v16  ;;  %v4853_v20 = vpop.f32.mrb[17].mxu1 }
0x1629   :  { %v2012_v21 = vrot.slane %v2002_v18, %v5687_v46 }
0x162b   :  { %v2013_v22 = vcombine.high %v2012_v21, %v2012_v21  ;;  %v2020_v28 = vrot.slane %v2012_v21, %v5687_v46 }
0x162d   :  { %v2027_v30 = vrot.slane %v2013_v22, %v5687_v46  ;;  %v2031_v36 = vrot.slane %v2020_v28, %v5692_v51 }
0x162f   :  { %v2035_v38 = vrot.slane %v2027_v30, %v5692_v51  ;;  %v2038_v31 = vadd.f32 %v2031_v36, %v5700_v56  ;;  %v2039_v40 = vadd.f32 %v2031_v36, %v5698_v55 }
0x1631   :  { %v2040_v43 = vadd.f32 %v2035_v38, %v5706_v60  ;;  %v2041_v44 = vadd.f32 %v2035_v38, %v5704_v59  ;;  %5291 = vtanh.f32 %v2038_v31 }
0x1632   :  { %5293 = vtanh.f32 %v2039_v40 }
0x1633   :  { %5295 = vtanh.f32 %v2040_v43 }
0x1634   :  { %5297 = vtanh.f32 %v2041_v44 }
0x163b   :  { %v5292_v49 = vpop.eup %5291 }
0x163c   :  { %v5294_v50 = vpop.eup %5293  ;;  %v2046_v54 = vmul.f32 %v6129_v53, %v5292_v49 }
0x163d   :  { %v5296_v2 = vpop.eup %5295  ;;  %v2047_v0 = vmul.f32 %v6129_v53, %v5294_v50 }
0x163e   :  { %v2050_v61 = vsel %vm181_vm1, %v2046_v54, 0.0  ;;  %v2048_v5 = vmul.f32 %v6129_v53, %v5296_v2  ;;  %v5298_v58 = vpop.eup %5297 }
0x163f   :  { %v2053_v8 = vsel %vm181_vm1, %v2047_v0, 0.0  ;;  %2051 = vadd.xlane.f32.xlu0 %v2050_v61  ;;  %v2049_v10 = vmul.f32 %v6129_v53, %v5298_v58 }
0x1640   :  { %2054 = vadd.xlane.f32.xlu1 %v2053_v8  ;;  %v2056_v9 = vsel %vm181_vm1, %v2048_v5, 0.0 }
0x1641   :  { %v2059_v45 = vsel %vm181_vm1, %v2049_v10, 0.0 }
0x1643   :  { %2057 = vadd.xlane.f32.xlu0 %v2056_v9 }
0x1647   :  { %2060 = vadd.xlane.f32.xlu0 %v2059_v45 }
0x16cc   :  { %v2052_v12 = vpop.xlane.xlu0 %2051 }
0x16cd   :  { %v2055_v13 = vpop.xlane.xlu1 %2054  ;;  %v2062_v20 = vadd.f32 %v2052_v12, %v5736_v29 }
0x16ce   :  { %v2063_v18 = vadd.f32 %v2055_v13, %v5736_v29 }
0x16cf   :  { %v2073_v30 = vrot.slane %v2062_v20, %v5731_v24 }
0x16d0   :  { %v2058_v16 = vpop.xlane.xlu0 %2057  ;;  %v2077_v28 = vrot.slane %v2063_v18, %v5734_v27 }
0x16d1   :  { %v2064_v21 = vadd.f32 %v2058_v16, %v5736_v29 }
0x16d2   :  { %v2078_v40 = vsel %vm480_vm3, %v2077_v28, %v2073_v30 }
0x16d3   :  { %v2082_v38 = vrot.slane %v2064_v21, %v5731_v24 }
0x16d4   :  { %v2061_v22 = vpop.xlane.xlu0 %2060 }
0x16d5   :  { %v2065_v36 = vadd.f32 %v2061_v22, %v5736_v29 }
0x16d7   :  { %v2086_v31 = vrot.slane %v2065_v36, %v5734_v27 }
0x16d9   :  { %v2087_v43 = vsel %vm480_vm3, %v2086_v31, %v2082_v38 }
0x16da   :  { %v2088_v44 = vsel %vm491_vm4, %v2087_v43, %v2078_v40 }
0x16db   :  { %v2090_v49 = vsel %vm494_vm5, %v2088_v44, -inf }
0x16dc   :  { %2091 = vmax.xlane.f32.xlu0 %v2090_v49 }
0x1769   :  { %v2092_v50 = vpop.xlane.xlu0 %2091 }
0x176a   :  { %v2097_v54 = vrot.slane %v2092_v50, %v5692_v51  ;;  %v2101_v2 = vrot.slane %v2092_v50, %v5751_v48 }
0x176c   :  { %v2104_v0 = vsub.f32 %v2062_v20, %v2097_v54  ;;  %v2105_v61 = vsub.f32 %v2063_v18, %v2097_v54  ;;  %v2106_v5 = vsub.f32 %v2064_v21, %v2101_v2  ;;  %v2107_v58 = vsub.f32 %v2065_v36, %v2101_v2 }
0x176e   :  { %v2108_v8 = vmul.f32 1.442695, %v2104_v0  ;;  %v2110_v9 = vmul.f32 1.442695, %v2105_v61  ;;  %v2112_v10 = vmul.f32 1.442695, %v2106_v5 }
0x176f   :  { %v2114_v45 = vmul.f32 1.442695, %v2107_v58 }
0x1770   :  { %5299 = vpow2.f32 %v2108_v8 }
0x1771   :  { %5301 = vpow2.f32 %v2110_v9 }
0x1772   :  { %5303 = vpow2.f32 %v2112_v10  ;;  %v4624_v10 = vld [vmem:[%s6867_s22 + $0x6] sm:$0x3] }
0x1773   :  { %5305 = vpow2.f32 %v2114_v45 }
0x177a   :  { %v5300_v12 = vpop.eup %5299 }
0x177b   :  { %v5302_v13 = vpop.eup %5301  ;;  %2121 = vperm.xlu0 %5199, %v5300_v12  }
0x177c   :  { %2124 = vperm.xlu1 %5200, %v5302_v13   ;;  %v5304_v16 = vpop.eup %5303 }
0x177d   :  { %v5306_v22 = vpop.eup %5305 }
0x177f   :  { %2127 = vperm.xlu0 %5199, %v5304_v16  }
0x1780   :  { %2130 = vperm.xlu1 %5200, %v5306_v22  }
0x17fa   :  { %v2122_v20 = vpop.permute.xlu0 %2121 }
0x17fb   :  { %v2125_v18 = vpop.permute.xlu1 %2124  ;;  %v2135_v28 = vrot.slane %v2122_v20, %v5731_v24 }
0x17fc   :  { %v2139_v21 = vrot.slane %v2125_v18, %v5734_v27 }
0x17fe   :  { %v2128_v30 = vpop.permute.xlu0 %2127  ;;  %v2140_v40 = vsel %vm480_vm3, %v2139_v21, %v2135_v28 }
0x17ff   :  { %v2131_v36 = vpop.permute.xlu1 %2130  ;;  %v2144_v38 = vrot.slane %v2128_v30, %v5731_v24 }
0x1800   :  { %v2148_v31 = vrot.slane %v2131_v36, %v5734_v27 }
0x1802   :  { %v2149_v43 = vsel %vm480_vm3, %v2148_v31, %v2144_v38 }
0x1803   :  { %v2150_v44 = vsel %vm491_vm4, %v2149_v43, %v2140_v40 }
0x1804   :  { %v2152_v49 = vsel %vm494_vm5, %v2150_v44, 0.0 }
0x1805   :  { %2153 = vadd.xlane.f32.xlu0 %v2152_v49 }
0x1892   :  { %v2154_v50 = vpop.xlane.xlu0 %2153 }
0x1893   :  { %v2159_v54 = vrot.slane %v2154_v50, %v5692_v51  ;;  %v2163_v2 = vrot.slane %v2154_v50, %v5751_v48 }
0x1895   :  { %5307 = vrcp.f32 %v2159_v54 }
0x1896   :  { %5309 = vrcp.f32 %v2163_v2 }
0x189f   :  { %v5308_v0 = vpop.eup %5307 }
0x18a0   :  { %v2167_v61 = vmul.f32 %v5308_v0, %v5300_v12  ;;  %v2168_v5 = vmul.f32 %v5308_v0, %v5302_v13  ;;  %v5310_v58 = vpop.eup %5309 }
0x18a1   :  { %v2170_v8 = vmul.f32 %v5310_v58, %v5304_v16  ;;  %v2171_v9 = vmul.f32 %v5310_v58, %v5306_v22 }
0x18a2   :  { %2174 = vperm.xlu1 %5200, %v2167_v61  }
0x18a6   :  { %2179 = vperm.xlu1 %5200, %v2168_v5  }
0x18aa   :  { %2184 = vperm.xlu1 %5200, %v2170_v8  }
0x18ae   :  { %2189 = vperm.xlu1 %5200, %v2171_v9  }
0x18b2   :  { %2219 = vrot.lane.b32.xlu1 %v4624_v10, %s5506_s23 }
0x1921   :  { %v2175_v45 = vpop.permute.xlu1 %2174 }
0x1922   :  { %v2192_v20 = vmul.f32 %v2175_v45, %v5644_v23 }
0x1924   :  { %v2196_v13 = vsel %vm181_vm1, %v2192_v20, 0.0 }
0x1925   :  { %v2180_v18 = vpop.permute.xlu1 %2179 }
0x1926   :  { %v2193_v12 = vmul.f32 %v2180_v18, %v5648_v26 }
0x1928   :  { %v2197_v21 = vsel %vm181_vm1, %v2193_v12, 0.0 }
0x1929   :  { %v2198_v16 = vadd.f32 %v2197_v21, %v2196_v13  ;;  %v2185_v28 = vpop.permute.xlu1 %2184 }
0x192a   :  { %v2194_v30 = vmul.f32 %v2185_v28, %v5660_v32 }
0x192b   :  { %v2199_v22 = vrot.slane %v2198_v16, 4 }
0x192c   :  { %v2205_v40 = vsel %vm181_vm1, %v2194_v30, 0.0 }
0x192d   :  { %v2200_v36 = vadd.f32 %v2199_v22, %v2198_v16  ;;  %v2190_v38 = vpop.permute.xlu1 %2189 }
0x192e   :  { %v2195_v31 = vmul.f32 %v2190_v38, %v5665_v34 }
0x192f   :  { %v2201_v44 = vrot.slane %v2200_v36, 2 }
0x1930   :  { %v2206_v43 = vsel %vm181_vm1, %v2195_v31, 0.0 }
0x1931   :  { %v2207_v49 = vadd.f32 %v2206_v43, %v2205_v40  ;;  %v2202_v54 = vadd.f32 %v2201_v44, %v2200_v36  ;;  %v2220_v10 = vpop.permute.xlu1 %2219 }
0x1933   :  { %v2208_v50 = vrot.slane %v2207_v49, 4  ;;  %v2203_v5 = vrot.slane %v2202_v54, 1 }
0x1935   :  { %v2209_v2 = vadd.f32 %v2208_v50, %v2207_v49  ;;  %v2204_v8 = vadd.f32 %v2203_v5, %v2202_v54 }
0x1937   :  { %v2210_v0 = vrot.slane %v2209_v2, 2 }
0x1939   :  { %v2211_v61 = vadd.f32 %v2210_v0, %v2209_v2 }
0x193b   :  { %v2212_v58 = vrot.slane %v2211_v61, 1 }
0x193d   :  { %v2213_v9 = vadd.f32 %v2212_v58, %v2211_v61 }
0x193f   :  { %v2216_v45 = vsel %vm491_vm4, %v2213_v9, %v2204_v8 }
0x1940   :  { %v2222_v20 = vsel %vm181_vm1, %v2216_v45, %v2220_v10 }
0x1941   :  { %v2223_v18 = vsel %vm70_vm0, %v2222_v20, %v6091_v11 }
0x1942   :  { %4627 = vmatmul.mubr.msk.f32.vlgmr.msra.gmra.mrb[10].mxu0 %vm640_vm6, %v2223_v18 }
0x1943   :  { %5086 = vmatpush1.bf16.msra.mxu0 %v5783_v47  ;;  %2816 = vmatprep.mubr.f32.mxu0 %v5502_v15 }
0x1944   :  { %5088 = vmatprep.subr.bf16.mxu0 %v5793_v52 }
0x1947   :  { %5090 = vmatpush1.bf16.msra.mxu0 %v5801_v57 }
0x1948   :  { %5092 = vmatprep.subr.bf16.mxu0 %v5814_v63 }
0x194b   :  { %5094 = vmatpush1.bf16.msra.mxu0 %v5825_v3 }
0x194c   :  { %5096 = vmatprep.subr.bf16.mxu0 %v5827_v4 }
0x194f   :  { %5098 = vmatpush1.bf16.msra.mxu0 %v5837_v7 }
0x1950   :  { %5112 = vmatprep.subr.bf16.mxu0 %v5775_v41 }
0x1a15   :  { %v2293_v12 = vpop.f32.mrb[10].mxu0 }
0x1a16   :  { %v2294_v13 = vadd.f32 %v2293_v12, %v5867_v1  ;;  %v2295_v21 = vpop.f32.mrb[11].mxu0 }
0x1a17   :  { %v2296_v16 = vadd.f32 %v2295_v21, %v5871_v6 }
0x1a18   :  { %2299 = vrot.lane.b32.xlu1 %v2294_v13, %s5507_s17 }
0x1a19   :  { %2310 = vrot.lane.b32.xlu0 %v2296_v16, %s5507_s17 }
0x1a1c   :  { %2320 = vrot.lane.b32.xlu1 %v2296_v16, %s5508_s18 }
0x1a8a   :  { %v2300_v28 = vpop.permute.xlu1 %2299 }
0x1a8b   :  { %v2302_v22 = vadd.f32 %v2300_v28, %v2294_v13  ;;  %v2311_v54 = vpop.permute.xlu0 %2310 }
0x1a8c   :  { %v2313_v2 = vadd.f32 %v2311_v54, %v2294_v13 }
0x1a8d   :  { %v4628_v30 = vmul.f32 -1.442695, %v2302_v22 }
0x1a8e   :  { %v2321_v40 = vpop.permute.xlu1 %2320  ;;  %v4629_v0 = vmul.f32 -1.442695, %v2313_v2 }
0x1a8f   :  { %5311 = vpow2.f32 %v4628_v30 }
0x1a99   :  { %v5312_v36 = vpop.eup %5311 }
0x1a9a   :  { %v2306_v38 = vadd.f32 1.0, %v5312_v36 }
0x1a9c   :  { %5313 = vrcp.f32 %v2306_v38 }
0x1aa6   :  { %v5314_v31 = vpop.eup %5313 }
0x1aa7   :  { %v2323_v43 = vmul.f32 %v5314_v31, %v2321_v40 }
0x1aa9   :  { %2325 = vrot.lane.b32.xlu1 %v2323_v43, %s5509_s12 }
0x1b1b   :  { %v2326_v44 = vpop.permute.xlu1 %2325 }
0x1b1c   :  { %v2328_v49 = vadd.f32 %v2326_v44, %v2294_v13 }
0x1b1e   :  { %5315 = vtanh.f32 %v2328_v49 }
0x1b1f   :  { %5317 = vpow2.f32 %v4629_v0 }
0x1b28   :  { %v5316_v50 = vpop.eup %5315 }
0x1b29   :  { %2332 = vrot.lane.b32.xlu1 %v5316_v50, %s5508_s18  ;;  %v5318_v61 = vpop.eup %5317 }
0x1b2a   :  { %v2317_v5 = vadd.f32 1.0, %v5318_v61 }
0x1b2c   :  { %5319 = vrcp.f32 %v2317_v5 }
0x1b36   :  { %v5320_v58 = vpop.eup %5319 }
0x1b37   :  { %v2330_v8 = vsub.f32 1.0, %v5320_v58  ;;  %v2336_v45 = vmul.f32 %v5320_v58, %v6091_v11 }
0x1b9b   :  { %v2333_v9 = vpop.permute.xlu1 %2332 }
0x1b9c   :  { %v2335_v10 = vmul.f32 %v2333_v9, %v2330_v8 }
0x1b9e   :  { %v6197_v20 = vadd.f32 %v2336_v45, %v2335_v10 }
0x1ba0   :  { %2339 = vrot.lane.b32.xlu1 %v6197_v20, %s5508_s18 }
0x1c12   :  { %v2340_v18 = vpop.permute.xlu1 %2339 }
0x1c13   :  { %4863 = vmatmul.mubr.msk.f32.vlgmr.msra.gmra.mrb[18].mxu1 %vm70_vm0, %v2340_v18 }
0x1c14   :  { %5079 = vmatpush3.bf16.msra.mxu1 %v5646_v25  ;;  %4873 = vmatprep.mubr.msk.f32.mxu1 %vm5503_vm2, %v5502_v15 }
0x1c15   :  { %5080 = vmatprep.subr.bf16.mxu1 %v5501_v14 }
0x1c18   :  { %5082 = vmatpush3.bf16.msra.mxu1 %v5663_v33 }
0x1c19   :  { %5099 = vmatprep.subr.bf16.mxu1 %v5501_v14 }
0x1c1b   :  { %4874 = vmatmul.mubr.msk.f32.vlgmr.msra.gmra.mrb[20].mxu1 %vm70_vm0, %v2340_v18 }
0x1c1c   :  { %5101 = vmatpush3.bf16.msra.mxu1 %v5887_v35  ;;  %4884 = vmatprep.mubr.msk.f32.mxu1 %vm5503_vm2, %v5502_v15 }
0x1c1d   :  { %5102 = vmatprep.subr.bf16.mxu1 %v5501_v14 }
0x1c20   :  { %5104 = vmatpush3.bf16.msra.mxu1 %v5893_v37 }
0x1c21   :  { %5105 = vmatprep.subr.bf16.mxu1 %v5501_v14 }
0x1ce6   :  { %v6215_v11 = vpop.f32.mrb[18].mxu1 }
0x1ce7   :  { %v4864_v12 = vpop.f32.mrb[19].mxu1 }
0x1cee   :  { %v2526_v13 = vpop.f32.mrb[20].mxu1 }
0x1cef   :  { %v2527_v21 = vadd.f32 %v6114_v17, %v2526_v13  ;;  %v4875_v16 = vpop.f32.mrb[21].mxu1 }
0x1cf1   :  { %v2537_v28 = vrot.slane %v2527_v21, %v5687_v46 }
0x1cf3   :  { %v2538_v22 = vcombine.high %v2537_v28, %v2537_v28  ;;  %v2545_v30 = vrot.slane %v2537_v28, %v5687_v46 }
0x1cf5   :  { %v2552_v36 = vrot.slane %v2538_v22, %v5687_v46  ;;  %v2556_v38 = vrot.slane %v2545_v30, %v5692_v51 }
0x1cf7   :  { %v2560_v31 = vrot.slane %v2552_v36, %v5692_v51  ;;  %v2563_v40 = vadd.f32 %v2556_v38, %v5700_v56  ;;  %v2564_v43 = vadd.f32 %v2556_v38, %v5698_v55 }
0x1cf9   :  { %v2565_v44 = vadd.f32 %v2560_v31, %v5706_v60  ;;  %v2566_v49 = vadd.f32 %v2560_v31, %v5704_v59  ;;  %5321 = vtanh.f32 %v2563_v40 }
0x1cfa   :  { %5323 = vtanh.f32 %v2564_v43 }
0x1cfb   :  { %5325 = vtanh.f32 %v2565_v44 }
0x1cfc   :  { %5327 = vtanh.f32 %v2566_v49 }
0x1d03   :  { %v5322_v50 = vpop.eup %5321 }
0x1d04   :  { %v5324_v54 = vpop.eup %5323  ;;  %v2571_v2 = vmul.f32 %v6129_v53, %v5322_v50 }
0x1d05   :  { %v5326_v0 = vpop.eup %5325  ;;  %v2572_v61 = vmul.f32 %v6129_v53, %v5324_v54 }
0x1d06   :  { %v2575_v5 = vsel %vm181_vm1, %v2571_v2, 0.0  ;;  %v2573_v58 = vmul.f32 %v6129_v53, %v5326_v0  ;;  %v5328_v8 = vpop.eup %5327 }
0x1d07   :  { %v2578_v9 = vsel %vm181_vm1, %v2572_v61, 0.0  ;;  %2576 = vadd.xlane.f32.xlu1 %v2575_v5  ;;  %v2574_v45 = vmul.f32 %v6129_v53, %v5328_v8 }
0x1d08   :  { %2579 = vadd.xlane.f32.xlu0 %v2578_v9  ;;  %v2581_v10 = vsel %vm181_vm1, %v2573_v58, 0.0 }
0x1d09   :  { %v2584_v18 = vsel %vm181_vm1, %v2574_v45, 0.0 }
0x1d0b   :  { %2582 = vadd.xlane.f32.xlu1 %v2581_v10 }
0x1d0f   :  { %2585 = vadd.xlane.f32.xlu1 %v2584_v18 }
0x1d94   :  { %v2577_v12 = vpop.xlane.xlu1 %2576 }
0x1d95   :  { %v2580_v13 = vpop.xlane.xlu0 %2579  ;;  %v2587_v28 = vadd.f32 %v2577_v12, %v5736_v29 }
0x1d96   :  { %v2588_v16 = vadd.f32 %v2580_v13, %v5736_v29 }
0x1d97   :  { %v2598_v38 = vrot.slane %v2587_v28, %v5731_v24 }
0x1d98   :  { %v2583_v21 = vpop.xlane.xlu1 %2582  ;;  %v2602_v36 = vrot.slane %v2588_v16, %v5734_v27 }
0x1d99   :  { %v2589_v22 = vadd.f32 %v2583_v21, %v5736_v29 }
0x1d9a   :  { %v2603_v44 = vsel %vm480_vm3, %v2602_v36, %v2598_v38 }
0x1d9b   :  { %v2607_v40 = vrot.slane %v2589_v22, %v5731_v24 }
0x1d9c   :  { %v2586_v30 = vpop.xlane.xlu1 %2585 }
0x1d9d   :  { %v2590_v31 = vadd.f32 %v2586_v30, %v5736_v29 }
0x1d9f   :  { %v2611_v43 = vrot.slane %v2590_v31, %v5734_v27 }
0x1da1   :  { %v2612_v49 = vsel %vm480_vm3, %v2611_v43, %v2607_v40 }
0x1da2   :  { %v2613_v50 = vsel %vm491_vm4, %v2612_v49, %v2603_v44 }
0x1da3   :  { %v2615_v54 = vsel %vm494_vm5, %v2613_v50, -inf }
0x1da4   :  { %2616 = vmax.xlane.f32.xlu0 %v2615_v54 }
0x1e31   :  { %v2617_v2 = vpop.xlane.xlu0 %2616 }
0x1e32   :  { %v2622_v0 = vrot.slane %v2617_v2, %v5692_v51  ;;  %v2626_v61 = vrot.slane %v2617_v2, %v5751_v48 }
0x1e34   :  { %v2629_v5 = vsub.f32 %v2587_v28, %v2622_v0  ;;  %v2630_v58 = vsub.f32 %v2588_v16, %v2622_v0  ;;  %v2631_v8 = vsub.f32 %v2589_v22, %v2626_v61  ;;  %v2632_v45 = vsub.f32 %v2590_v31, %v2626_v61 }
0x1e36   :  { %v2633_v9 = vmul.f32 1.442695, %v2629_v5  ;;  %v2635_v10 = vmul.f32 1.442695, %v2630_v58  ;;  %v2637_v18 = vmul.f32 1.442695, %v2631_v8 }
0x1e37   :  { %v2639_v12 = vmul.f32 1.442695, %v2632_v45 }
0x1e38   :  { %5329 = vpow2.f32 %v2633_v9 }
0x1e39   :  { %5331 = vpow2.f32 %v2635_v10 }
0x1e3a   :  { %5333 = vpow2.f32 %v2637_v18 }
0x1e3b   :  { %5335 = vpow2.f32 %v2639_v12  ;;  %v4631_v12 = vld [vmem:[%s6867_s22 + $0x8] sm:$0x3] }
0x1e42   :  { %v5330_v13 = vpop.eup %5329 }
0x1e43   :  { %v5332_v21 = vpop.eup %5331  ;;  %2646 = vperm.xlu1 %5200, %v5330_v13  }
0x1e44   :  { %2649 = vperm.xlu0 %5199, %v5332_v21   ;;  %v5334_v30 = vpop.eup %5333 }
0x1e45   :  { %v5336_v36 = vpop.eup %5335 }
0x1e47   :  { %2652 = vperm.xlu1 %5200, %v5334_v30  }
0x1e4b   :  { %2655 = vperm.xlu1 %5200, %v5336_v36  }
0x1ec2   :  { %v2647_v28 = vpop.permute.xlu1 %2646 }
0x1ec3   :  { %v2650_v16 = vpop.permute.xlu0 %2649  ;;  %v2660_v31 = vrot.slane %v2647_v28, %v5731_v24 }
0x1ec4   :  { %v2664_v38 = vrot.slane %v2650_v16, %v5734_v27 }
0x1ec6   :  { %v2653_v22 = vpop.permute.xlu1 %2652  ;;  %v2665_v49 = vsel %vm480_vm3, %v2664_v38, %v2660_v31 }
0x1ec7   :  { %v2669_v43 = vrot.slane %v2653_v22, %v5731_v24 }
0x1eca   :  { %v2656_v40 = vpop.permute.xlu1 %2655 }
0x1ecb   :  { %v2673_v44 = vrot.slane %v2656_v40, %v5734_v27 }
0x1ecd   :  { %v2674_v50 = vsel %vm480_vm3, %v2673_v44, %v2669_v43 }
0x1ece   :  { %v2675_v54 = vsel %vm491_vm4, %v2674_v50, %v2665_v49 }
0x1ecf   :  { %v2677_v2 = vsel %vm494_vm5, %v2675_v54, 0.0 }
0x1ed0   :  { %2678 = vadd.xlane.f32.xlu1 %v2677_v2 }
0x1f5d   :  { %v2679_v0 = vpop.xlane.xlu1 %2678 }
0x1f5e   :  { %v2684_v61 = vrot.slane %v2679_v0, %v5692_v51  ;;  %v2688_v5 = vrot.slane %v2679_v0, %v5751_v48 }
0x1f60   :  { %5337 = vrcp.f32 %v2684_v61 }
0x1f61   :  { %5339 = vrcp.f32 %v2688_v5 }
0x1f6a   :  { %v5338_v58 = vpop.eup %5337 }
0x1f6b   :  { %v2692_v8 = vmul.f32 %v5338_v58, %v5330_v13  ;;  %v2693_v9 = vmul.f32 %v5338_v58, %v5332_v21  ;;  %v5340_v10 = vpop.eup %5339 }
0x1f6c   :  { %v2695_v45 = vmul.f32 %v5340_v10, %v5334_v30  ;;  %v2696_v18 = vmul.f32 %v5340_v10, %v5336_v36 }
0x1f6d   :  { %2699 = vperm.xlu0 %5199, %v2692_v8  }
0x1f71   :  { %2704 = vperm.xlu0 %5199, %v2693_v9  }
0x1f75   :  { %2709 = vperm.xlu0 %5199, %v2695_v45  }
0x1f79   :  { %2714 = vperm.xlu0 %5199, %v2696_v18  }
0x1f7d   :  { %2744 = vrot.lane.b32.xlu0 %v4631_v12, %s5506_s23 }
0x1fec   :  { %v2700_v28 = vpop.permute.xlu0 %2699 }
0x1fed   :  { %v2717_v16 = vmul.f32 %v2700_v28, %v5644_v23 }
0x1fef   :  { %v2721_v21 = vsel %vm181_vm1, %v2717_v16, 0.0 }
0x1ff0   :  { %v2705_v22 = vpop.permute.xlu0 %2704 }
0x1ff1   :  { %v2718_v13 = vmul.f32 %v2705_v22, %v5648_v26 }
0x1ff3   :  { %v2722_v38 = vsel %vm181_vm1, %v2718_v13, 0.0 }
0x1ff4   :  { %v2723_v30 = vadd.f32 %v2722_v38, %v2721_v21  ;;  %v2710_v31 = vpop.permute.xlu0 %2709 }
0x1ff5   :  { %v2719_v40 = vmul.f32 %v2710_v31, %v5660_v32 }
0x1ff6   :  { %v2724_v36 = vrot.slane %v2723_v30, 4 }
0x1ff7   :  { %v2730_v50 = vsel %vm181_vm1, %v2719_v40, 0.0 }
0x1ff8   :  { %v2725_v43 = vadd.f32 %v2724_v36, %v2723_v30  ;;  %v2715_v44 = vpop.permute.xlu0 %2714 }
0x1ff9   :  { %v2720_v49 = vmul.f32 %v2715_v44, %v5665_v34 }
0x1ffa   :  { %v2726_v2 = vrot.slane %v2725_v43, 2 }
0x1ffb   :  { %v2731_v54 = vsel %vm181_vm1, %v2720_v49, 0.0 }
0x1ffc   :  { %v2732_v0 = vadd.f32 %v2731_v54, %v2730_v50  ;;  %v2727_v5 = vadd.f32 %v2726_v2, %v2725_v43  ;;  %v2745_v28 = vpop.permute.xlu0 %2744 }
0x1ffe   :  { %v2733_v61 = vrot.slane %v2732_v0, 4  ;;  %v2728_v10 = vrot.slane %v2727_v5, 1 }
0x2000   :  { %v2734_v58 = vadd.f32 %v2733_v61, %v2732_v0  ;;  %v2729_v18 = vadd.f32 %v2728_v10, %v2727_v5 }
0x2002   :  { %v2735_v8 = vrot.slane %v2734_v58, 2 }
0x2004   :  { %v2736_v9 = vadd.f32 %v2735_v8, %v2734_v58 }
0x2006   :  { %v2737_v45 = vrot.slane %v2736_v9, 1 }
0x2008   :  { %v2738_v12 = vadd.f32 %v2737_v45, %v2736_v9 }
0x200a   :  { %v2741_v16 = vsel %vm491_vm4, %v2738_v12, %v2729_v18 }
0x200b   :  { %v2747_v22 = vsel %vm181_vm1, %v2741_v16, %v2745_v28 }
0x200c   :  { %v2748_v13 = vsel %vm70_vm0, %v2747_v22, %v6197_v20 }
0x200d   :  { %4634 = vmatmul.mubr.msk.f32.vlgmr.msra.gmra.mrb[12].mxu0 %vm640_vm6, %v2748_v13 }
0x200e   :  { %5114 = vmatpush1.bf16.msra.mxu0 %v5783_v47  ;;  %3341 = vmatprep.mubr.f32.mxu0 %v5502_v15 }
0x200f   :  { %5116 = vmatprep.subr.bf16.mxu0 %v5793_v52 }
0x2012   :  { %5118 = vmatpush1.bf16.msra.mxu0 %v5801_v57 }
0x2013   :  { %5120 = vmatprep.subr.bf16.mxu0 %v5814_v63 }
0x2016   :  { %5122 = vmatpush1.bf16.msra.mxu0 %v5825_v3 }
0x2017   :  { %5124 = vmatprep.subr.bf16.mxu0 %v5827_v4 }
0x201a   :  { %5126 = vmatpush1.bf16.msra.mxu0 %v5837_v7 }
0x201b   :  { %5140 = vmatprep.subr.bf16.mxu0 %v5775_v41 }
0x20e0   :  { %v2818_v21 = vpop.f32.mrb[12].mxu0 }
0x20e1   :  { %v2819_v38 = vadd.f32 %v2818_v21, %v5867_v1  ;;  %v2820_v30 = vpop.f32.mrb[13].mxu0 }
0x20e2   :  { %v2821_v31 = vadd.f32 %v2820_v30, %v5871_v6 }
0x20e3   :  { %2824 = vrot.lane.b32.xlu0 %v2819_v38, %s5507_s17 }
0x20e7   :  { %2845 = vrot.lane.b32.xlu0 %v2821_v31, %s5508_s18 }
0x2155   :  { %v2825_v36 = vpop.permute.xlu0 %2824 }
0x2156   :  { %v2827_v40 = vadd.f32 %v2825_v36, %v2819_v38 }
0x2158   :  { %v4635_v43 = vmul.f32 -1.442695, %v2827_v40 }
0x2159   :  { %v2846_v54 = vpop.permute.xlu0 %2845 }
0x215a   :  { %5341 = vpow2.f32 %v4635_v43 }
0x2164   :  { %v5342_v44 = vpop.eup %5341 }
0x2165   :  { %v2831_v49 = vadd.f32 1.0, %v5342_v44 }
0x2167   :  { %5343 = vrcp.f32 %v2831_v49 }
0x2171   :  { %v5344_v50 = vpop.eup %5343 }
0x2172   :  { %v2848_v2 = vmul.f32 %v5344_v50, %v2846_v54 }
0x2174   :  { %2850 = vrot.lane.b32.xlu0 %v2848_v2, %s5509_s12 }
0x2178   :  { %2835 = vrot.lane.b32.xlu0 %v2821_v31, %s5507_s17 }
0x21e6   :  { %v2851_v0 = vpop.permute.xlu0 %2850 }
0x21e7   :  { %v2853_v61 = vadd.f32 %v2851_v0, %v2819_v38 }
0x21e9   :  { %5345 = vtanh.f32 %v2853_v61 }
0x21ea   :  { %v2836_v58 = vpop.permute.xlu0 %2835 }
0x21eb   :  { %v2838_v8 = vadd.f32 %v2836_v58, %v2819_v38 }
0x21ed   :  { %v4636_v9 = vmul.f32 -1.442695, %v2838_v8 }
0x21ef   :  { %5347 = vpow2.f32 %v4636_v9 }
0x21f3   :  { %v5346_v5 = vpop.eup %5345 }
0x21f4   :  { %2857 = vrot.lane.b32.xlu1 %v5346_v5, %s5508_s18 }
0x21f9   :  { %v5348_v10 = vpop.eup %5347 }
0x21fa   :  { %v2842_v45 = vadd.f32 1.0, %v5348_v10 }
0x21fc   :  { %5349 = vrcp.f32 %v2842_v45 }
0x2206   :  { %v5350_v18 = vpop.eup %5349 }
0x2207   :  { %v2855_v12 = vsub.f32 1.0, %v5350_v18  ;;  %v2861_v22 = vmul.f32 %v5350_v18, %v6197_v20 }
0x2266   :  { %v2858_v28 = vpop.permute.xlu1 %2857 }
0x2267   :  { %v2860_v16 = vmul.f32 %v2858_v28, %v2855_v12 }
0x2269   :  { %v6293_v13 = vadd.f32 %v2861_v22, %v2860_v16 }
0x226b   :  { %2864 = vrot.lane.b32.xlu0 %v6293_v13, %s5508_s18 }
0x22dd   :  { %v2865_v21 = vpop.permute.xlu0 %2864 }
0x22de   :  { %4885 = vmatmul.mubr.msk.f32.vlgmr.msra.gmra.mrb[22].mxu1 %vm70_vm0, %v2865_v21 }
0x22df   :  { %5107 = vmatpush3.bf16.msra.mxu1 %v5646_v25  ;;  %4895 = vmatprep.mubr.msk.f32.mxu1 %vm5503_vm2, %v5502_v15 }
0x22e0   :  { %5108 = vmatprep.subr.bf16.mxu1 %v5501_v14 }
0x22e3   :  { %5110 = vmatpush3.bf16.msra.mxu1 %v5663_v33 }
0x22e4   :  { %5127 = vmatprep.subr.bf16.mxu1 %v5501_v14 }
0x22e6   :  { %4896 = vmatmul.mubr.msk.f32.vlgmr.msra.gmra.mrb[24].mxu1 %vm70_vm0, %v2865_v21 }
0x22e7   :  { %5129 = vmatpush3.bf16.msra.mxu1 %v5887_v35  ;;  %4906 = vmatprep.mubr.msk.f32.mxu1 %vm5503_vm2, %v5502_v15 }
0x22e8   :  { %5130 = vmatprep.subr.bf16.mxu1 %v5501_v14 }
0x22eb   :  { %5132 = vmatpush3.bf16.msra.mxu1 %v5893_v37 }
0x22ec   :  { %5133 = vmatprep.subr.bf16.mxu1 %v5501_v14 }
0x23b1   :  { %v6311_v20 = vpop.f32.mrb[22].mxu1 }
0x23b2   :  { %v4886_v38 = vpop.f32.mrb[23].mxu1 }
0x23b9   :  { %v3051_v30 = vpop.f32.mrb[24].mxu1 }
0x23ba   :  { %v3052_v31 = vadd.f32 %v6114_v17, %v3051_v30  ;;  %v4897_v36 = vpop.f32.mrb[25].mxu1 }
0x23bc   :  { %v3062_v40 = vrot.slane %v3052_v31, %v5687_v46 }
0x23be   :  { %v3063_v43 = vcombine.high %v3062_v40, %v3062_v40  ;;  %v3070_v44 = vrot.slane %v3062_v40, %v5687_v46 }
0x23c0   :  { %v3077_v49 = vrot.slane %v3063_v43, %v5687_v46  ;;  %v3081_v50 = vrot.slane %v3070_v44, %v5692_v51 }
0x23c2   :  { %v3085_v54 = vrot.slane %v3077_v49, %v5692_v51  ;;  %v3088_v2 = vadd.f32 %v3081_v50, %v5700_v56  ;;  %v3089_v0 = vadd.f32 %v3081_v50, %v5698_v55 }
0x23c4   :  { %v3090_v61 = vadd.f32 %v3085_v54, %v5706_v60  ;;  %v3091_v17 = vadd.f32 %v3085_v54, %v5704_v59  ;;  %5351 = vtanh.f32 %v3088_v2 }
0x23c5   :  { %5353 = vtanh.f32 %v3089_v0 }
0x23c6   :  { %5355 = vtanh.f32 %v3090_v61 }
0x23c7   :  { %5357 = vtanh.f32 %v3091_v17 }
0x23ce   :  { %v5352_v5 = vpop.eup %5351 }
0x23cf   :  { %v5354_v58 = vpop.eup %5353  ;;  %v3096_v8 = vmul.f32 %v6129_v53, %v5352_v5 }
0x23d0   :  { %v5356_v9 = vpop.eup %5355  ;;  %v3097_v10 = vmul.f32 %v6129_v53, %v5354_v58 }
0x23d1   :  { %v3100_v45 = vsel %vm181_vm1, %v3096_v8, 0.0  ;;  %v3098_v18 = vmul.f32 %v6129_v53, %v5356_v9  ;;  %v5358_v12 = vpop.eup %5357 }
0x23d2   :  { %v3103_v28 = vsel %vm181_vm1, %v3097_v10, 0.0  ;;  %3101 = vadd.xlane.f32.xlu0 %v3100_v45  ;;  %v3099_v22 = vmul.f32 %v6129_v53, %v5358_v12 }
0x23d3   :  { %3104 = vadd.xlane.f32.xlu1 %v3103_v28  ;;  %v3106_v16 = vsel %vm181_vm1, %v3098_v18, 0.0 }
0x23d4   :  { %v3109_v21 = vsel %vm181_vm1, %v3099_v22, 0.0 }
0x23d6   :  { %3107 = vadd.xlane.f32.xlu0 %v3106_v16 }
0x23da   :  { %3110 = vadd.xlane.f32.xlu0 %v3109_v21 }
0x245f   :  { %v3102_v38 = vpop.xlane.xlu0 %3101 }
0x2460   :  { %v3105_v30 = vpop.xlane.xlu1 %3104  ;;  %v3112_v40 = vadd.f32 %v3102_v38, %v5736_v29 }
0x2461   :  { %v3113_v36 = vadd.f32 %v3105_v30, %v5736_v29 }
0x2462   :  { %v3123_v50 = vrot.slane %v3112_v40, %v5731_v24 }
0x2463   :  { %v3108_v31 = vpop.xlane.xlu0 %3107  ;;  %v3127_v49 = vrot.slane %v3113_v36, %v5734_v27 }
0x2464   :  { %v3114_v43 = vadd.f32 %v3108_v31, %v5736_v29 }
0x2465   :  { %v3128_v0 = vsel %vm480_vm3, %v3127_v49, %v3123_v50 }
0x2466   :  { %v3132_v54 = vrot.slane %v3114_v43, %v5731_v24 }
0x2467   :  { %v3111_v44 = vpop.xlane.xlu0 %3110 }
0x2468   :  { %v3115_v53 = vadd.f32 %v3111_v44, %v5736_v29 }
0x246a   :  { %v3136_v2 = vrot.slane %v3115_v53, %v5734_v27 }
0x246c   :  { %v3137_v61 = vsel %vm480_vm3, %v3136_v2, %v3132_v54 }
0x246d   :  { %v3138_v17 = vsel %vm491_vm4, %v3137_v61, %v3128_v0 }
0x246e   :  { %v3140_v5 = vsel %vm494_vm5, %v3138_v17, -inf }
0x246f   :  { %3141 = vmax.xlane.f32.xlu0 %v3140_v5 }
0x24fc   :  { %v3142_v58 = vpop.xlane.xlu0 %3141 }
0x24fd   :  { %v3147_v8 = vrot.slane %v3142_v58, %v5692_v51  ;;  %v3151_v9 = vrot.slane %v3142_v58, %v5751_v48 }
0x24ff   :  { %v3154_v10 = vsub.f32 %v3112_v40, %v3147_v8  ;;  %v3155_v45 = vsub.f32 %v3113_v36, %v3147_v8  ;;  %v3156_v18 = vsub.f32 %v3114_v43, %v3151_v9  ;;  %v3157_v12 = vsub.f32 %v3115_v53, %v3151_v9 }
0x2501   :  { %v3158_v28 = vmul.f32 1.442695, %v3154_v10  ;;  %v3160_v16 = vmul.f32 1.442695, %v3155_v45  ;;  %v3162_v22 = vmul.f32 1.442695, %v3156_v18 }
0x2502   :  { %v3164_v21 = vmul.f32 1.442695, %v3157_v12 }
0x2503   :  { %5359 = vpow2.f32 %v3158_v28 }
0x2504   :  { %5361 = vpow2.f32 %v3160_v16 }
0x2505   :  { %5363 = vpow2.f32 %v3162_v22  ;;  %v4638_v22 = vld [vmem:[%s6867_s22 + $0xa] sm:$0x3] }
0x2506   :  { %5365 = vpow2.f32 %v3164_v21 }
0x250d   :  { %v5360_v38 = vpop.eup %5359 }
0x250e   :  { %v5362_v30 = vpop.eup %5361  ;;  %3171 = vperm.xlu0 %5199, %v5360_v38  }
0x250f   :  { %3174 = vperm.xlu1 %5200, %v5362_v30   ;;  %v5364_v31 = vpop.eup %5363 }
0x2510   :  { %v5366_v44 = vpop.eup %5365 }
0x2512   :  { %3177 = vperm.xlu0 %5199, %v5364_v31  }
0x2513   :  { %3180 = vperm.xlu1 %5200, %v5366_v44  }
0x258d   :  { %v3172_v40 = vpop.permute.xlu0 %3171 }
0x258e   :  { %v3175_v36 = vpop.permute.xlu1 %3174  ;;  %v3185_v49 = vrot.slane %v3172_v40, %v5731_v24 }
0x258f   :  { %v3189_v43 = vrot.slane %v3175_v36, %v5734_v27 }
0x2591   :  { %v3178_v50 = vpop.permute.xlu0 %3177  ;;  %v3190_v0 = vsel %vm480_vm3, %v3189_v43, %v3185_v49 }
0x2592   :  { %v3181_v53 = vpop.permute.xlu1 %3180  ;;  %v3194_v54 = vrot.slane %v3178_v50, %v5731_v24 }
0x2593   :  { %v3198_v2 = vrot.slane %v3181_v53, %v5734_v27 }
0x2595   :  { %v3199_v61 = vsel %vm480_vm3, %v3198_v2, %v3194_v54 }
0x2596   :  { %v3200_v17 = vsel %vm491_vm4, %v3199_v61, %v3190_v0 }
0x2597   :  { %v3202_v5 = vsel %vm494_vm5, %v3200_v17, 0.0 }
0x2598   :  { %3203 = vadd.xlane.f32.xlu0 %v3202_v5 }
0x2625   :  { %v3204_v58 = vpop.xlane.xlu0 %3203 }
0x2626   :  { %v3209_v8 = vrot.slane %v3204_v58, %v5692_v51  ;;  %v3213_v9 = vrot.slane %v3204_v58, %v5751_v48 }
0x2628   :  { %5367 = vrcp.f32 %v3209_v8 }
0x2629   :  { %5369 = vrcp.f32 %v3213_v9 }
0x2632   :  { %v5368_v10 = vpop.eup %5367 }
0x2633   :  { %v3217_v45 = vmul.f32 %v5368_v10, %v5360_v38  ;;  %v3218_v18 = vmul.f32 %v5368_v10, %v5362_v30  ;;  %v5370_v12 = vpop.eup %5369 }
0x2634   :  { %v3220_v28 = vmul.f32 %v5370_v12, %v5364_v31  ;;  %v3221_v16 = vmul.f32 %v5370_v12, %v5366_v44 }
0x2635   :  { %3224 = vperm.xlu1 %5200, %v3217_v45  }
0x2639   :  { %3229 = vperm.xlu1 %5200, %v3218_v18  }
0x263d   :  { %3234 = vperm.xlu1 %5200, %v3220_v28  }
0x2641   :  { %3239 = vperm.xlu1 %5200, %v3221_v16  }
0x2645   :  { %3269 = vrot.lane.b32.xlu1 %v4638_v22, %s5506_s23 }
0x26b4   :  { %v3225_v21 = vpop.permute.xlu1 %3224 }
0x26b5   :  { %v3242_v40 = vmul.f32 %v3225_v21, %v5644_v23 }
0x26b7   :  { %v3246_v30 = vsel %vm181_vm1, %v3242_v40, 0.0 }
0x26b8   :  { %v3230_v36 = vpop.permute.xlu1 %3229 }
0x26b9   :  { %v3243_v38 = vmul.f32 %v3230_v36, %v5648_v26 }
0x26bb   :  { %v3247_v43 = vsel %vm181_vm1, %v3243_v38, 0.0 }
0x26bc   :  { %v3248_v31 = vadd.f32 %v3247_v43, %v3246_v30  ;;  %v3235_v49 = vpop.permute.xlu1 %3234 }
0x26bd   :  { %v3244_v50 = vmul.f32 %v3235_v49, %v5660_v32 }
0x26be   :  { %v3249_v44 = vrot.slane %v3248_v31, 4 }
0x26bf   :  { %v3255_v0 = vsel %vm181_vm1, %v3244_v50, 0.0 }
0x26c0   :  { %v3250_v53 = vadd.f32 %v3249_v44, %v3248_v31  ;;  %v3240_v54 = vpop.permute.xlu1 %3239 }
0x26c1   :  { %v3245_v2 = vmul.f32 %v3240_v54, %v5665_v34 }
0x26c2   :  { %v3251_v17 = vrot.slane %v3250_v53, 2 }
0x26c3   :  { %v3256_v61 = vsel %vm181_vm1, %v3245_v2, 0.0 }
0x26c4   :  { %v3257_v5 = vadd.f32 %v3256_v61, %v3255_v0  ;;  %v3252_v8 = vadd.f32 %v3251_v17, %v3250_v53  ;;  %v3270_v22 = vpop.permute.xlu1 %3269 }
0x26c6   :  { %v3258_v58 = vrot.slane %v3257_v5, 4  ;;  %v3253_v18 = vrot.slane %v3252_v8, 1 }
0x26c8   :  { %v3259_v9 = vadd.f32 %v3258_v58, %v3257_v5  ;;  %v3254_v28 = vadd.f32 %v3253_v18, %v3252_v8 }
0x26ca   :  { %v3260_v10 = vrot.slane %v3259_v9, 2 }
0x26cc   :  { %v3261_v45 = vadd.f32 %v3260_v10, %v3259_v9 }
0x26ce   :  { %v3262_v12 = vrot.slane %v3261_v45, 1 }
0x26d0   :  { %v3263_v16 = vadd.f32 %v3262_v12, %v3261_v45 }
0x26d2   :  { %v3266_v21 = vsel %vm491_vm4, %v3263_v16, %v3254_v28 }
0x26d3   :  { %v3272_v40 = vsel %vm181_vm1, %v3266_v21, %v3270_v22 }
0x26d4   :  { %v3273_v36 = vsel %vm70_vm0, %v3272_v40, %v6293_v13 }
0x26d5   :  { %4641 = vmatmul.mubr.msk.f32.vlgmr.msra.gmra.mrb[14].mxu0 %vm640_vm6, %v3273_v36 }
0x26d6   :  { %5142 = vmatpush1.bf16.msra.mxu0 %v5783_v47  ;;  %3866 = vmatprep.mubr.f32.mxu0 %v5502_v15 }
0x26d7   :  { %5144 = vmatprep.subr.bf16.mxu0 %v5793_v52 }
0x26da   :  { %5146 = vmatpush1.bf16.msra.mxu0 %v5801_v57 }
0x26db   :  { %5148 = vmatprep.subr.bf16.mxu0 %v5814_v63 }
0x26de   :  { %5150 = vmatpush1.bf16.msra.mxu0 %v5825_v3 }
0x26df   :  { %5152 = vmatprep.subr.bf16.mxu0 %v5827_v4 }
0x26e2   :  { %5154 = vmatpush1.bf16.msra.mxu0 %v5837_v7 }
0x26e3   :  { %5168 = vmatprep.subr.bf16.mxu0 %v5775_v41 }
0x27a8   :  { %v3343_v38 = vpop.f32.mrb[14].mxu0 }
0x27a9   :  { %v3344_v30 = vadd.f32 %v3343_v38, %v5867_v1  ;;  %v3345_v43 = vpop.f32.mrb[15].mxu0 }
0x27aa   :  { %v3346_v31 = vadd.f32 %v3345_v43, %v5871_v6 }
0x27ab   :  { %3349 = vrot.lane.b32.xlu1 %v3344_v30, %s5507_s17 }
0x27ac   :  { %3360 = vrot.lane.b32.xlu0 %v3346_v31, %s5507_s17 }
0x27af   :  { %3370 = vrot.lane.b32.xlu1 %v3346_v31, %s5508_s18 }
0x281d   :  { %v3350_v49 = vpop.permute.xlu1 %3349 }
0x281e   :  { %v3352_v44 = vadd.f32 %v3350_v49, %v3344_v30  ;;  %v3361_v58 = vpop.permute.xlu0 %3360 }
0x281f   :  { %v3363_v8 = vadd.f32 %v3361_v58, %v3344_v30 }
0x2820   :  { %v4642_v50 = vmul.f32 -1.442695, %v3352_v44 }
0x2821   :  { %v3371_v2 = vpop.permute.xlu1 %3370  ;;  %v4643_v9 = vmul.f32 -1.442695, %v3363_v8  ;;  %v6427_v8 = vld [vmem:[%s6857_s9] ss:$0 sm:$0xff] }
0x2822   :  { %5371 = vpow2.f32 %v4642_v50 }
0x282c   :  { %v5372_v53 = vpop.eup %5371 }
0x282d   :  { %v3356_v54 = vadd.f32 1.0, %v5372_v53 }
0x282f   :  { %5373 = vrcp.f32 %v3356_v54 }
0x2839   :  { %v5374_v41 = vpop.eup %5373 }
0x283a   :  { %v3373_v0 = vmul.f32 %v5374_v41, %v3371_v2 }
0x283c   :  { %3375 = vrot.lane.b32.xlu1 %v3373_v0, %s5509_s12 }
0x28ae   :  { %v3376_v61 = vpop.permute.xlu1 %3375 }
0x28af   :  { %v3378_v17 = vadd.f32 %v3376_v61, %v3344_v30  ;;  %v6412_v30 = vld [vmem:[%s6856_s8] ss:$0 sm:$0xff] }
0x28b1   :  { %5375 = vtanh.f32 %v3378_v17 }
0x28b2   :  { %5377 = vpow2.f32 %v4643_v9 }
0x28bb   :  { %v5376_v5 = vpop.eup %5375 }
0x28bc   :  { %3382 = vrot.lane.b32.xlu1 %v5376_v5, %s5508_s18  ;;  %v5378_v10 = vpop.eup %5377 }
0x28bd   :  { %v3367_v45 = vadd.f32 1.0, %v5378_v10 }
0x28bf   :  { %5379 = vrcp.f32 %v3367_v45 }
0x28c9   :  { %v5380_v18 = vpop.eup %5379 }
0x28ca   :  { %v3380_v12 = vsub.f32 1.0, %v5380_v18  ;;  %v3386_v22 = vmul.f32 %v5380_v18, %v6293_v13 }
0x292e   :  { %v3383_v28 = vpop.permute.xlu1 %3382 }
0x292f   :  { %v3385_v16 = vmul.f32 %v3383_v28, %v3380_v12 }
0x2931   :  { %v6389_v21 = vadd.f32 %v3386_v22, %v3385_v16 }
0x2933   :  { %3389 = vrot.lane.b32.xlu1 %v6389_v21, %s5508_s18 }
0x29a5   :  { %v3390_v40 = vpop.permute.xlu1 %3389 }
0x29a6   :  { %4907 = vmatmul.mubr.msk.f32.vlgmr.msra.gmra.mrb[26].mxu1 %vm70_vm0, %v3390_v40 }
0x29a7   :  { %5135 = vmatpush3.bf16.msra.mxu1 %v5646_v25  ;;  %4917 = vmatprep.mubr.msk.f32.mxu1 %vm5503_vm2, %v5502_v15 }
0x29a8   :  { %5136 = vmatprep.subr.bf16.mxu1 %v5501_v14 }
0x29ab   :  { %5138 = vmatpush3.bf16.msra.mxu1 %v5663_v33 }
0x29ac   :  { %5155 = vmatprep.subr.bf16.mxu1 %v5501_v14 }
0x29ae   :  { %4918 = vmatmul.mubr.msk.f32.vlgmr.msra.gmra.mrb[28].mxu1 %vm70_vm0, %v3390_v40 }
0x29af   :  { %5157 = vmatpush3.bf16.msra.mxu1 %v5887_v35  ;;  %4928 = vmatprep.mubr.msk.f32.mxu1 %vm5503_vm2, %v5502_v15 }
0x29b0   :  { %5158 = vmatprep.subr.bf16.mxu1 %v5501_v14 }
0x29b3   :  { %5160 = vmatpush3.bf16.msra.mxu1 %v5893_v37 }
0x29b4   :  { %5161 = vmatprep.subr.bf16.mxu1 %v5501_v14 }
0x2a79   :  { %v6407_v13 = vpop.f32.mrb[26].mxu1 }
0x2a7a   :  { %v4908_v36 = vpop.f32.mrb[27].mxu1 }
0x2a81   :  { %v3576_v38 = vpop.f32.mrb[28].mxu1 }
0x2a82   :  { %v3577_v43 = vadd.f32 %v6412_v30, %v3576_v38  ;;  %v4919_v31 = vpop.f32.mrb[29].mxu1 }
0x2a84   :  { %v3587_v49 = vrot.slane %v3577_v43, %v5687_v46 }
0x2a86   :  { %v3588_v44 = vcombine.high %v3587_v49, %v3587_v49  ;;  %v3595_v50 = vrot.slane %v3587_v49, %v5687_v46 }
0x2a88   :  { %v3602_v53 = vrot.slane %v3588_v44, %v5687_v46  ;;  %v3606_v54 = vrot.slane %v3595_v50, %v5692_v51 }
0x2a8a   :  { %v3610_v41 = vrot.slane %v3602_v53, %v5692_v51  ;;  %v3613_v2 = vadd.f32 %v3606_v54, %v5700_v56  ;;  %v3614_v0 = vadd.f32 %v3606_v54, %v5698_v55 }
0x2a8c   :  { %v3615_v61 = vadd.f32 %v3610_v41, %v5706_v60  ;;  %v3616_v17 = vadd.f32 %v3610_v41, %v5704_v59  ;;  %5381 = vtanh.f32 %v3613_v2 }
0x2a8d   :  { %5383 = vtanh.f32 %v3614_v0 }
0x2a8e   :  { %5385 = vtanh.f32 %v3615_v61 }
0x2a8f   :  { %5387 = vtanh.f32 %v3616_v17 }
0x2a96   :  { %v5382_v5 = vpop.eup %5381 }
0x2a97   :  { %v5384_v58 = vpop.eup %5383  ;;  %v3621_v9 = vmul.f32 %v6427_v8, %v5382_v5 }
0x2a98   :  { %v5386_v10 = vpop.eup %5385  ;;  %v3622_v45 = vmul.f32 %v6427_v8, %v5384_v58 }
0x2a99   :  { %v3625_v18 = vsel %vm181_vm1, %v3621_v9, 0.0  ;;  %v3623_v12 = vmul.f32 %v6427_v8, %v5386_v10  ;;  %v5388_v28 = vpop.eup %5387 }
0x2a9a   :  { %v3628_v16 = vsel %vm181_vm1, %v3622_v45, 0.0  ;;  %3626 = vadd.xlane.f32.xlu1 %v3625_v18  ;;  %v3624_v40 = vmul.f32 %v6427_v8, %v5388_v28 }
0x2a9b   :  { %3629 = vadd.xlane.f32.xlu0 %v3628_v16  ;;  %v3631_v22 = vsel %vm181_vm1, %v3623_v12, 0.0 }
0x2a9c   :  { %v3634_v36 = vsel %vm181_vm1, %v3624_v40, 0.0 }
0x2a9e   :  { %3632 = vadd.xlane.f32.xlu1 %v3631_v22 }
0x2aa2   :  { %3635 = vadd.xlane.f32.xlu1 %v3634_v36 }
0x2b27   :  { %v3627_v38 = vpop.xlane.xlu1 %3626 }
0x2b28   :  { %v3630_v43 = vpop.xlane.xlu0 %3629  ;;  %v3637_v44 = vadd.f32 %v3627_v38, %v5736_v29 }
0x2b29   :  { %v3638_v49 = vadd.f32 %v3630_v43, %v5736_v29 }
0x2b2a   :  { %v3648_v41 = vrot.slane %v3637_v44, %v5731_v24 }
0x2b2b   :  { %v3633_v31 = vpop.xlane.xlu1 %3632  ;;  %v3652_v54 = vrot.slane %v3638_v49, %v5734_v27 }
0x2b2c   :  { %v3639_v50 = vadd.f32 %v3633_v31, %v5736_v29 }
0x2b2d   :  { %v3653_v17 = vsel %vm480_vm3, %v3652_v54, %v3648_v41 }
0x2b2e   :  { %v3657_v0 = vrot.slane %v3639_v50, %v5731_v24 }
0x2b2f   :  { %v3636_v53 = vpop.xlane.xlu1 %3635 }
0x2b30   :  { %v3640_v2 = vadd.f32 %v3636_v53, %v5736_v29 }
0x2b32   :  { %v3661_v61 = vrot.slane %v3640_v2, %v5734_v27 }
0x2b34   :  { %v3662_v5 = vsel %vm480_vm3, %v3661_v61, %v3657_v0 }
0x2b35   :  { %v3663_v58 = vsel %vm491_vm4, %v3662_v5, %v3653_v17 }
0x2b36   :  { %v3665_v9 = vsel %vm494_vm5, %v3663_v58, -inf }
0x2b37   :  { %3666 = vmax.xlane.f32.xlu0 %v3665_v9 }
0x2bc4   :  { %v3667_v10 = vpop.xlane.xlu0 %3666 }
0x2bc5   :  { %v3672_v45 = vrot.slane %v3667_v10, %v5692_v51  ;;  %v3676_v18 = vrot.slane %v3667_v10, %v5751_v48 }
0x2bc7   :  { %v3679_v12 = vsub.f32 %v3637_v44, %v3672_v45  ;;  %v3680_v28 = vsub.f32 %v3638_v49, %v3672_v45  ;;  %v3681_v16 = vsub.f32 %v3639_v50, %v3676_v18  ;;  %v3682_v36 = vsub.f32 %v3640_v2, %v3676_v18 }
0x2bc9   :  { %v3683_v22 = vmul.f32 1.442695, %v3679_v12  ;;  %v3685_v40 = vmul.f32 1.442695, %v3680_v28  ;;  %v3687_v38 = vmul.f32 1.442695, %v3681_v16 }
0x2bca   :  { %v3689_v43 = vmul.f32 1.442695, %v3682_v36 }
0x2bcb   :  { %5389 = vpow2.f32 %v3683_v22 }
0x2bcc   :  { %5391 = vpow2.f32 %v3685_v40 }
0x2bcd   :  { %5393 = vpow2.f32 %v3687_v38 }
0x2bce   :  { %5395 = vpow2.f32 %v3689_v43 }
0x2bd5   :  { %v5390_v31 = vpop.eup %5389 }
0x2bd6   :  { %v5392_v53 = vpop.eup %5391  ;;  %3696 = vperm.xlu1 %5200, %v5390_v31  }
0x2bd7   :  { %3699 = vperm.xlu0 %5199, %v5392_v53   ;;  %v5394_v54 = vpop.eup %5393 }
0x2bd8   :  { %v5396_v41 = vpop.eup %5395 }
0x2bda   :  { %3702 = vperm.xlu1 %5200, %v5394_v54  }
0x2bde   :  { %3705 = vperm.xlu1 %5200, %v5396_v41  }
0x2c55   :  { %v3697_v44 = vpop.permute.xlu1 %3696 }
0x2c56   :  { %v3700_v49 = vpop.permute.xlu0 %3699  ;;  %v3710_v2 = vrot.slane %v3697_v44, %v5731_v24  ;;  %v4645_v44 = vld [vmem:[%s6867_s22 + $0xc] sm:$0x3] }
0x2c57   :  { %v3714_v0 = vrot.slane %v3700_v49, %v5734_v27 }
0x2c59   :  { %v3703_v50 = vpop.permute.xlu1 %3702  ;;  %v3715_v58 = vsel %vm480_vm3, %v3714_v0, %v3710_v2 }
0x2c5a   :  { %v3719_v17 = vrot.slane %v3703_v50, %v5731_v24 }
0x2c5d   :  { %v3706_v61 = vpop.permute.xlu1 %3705 }
0x2c5e   :  { %v3723_v5 = vrot.slane %v3706_v61, %v5734_v27 }
0x2c60   :  { %v3724_v9 = vsel %vm480_vm3, %v3723_v5, %v3719_v17 }
0x2c61   :  { %v3725_v10 = vsel %vm491_vm4, %v3724_v9, %v3715_v58 }
0x2c62   :  { %v3727_v45 = vsel %vm494_vm5, %v3725_v10, 0.0 }
0x2c63   :  { %3728 = vadd.xlane.f32.xlu1 %v3727_v45 }
0x2cf0   :  { %v3729_v18 = vpop.xlane.xlu1 %3728 }
0x2cf1   :  { %v3734_v12 = vrot.slane %v3729_v18, %v5692_v51  ;;  %v3738_v28 = vrot.slane %v3729_v18, %v5751_v48 }
0x2cf3   :  { %5397 = vrcp.f32 %v3734_v12 }
0x2cf4   :  { %5399 = vrcp.f32 %v3738_v28 }
0x2cfd   :  { %v5398_v16 = vpop.eup %5397 }
0x2cfe   :  { %v3742_v22 = vmul.f32 %v5398_v16, %v5390_v31  ;;  %v3743_v40 = vmul.f32 %v5398_v16, %v5392_v53  ;;  %v5400_v36 = vpop.eup %5399 }
0x2cff   :  { %v3745_v38 = vmul.f32 %v5400_v36, %v5394_v54  ;;  %v3746_v43 = vmul.f32 %v5400_v36, %v5396_v41 }
0x2d00   :  { %3749 = vperm.xlu0 %5199, %v3742_v22  }
0x2d04   :  { %3754 = vperm.xlu0 %5199, %v3743_v40  }
0x2d08   :  { %3759 = vperm.xlu0 %5199, %v3745_v38  }
0x2d0c   :  { %3764 = vperm.xlu0 %5199, %v3746_v43  }
0x2d10   :  { %3794 = vrot.lane.b32.xlu0 %v4645_v44, %s5506_s23 }
0x2d7f   :  { %v3750_v49 = vpop.permute.xlu0 %3749 }
0x2d80   :  { %v3767_v50 = vmul.f32 %v3750_v49, %v5644_v23 }
0x2d82   :  { %v3771_v53 = vsel %vm181_vm1, %v3767_v50, 0.0 }
0x2d83   :  { %v3755_v0 = vpop.permute.xlu0 %3754 }
0x2d84   :  { %v3768_v31 = vmul.f32 %v3755_v0, %v5648_v26 }
0x2d86   :  { %v3772_v2 = vsel %vm181_vm1, %v3768_v31, 0.0 }
0x2d87   :  { %v3773_v54 = vadd.f32 %v3772_v2, %v3771_v53  ;;  %v3760_v61 = vpop.permute.xlu0 %3759 }
0x2d88   :  { %v3769_v17 = vmul.f32 %v3760_v61, %v5660_v32 }
0x2d89   :  { %v3774_v41 = vrot.slane %v3773_v54, 4 }
0x2d8a   :  { %v3780_v10 = vsel %vm181_vm1, %v3769_v17, 0.0 }
0x2d8b   :  { %v3775_v5 = vadd.f32 %v3774_v41, %v3773_v54  ;;  %v3765_v58 = vpop.permute.xlu0 %3764 }
0x2d8c   :  { %v3770_v9 = vmul.f32 %v3765_v58, %v5665_v34 }
0x2d8d   :  { %v3776_v18 = vrot.slane %v3775_v5, 2 }
0x2d8e   :  { %v3781_v45 = vsel %vm181_vm1, %v3770_v9, 0.0 }
0x2d8f   :  { %v3782_v12 = vadd.f32 %v3781_v45, %v3780_v10  ;;  %v3777_v16 = vadd.f32 %v3776_v18, %v3775_v5  ;;  %v3795_v50 = vpop.permute.xlu0 %3794 }
0x2d91   :  { %v3783_v28 = vrot.slane %v3782_v12, 4  ;;  %v3778_v36 = vrot.slane %v3777_v16, 1 }
0x2d93   :  { %v3784_v22 = vadd.f32 %v3783_v28, %v3782_v12  ;;  %v3779_v44 = vadd.f32 %v3778_v36, %v3777_v16 }
0x2d95   :  { %v3785_v40 = vrot.slane %v3784_v22, 2 }
0x2d97   :  { %v3786_v38 = vadd.f32 %v3785_v40, %v3784_v22 }
0x2d99   :  { %v3787_v43 = vrot.slane %v3786_v38, 1 }
0x2d9b   :  { %v3788_v49 = vadd.f32 %v3787_v43, %v3786_v38 }
0x2d9d   :  { %v3791_v0 = vsel %vm491_vm4, %v3788_v49, %v3779_v44 }
0x2d9e   :  { %v3797_v31 = vsel %vm181_vm1, %v3791_v0, %v3795_v50 }
0x2d9f   :  { %v3798_v53 = vsel %vm70_vm0, %v3797_v31, %v6389_v21 }
0x2da0   :  { %4648 = vmatmul.mubr.msk.f32.vlgmr.msra.gmra.mrb[16].mxu0 %vm640_vm6, %v3798_v53 }
0x2da1   :  { %5170 = vmatpush1.bf16.msra.mxu0 %v5783_v47  ;;  %4391 = vmatprep.mubr.f32.mxu0 %v5502_v15 }
0x2da2   :  { %5172 = vmatprep.subr.bf16.mxu0 %v5793_v52 }
0x2da5   :  { %5174 = vmatpush1.bf16.msra.mxu0 %v5801_v57 }
0x2da6   :  { %5176 = vmatprep.subr.bf16.mxu0 %v5814_v63 }
0x2da9   :  { %5178 = vmatpush1.bf16.msra.mxu0 %v5825_v3 }
0x2daa   :  { %5180 = vmatprep.subr.bf16.mxu0 %v5827_v4 }
0x2dad   :  { %5182 = vmatpush1.bf16.msra.mxu0 %v5837_v7 }
0x2e73   :  { %v3868_v2 = vpop.f32.mrb[16].mxu0 }
0x2e74   :  { %v3869_v54 = vadd.f32 %v3868_v2, %v5867_v1  ;;  %v3870_v61 = vpop.f32.mrb[17].mxu0 }
0x2e75   :  { %v3871_v47 = vadd.f32 %v3870_v61, %v5871_v6 }
0x2e76   :  { %3874 = vrot.lane.b32.xlu0 %v3869_v54, %s5507_s17 }
0x2e7a   :  { %3895 = vrot.lane.b32.xlu0 %v3871_v47, %s5508_s18 }
0x2ee8   :  { %v3875_v52 = vpop.permute.xlu0 %3874 }
0x2ee9   :  { %v3877_v57 = vadd.f32 %v3875_v52, %v3869_v54 }
0x2eeb   :  { %v4649_v41 = vmul.f32 -1.442695, %v3877_v57 }
0x2eec   :  { %v3896_v17 = vpop.permute.xlu0 %3895 }
0x2eed   :  { %5401 = vpow2.f32 %v4649_v41 }
0x2ef7   :  { %v5402_v63 = vpop.eup %5401 }
0x2ef8   :  { %v3881_v3 = vadd.f32 1.0, %v5402_v63 }
0x2efa   :  { %5403 = vrcp.f32 %v3881_v3 }
0x2f04   :  { %v5404_v4 = vpop.eup %5403 }
0x2f05   :  { %v3898_v7 = vmul.f32 %v5404_v4, %v3896_v17 }
0x2f07   :  { %3900 = vrot.lane.b32.xlu0 %v3898_v7, %s5509_s12 }
0x2f0b   :  { %3885 = vrot.lane.b32.xlu0 %v3871_v47, %s5507_s17 }
0x2f79   :  { %v3901_v5 = vpop.permute.xlu0 %3900 }
0x2f7a   :  { %v3903_v58 = vadd.f32 %v3901_v5, %v3869_v54 }
0x2f7c   :  { %5405 = vtanh.f32 %v3903_v58 }
0x2f7d   :  { %v3886_v10 = vpop.permute.xlu0 %3885 }
0x2f7e   :  { %v3888_v45 = vadd.f32 %v3886_v10, %v3869_v54 }
0x2f80   :  { %v4650_v18 = vmul.f32 -1.442695, %v3888_v45 }
0x2f82   :  { %5407 = vpow2.f32 %v4650_v18 }
0x2f86   :  { %v5406_v9 = vpop.eup %5405 }
0x2f87   :  { %3907 = vrot.lane.b32.xlu1 %v5406_v9, %s5508_s18 }
0x2f8c   :  { %v5408_v12 = vpop.eup %5407 }
0x2f8d   :  { %v3892_v28 = vadd.f32 1.0, %v5408_v12 }
0x2f8f   :  { %5409 = vrcp.f32 %v3892_v28 }
0x2f99   :  { %v5410_v16 = vpop.eup %5409 }
0x2f9a   :  { %v3905_v22 = vsub.f32 1.0, %v5410_v16  ;;  %v3911_v38 = vmul.f32 %v5410_v16, %v6389_v21 }
0x2ff9   :  { %v3908_v40 = vpop.permute.xlu1 %3907 }
0x2ffa   :  { %v3910_v36 = vmul.f32 %v3908_v40, %v3905_v22 }
0x2ffc   :  { %v6494_v43 = vadd.f32 %v3911_v38, %v3910_v36 }
0x2ffe   :  { %3914 = vrot.lane.b32.xlu0 %v6494_v43, %s5508_s18 }
0x3070   :  { %v3915_v44 = vpop.permute.xlu0 %3914 }
0x3071   :  { %4929 = vmatmul.mubr.msk.f32.vlgmr.msra.gmra.mrb[30].mxu1 %vm70_vm0, %v3915_v44 }
0x3072   :  { %5163 = vmatpush3.bf16.msra.mxu1 %v5646_v25  ;;  %4939 = vmatprep.mubr.msk.f32.mxu1 %vm5503_vm2, %v5502_v15 }
0x3073   :  { %5164 = vmatprep.subr.bf16.mxu1 %v5501_v14 }
0x3076   :  { %5166 = vmatpush3.bf16.msra.mxu1 %v5663_v33 }
0x3077   :  { %5183 = vmatprep.subr.bf16.mxu1 %v5501_v14 }
0x3079   :  { %4940 = vmatmul.mubr.msk.f32.vlgmr.msra.gmra.mrb[32].mxu1 %vm70_vm0, %v3915_v44 }
0x307a   :  { %5185 = vmatpush3.bf16.msra.mxu1 %v5887_v35  ;;  %4950 = vmatprep.mubr.msk.f32.mxu1 %vm5503_vm2, %v5502_v15 }
0x307b   :  { %5186 = vmatprep.subr.bf16.mxu1 %v5501_v14 }
0x307e   :  { %5188 = vmatpush3.bf16.msra.mxu1 %v5893_v37 }
0x3144   :  { %v6511_v25 = vpop.f32.mrb[30].mxu1 }
0x3145   :  { %v4930_v21 = vpop.f32.mrb[31].mxu1 }
0x314c   :  { %v4101_v49 = vpop.f32.mrb[32].mxu1 }
0x314d   :  { %v4102_v50 = vadd.f32 %v6412_v30, %v4101_v49  ;;  %v4941_v33 = vpop.f32.mrb[33].mxu1 }
0x314f   :  { %v4112_v0 = vrot.slane %v4102_v50, %v5687_v46 }
0x3151   :  { %v4113_v31 = vcombine.high %v4112_v0, %v4112_v0  ;;  %v4120_v53 = vrot.slane %v4112_v0, %v5687_v46 }
0x3153   :  { %v4127_v35 = vrot.slane %v4113_v31, %v5687_v46  ;;  %v4131_v15 = vrot.slane %v4120_v53, %v5692_v51 }
0x3155   :  { %v4135_v14 = vrot.slane %v4127_v35, %v5692_v51  ;;  %v4138_v37 = vadd.f32 %v4131_v15, %v5700_v56  ;;  %v4139_v2 = vadd.f32 %v4131_v15, %v5698_v55 }
0x3157   :  { %v4140_v54 = vadd.f32 %v4135_v14, %v5706_v60  ;;  %v4141_v30 = vadd.f32 %v4135_v14, %v5704_v59  ;;  %5411 = vtanh.f32 %v4138_v37 }
0x3158   :  { %5413 = vtanh.f32 %v4139_v2 }
0x3159   :  { %5415 = vtanh.f32 %v4140_v54 }
0x315a   :  { %5417 = vtanh.f32 %v4141_v30 }
0x3161   :  { %v5412_v61 = vpop.eup %5411 }
0x3162   :  { %v5414_v47 = vpop.eup %5413  ;;  %v4146_v46 = vmul.f32 %v6427_v8, %v5412_v61 }
0x3163   :  { %v5416_v52 = vpop.eup %5415  ;;  %v4147_v57 = vmul.f32 %v6427_v8, %v5414_v47 }
0x3164   :  { %v4150_v41 = vsel %vm181_vm1, %v4146_v46, 0.0  ;;  %v4148_v56 = vmul.f32 %v6427_v8, %v5416_v52  ;;  %v5418_v55 = vpop.eup %5417 }
0x3165   :  { %v4153_v60 = vsel %vm181_vm1, %v4147_v57, 0.0  ;;  %4151 = vadd.xlane.f32.xlu0 %v4150_v41  ;;  %v4149_v63 = vmul.f32 %v6427_v8, %v5418_v55 }
0x3166   :  { %4154 = vadd.xlane.f32.xlu1 %v4153_v60  ;;  %v4156_v59 = vsel %vm181_vm1, %v4148_v56, 0.0 }
0x3167   :  { %v4159_v3 = vsel %vm181_vm1, %v4149_v63, 0.0 }
0x3169   :  { %4157 = vadd.xlane.f32.xlu0 %v4156_v59 }
0x316d   :  { %4160 = vadd.xlane.f32.xlu0 %v4159_v3 }
0x31f2   :  { %v4152_v4 = vpop.xlane.xlu0 %4151 }
0x31f3   :  { %v4155_v17 = vpop.xlane.xlu1 %4154  ;;  %v4162_v58 = vadd.f32 %v4152_v4, %v5736_v29 }
0x31f4   :  { %v4163_v5 = vadd.f32 %v4155_v17, %v5736_v29 }
0x31f5   :  { %v4173_v18 = vrot.slane %v4162_v58, %v5731_v24 }
0x31f6   :  { %v4158_v7 = vpop.xlane.xlu0 %4157  ;;  %v4177_v45 = vrot.slane %v4163_v5, %v5734_v27 }
0x31f7   :  { %v4164_v9 = vadd.f32 %v4158_v7, %v5736_v29 }
0x31f8   :  { %v4178_v16 = vsel %vm480_vm3, %v4177_v45, %v4173_v18 }
0x31f9   :  { %v4182_v12 = vrot.slane %v4164_v9, %v5731_v24 }
0x31fa   :  { %v4161_v10 = vpop.xlane.xlu0 %4160 }
0x31fb   :  { %v4165_v8 = vadd.f32 %v4161_v10, %v5736_v29 }
0x31fd   :  { %v4186_v28 = vrot.slane %v4165_v8, %v5734_v27 }
0x31ff   :  { %v4187_v22 = vsel %vm480_vm3, %v4186_v28, %v4182_v12 }
0x3200   :  { %v4188_v40 = vsel %vm491_vm4, %v4187_v22, %v4178_v16 }
0x3201   :  { %v4190_v36 = vsel %vm494_vm5, %v4188_v40, -inf }
0x3202   :  { %4191 = vmax.xlane.f32.xlu0 %v4190_v36 }
0x328f   :  { %v4192_v38 = vpop.xlane.xlu0 %4191 }
0x3290   :  { %v4197_v44 = vrot.slane %v4192_v38, %v5692_v51  ;;  %v4201_v21 = vrot.slane %v4192_v38, %v5751_v48 }
0x3292   :  { %v4204_v49 = vsub.f32 %v4162_v58, %v4197_v44  ;;  %v4205_v29 = vsub.f32 %v4163_v5, %v4197_v44  ;;  %v4206_v50 = vsub.f32 %v4164_v9, %v4201_v21  ;;  %v4207_v33 = vsub.f32 %v4165_v8, %v4201_v21  ;;  %v4652_v9 = vld [vmem:[%s6867_s22 + $0xe] sm:$0x3] }
0x3294   :  { %v4208_v0 = vmul.f32 1.442695, %v4204_v49  ;;  %v4210_v31 = vmul.f32 1.442695, %v4205_v29  ;;  %v4212_v53 = vmul.f32 1.442695, %v4206_v50 }
0x3295   :  { %v4214_v35 = vmul.f32 1.442695, %v4207_v33 }
0x3296   :  { %5419 = vpow2.f32 %v4208_v0 }
0x3297   :  { %5421 = vpow2.f32 %v4210_v31 }
0x3298   :  { %5423 = vpow2.f32 %v4212_v53 }
0x3299   :  { %5425 = vpow2.f32 %v4214_v35 }
0x32a0   :  { %v5420_v15 = vpop.eup %5419 }
0x32a1   :  { %v5422_v14 = vpop.eup %5421  ;;  %4221 = vperm.xlu0 %5199, %v5420_v15  }
0x32a2   :  { %4224 = vperm.xlu1 %5200, %v5422_v14   ;;  %v5424_v37 = vpop.eup %5423 }
0x32a3   :  { %v5426_v2 = vpop.eup %5425 }
0x32a5   :  { %4227 = vperm.xlu0 %5199, %v5424_v37  }
0x32a6   :  { %4230 = vperm.xlu1 %5200, %v5426_v2  }
0x3320   :  { %v4222_v54 = vpop.permute.xlu0 %4221 }
0x3321   :  { %v4225_v30 = vpop.permute.xlu1 %4224  ;;  %v4235_v47 = vrot.slane %v4222_v54, %v5731_v24 }
0x3322   :  { %v4239_v61 = vrot.slane %v4225_v30, %v5734_v27 }
0x3324   :  { %v4228_v46 = vpop.permute.xlu0 %4227  ;;  %v4240_v56 = vsel %vm480_vm3, %v4239_v61, %v4235_v47  ;;  %v6580_v47 = vld [vmem:[%s6862_s14] ss:$0 sm:$0xff] }
0x3325   :  { %v4231_v52 = vpop.permute.xlu1 %4230  ;;  %v4244_v57 = vrot.slane %v4228_v46, %v5731_v24  ;;  %v6584_v46 = vadd.f32 %v6580_v47, %v6013_v62 }
0x3326   :  { %v4248_v41 = vrot.slane %v4231_v52, %v5734_v27  ;;  %v6594_v52 = vadd.f32 %v6580_v47, %v6511_v25 }
0x3328   :  { %v4249_v55 = vsel %vm480_vm3, %v4248_v41, %v4244_v57  ;;  %v3988_v62 = vsel %vm836_vm7, %v6594_v52, -inf }
0x3329   :  { %v4250_v60 = vsel %vm491_vm4, %v4249_v55, %v4240_v56 }
0x332a   :  { %v4252_v59 = vsel %vm494_vm5, %v4250_v60, 0.0 }
0x332b   :  { %4253 = vadd.xlane.f32.xlu0 %v4252_v59 }
0x33b8   :  { %v4254_v63 = vpop.xlane.xlu0 %4253 }
0x33b9   :  { %v4259_v3 = vrot.slane %v4254_v63, %v5692_v51  ;;  %v4263_v4 = vrot.slane %v4254_v63, %v5751_v48 }
0x33bb   :  { %5427 = vrcp.f32 %v4259_v3 }
0x33bc   :  { %5429 = vrcp.f32 %v4263_v4 }
0x33c5   :  { %v5428_v17 = vpop.eup %5427 }
0x33c6   :  { %v4267_v24 = vmul.f32 %v5428_v17, %v5420_v15  ;;  %v4268_v27 = vmul.f32 %v5428_v17, %v5422_v14  ;;  %v5430_v7 = vpop.eup %5429 }
0x33c7   :  { %v4270_v5 = vmul.f32 %v5430_v7, %v5424_v37  ;;  %v4271_v58 = vmul.f32 %v5430_v7, %v5426_v2 }
0x33c8   :  { %4274 = vperm.xlu1 %5200, %v4267_v24  }
0x33cc   :  { %4279 = vperm.xlu1 %5200, %v4268_v27  }
0x33d0   :  { %4284 = vperm.xlu1 %5200, %v4270_v5  }
0x33d4   :  { %4289 = vperm.xlu1 %5200, %v4271_v58  }
0x33d8   :  { %4319 = vrot.lane.b32.xlu1 %v4652_v9, %s5506_s23 }
0x3447   :  { %v4275_v51 = vpop.permute.xlu1 %4274 }
0x3448   :  { %v4292_v48 = vmul.f32 %v4275_v51, %v5644_v23 }
0x344a   :  { %v4296_v18 = vsel %vm181_vm1, %v4292_v48, 0.0 }
0x344b   :  { %v4280_v10 = vpop.permute.xlu1 %4279 }
0x344c   :  { %v4293_v45 = vmul.f32 %v4280_v10, %v5648_v26 }
0x344e   :  { %v4297_v8 = vsel %vm181_vm1, %v4293_v45, 0.0 }
0x344f   :  { %v4298_v12 = vadd.f32 %v4297_v8, %v4296_v18  ;;  %v4285_v28 = vpop.permute.xlu1 %4284  ;;  %v6606_v8 = vadd.f32 %v6580_v47, %v5917_v42  ;;  %v6622_v42 = vadd.f32 %v6580_v47, %v6407_v13 }
0x3450   :  { %v4294_v22 = vmul.f32 %v4285_v28, %v5660_v32 }
0x3451   :  { %v4299_v16 = vrot.slane %v4298_v12, 4  ;;  %v837_v28 = vsel %vm836_vm7, %v6606_v8, -inf }
0x3452   :  { %v4305_v44 = vsel %vm181_vm1, %v4294_v22, 0.0  ;;  %v3463_v22 = vsel %vm836_vm7, %v6622_v42, -inf }
0x3453   :  { %v4300_v40 = vadd.f32 %v4299_v16, %v4298_v12  ;;  %v4290_v36 = vpop.permute.xlu1 %4289  ;;  %v6610_v12 = vadd.f32 %v6580_v47, %v6109_v39  ;;  %v6616_v16 = vadd.f32 %v6580_v47, %v6215_v11 }
0x3454   :  { %v4295_v38 = vmul.f32 %v4290_v36, %v5665_v34 }
0x3455   :  { %v4301_v21 = vrot.slane %v4300_v40, 2  ;;  %v2413_v39 = vsel %vm836_vm7, %v6616_v16, -inf }
0x3456   :  { %v4306_v23 = vsel %vm181_vm1, %v4295_v38, 0.0 }
0x3457   :  { %v4307_v49 = vadd.f32 %v4306_v23, %v4305_v44  ;;  %v4302_v29 = vadd.f32 %v4301_v21, %v4300_v40  ;;  %v4320_v32 = vpop.permute.xlu1 %4319 }
0x3459   :  { %v4308_v26 = vrot.slane %v4307_v49, 4  ;;  %v4303_v0 = vrot.slane %v4302_v29, 1 }
0x345b   :  { %v4309_v50 = vadd.f32 %v4308_v26, %v4307_v49  ;;  %v4304_v35 = vadd.f32 %v4303_v0, %v4302_v29 }
0x345d   :  { %v4310_v33 = vrot.slane %v4309_v50, 2 }
0x345f   :  { %v4311_v31 = vadd.f32 %v4310_v33, %v4309_v50 }
0x3461   :  { %v4312_v53 = vrot.slane %v4311_v31, 1 }
0x3463   :  { %v4313_v15 = vadd.f32 %v4312_v53, %v4311_v31 }
0x3465   :  { %v4316_v14 = vsel %vm491_vm4, %v4313_v15, %v4304_v35 }
0x3466   :  { %v4322_v34 = vsel %vm181_vm1, %v4316_v14, %v4320_v32 }
0x3467   :  { %v4323_v37 = vsel %vm70_vm0, %v4322_v34, %v6494_v43 }
0x3468   :  { %4655 = vmatmul.mubr.msk.f32.vlgmr.msra.gmra.mrb[18].mxu0 %vm640_vm6, %v4323_v37 }
0x353b   :  { %v4393_v2 = vpop.f32.mrb[18].mxu0 }
0x353c   :  { %v4394_v54 = vadd.f32 %v4393_v2, %v5867_v1  ;;  %v4395_v30 = vpop.f32.mrb[19].mxu0  ;;  %v6588_v1 = vadd.f32 %v6580_v47, %v6311_v20 }
0x353d   :  { %v4396_v61 = vadd.f32 %v4395_v30, %v5871_v6  ;;  %v1363_v6 = vsel %vm836_vm7, %v6584_v46, -inf }
0x353e   :  { %4399 = vrot.lane.b32.xlu1 %v4394_v54, %s5507_s17  ;;  %v2938_v57 = vsel %vm836_vm7, %v6588_v1, -inf }
0x353f   :  { %4410 = vrot.lane.b32.xlu0 %v4396_v61, %s5507_s17 }
0x3542   :  { %4420 = vrot.lane.b32.xlu1 %v4396_v61, %s5508_s18 }
0x355e   :  { %1364 = vmax.xlane.f32.xlu0 %v1363_v6 }
0x3562   :  { %2939 = vmax.xlane.f32.xlu0 %v2938_v57 }
0x3566   :  { %3989 = vmax.xlane.f32.xlu0 %v3988_v62 }
0x35b0   :  { %v4400_v41 = vpop.permute.xlu1 %4399 }
0x35b1   :  { %v4402_v56 = vadd.f32 %v4400_v41, %v4394_v54  ;;  %v4411_v24 = vpop.permute.xlu0 %4410 }
0x35b2   :  { %v4413_v27 = vadd.f32 %v4411_v24, %v4394_v54 }
0x35b3   :  { %v4656_v20 = vmul.f32 -1.442695, %v4402_v56 }
0x35b4   :  { %v4421_v63 = vpop.permute.xlu1 %4420  ;;  %v4657_v7 = vmul.f32 -1.442695, %v4413_v27 }
0x35b5   :  { %5431 = vpow2.f32 %v4656_v20 }
0x35bf   :  { %v5432_v55 = vpop.eup %5431 }
0x35c0   :  { %v4406_v60 = vadd.f32 1.0, %v5432_v55 }
0x35c2   :  { %5433 = vrcp.f32 %v4406_v60 }
0x35cc   :  { %v5434_v59 = vpop.eup %5433 }
0x35cd   :  { %v4423_v3 = vmul.f32 %v5434_v59, %v4421_v63 }
0x35cf   :  { %4425 = vrot.lane.b32.xlu1 %v4423_v3, %s5509_s12 }
0x35eb   :  { %v6629_v11 = vpop.xlane.xlu0 %1364 }
0x35ef   :  { %v6631_v36 = vpop.xlane.xlu0 %2939 }
0x35f0   :  { %v2958_v44 = vsub.f32 %v6588_v1, %v6631_v36  ;;  %vm2941_vm10 = vcmp.eq.f32.partialorder %v6588_v1, %v6631_v36 }
0x35f1   :  { %v2942_v57 = vsel %vm2941_vm10, %v5726_v19, 32  ;;  %vm4558_vm10 = vcmask 15360  }
0x35f2   :  { %v2959_v29 = vmul.f32 1.442695, %v2958_v44  ;;  %v6673_v56 = vsel %vm836_vm7, %v2942_v57, 2147483647 }
0x35f3   :  { %v6639_v21 = vpop.xlane.xlu0 %3989  ;;  %v2945_v60 = vshra.s32 %v6673_v56, 16 }
0x35f4   :  { %v4008_v50 = vsub.f32 %v6594_v52, %v6639_v21  ;;  %vm3991_vm11 = vcmp.eq.f32.partialorder %v6594_v52, %v6639_v21 }
0x35f5   :  { %v3992_v20 = vsel %vm3991_vm11, %v5726_v19, 32  ;;  %v6684_v63 = vcvt.s32.f32 %v2945_v60  ;;  %vm4560_vm11 = vcmask 23552  }
0x35f6   :  { %v4009_v0 = vmul.f32 1.442695, %v4008_v50  ;;  %v6681_v59 = vsel %vm836_vm7, %v3992_v20, 2147483647 }
0x35f7   :  { %v3995_v3 = vshra.s32 %v6681_v59, 16 }
0x3641   :  { %v4426_v25 = vpop.permute.xlu1 %4425 }
0x3642   :  { %v4428_v4 = vadd.f32 %v4426_v25, %v4394_v54  ;;  %v6688_v25 = vcvt.s32.f32 %v3995_v3 }
0x3644   :  { %5435 = vtanh.f32 %v4428_v4 }
0x3645   :  { %5437 = vpow2.f32 %v4657_v7 }
0x364e   :  { %v5436_v17 = vpop.eup %5435 }
0x364f   :  { %4432 = vrot.lane.b32.xlu1 %v5436_v17, %s5508_s18  ;;  %v5438_v5 = vpop.eup %5437  ;;  %v1383_v17 = vsub.f32 %v6584_v46, %v6629_v11 }
0x3650   :  { %v4417_v58 = vadd.f32 1.0, %v5438_v5 }
0x3651   :  { %v1384_v24 = vmul.f32 1.442695, %v1383_v17 }
0x3652   :  { %5439 = vrcp.f32 %v4417_v58 }
0x365c   :  { %v5440_v9 = vpop.eup %5439 }
0x365d   :  { %v4430_v51 = vsub.f32 1.0, %v5440_v9  ;;  %v4436_v45 = vmul.f32 %v5440_v9, %v6494_v43  ;;  %v1888_v43 = vsel %vm836_vm7, %v6610_v12, -inf }
0x36c1   :  { %v4433_v48 = vpop.permute.xlu1 %4432 }
0x36c2   :  { %v4435_v10 = vmul.f32 %v4433_v48, %v4430_v51 }
0x36c4   :  { %v4437_v18 = vadd.f32 %v4436_v45, %v4435_v10 }
0x36c6   :  { %4439 = vrot.lane.b32.xlu1 %v4437_v18, %s5508_s18 }
0x36ea   :  { %838 = vmax.xlane.f32.xlu1 %v837_v28 }
0x36ee   :  { %1889 = vmax.xlane.f32.xlu1 %v1888_v43 }
0x36f2   :  { %2414 = vmax.xlane.f32.xlu1 %v2413_v39 }
0x36f6   :  { %3464 = vmax.xlane.f32.xlu1 %v3463_v22 }
0x3738   :  { %v4440_v40 = vpop.permute.xlu1 %4439 }
0x3739   :  { %4951 = vmatmul.mubr.msk.f32.vlgmr.msra.gmra.mrb[34].mxu1 %vm70_vm0, %v4440_v40  ;;  %vm1366_vm0 = vcmp.eq.f32.partialorder %v6584_v46, %v6629_v11 }
0x3777   :  { %v6633_v38 = vpop.xlane.xlu1 %838 }
0x3778   :  { %v857_v13 = vsub.f32 %v6606_v8, %v6633_v38  ;;  %vm840_vm8 = vcmp.eq.f32.partialorder %v6606_v8, %v6633_v38 }
0x3779   :  { %v841_v14 = vsel %vm840_vm8, %v5726_v19, 32  ;;  %vm871_vm8 = vcmask 1041408  }
0x377a   :  { %v858_v23 = vmul.f32 1.442695, %v857_v13  ;;  %v6656_v37 = vsel %vm836_vm7, %v841_v14, 2147483647  ;;  %v4618_v14 = vld [vmem:[%s6849_s1 + $0x4] sm:$0x3] }
0x377b   :  { %v6641_v49 = vpop.xlane.xlu1 %1889  ;;  %v844_v30 = vshra.s32 %v6656_v37, 16 }
0x377c   :  { %5441 = vpow2.f32 %v858_v23  ;;  %v1908_v26 = vsub.f32 %v6610_v12, %v6641_v49  ;;  %vm1891_vm9 = vcmp.eq.f32.partialorder %v6610_v12, %v6641_v49 }
0x377d   :  { %v1892_v54 = vsel %vm1891_vm9, %v5726_v19, 32  ;;  %v6669_v62 = vcvt.s32.f32 %v844_v30  ;;  %vm4556_vm9 = vcmask 7168  }
0x377e   :  { %v1909_v33 = vmul.f32 1.442695, %v1908_v26  ;;  %v6664_v6 = vsel %vm836_vm7, %v1892_v54, 2147483647 }
0x377f   :  { %v1895_v41 = vshra.s32 %v6664_v6, 16  ;;  %v6691_v4 = vpop.xlane.xlu1 %2414 }
0x3780   :  { %5443 = vpow2.f32 %v1909_v33  ;;  %v2433_v27 = vsub.f32 %v6616_v16, %v6691_v4  ;;  %vm2416_vm1 = vcmp.eq.f32.partialorder %v6616_v16, %v6691_v4 }
0x3781   :  { %5445 = vpow2.f32 %v2959_v29  ;;  %v6677_v55 = vcvt.s32.f32 %v1895_v41 }
0x3782   :  { %5447 = vpow2.f32 %v4009_v0  ;;  %v2434_v5 = vmul.f32 1.442695, %v2433_v27  ;;  %v309_v0 = vld [vmem:[%s6849_s1] sm:$0x3] }
0x3783   :  { %v6697_v7 = vpop.xlane.xlu1 %3464  ;;  %5449 = vpow2.f32 %v1384_v24 }
0x3784   :  { %v3483_v58 = vsub.f32 %v6622_v42, %v6697_v7  ;;  %5451 = vpow2.f32 %v2434_v5  ;;  %v843_v5 = vand.u32 65535, %v6656_v37  ;;  %vm3466_vm2 = vcmp.eq.f32.partialorder %v6622_v42, %v6697_v7 }
0x3786   :  { %v5442_v31 = vpop.eup %5441  ;;  %v3484_v9 = vmul.f32 1.442695, %v3483_v58  ;;  %v1894_v58 = vand.u32 65535, %v6664_v6  ;;  %v3994_v6 = vand.u32 65535, %v6681_v59 }
0x3787   :  { %v860_v53 = vsel %vm836_vm7, %v5442_v31, 0.0 }
0x3788   :  { %861 = vadd.xlane.f32.xlu0 %v860_v53  ;;  %5453 = vpow2.f32 %v3484_v9 }
0x378a   :  { %v5444_v35 = vpop.eup %5443 }
0x378b   :  { %v1911_v15 = vsel %vm836_vm7, %v5444_v35, 0.0  ;;  %v5446_v32 = vpop.eup %5445 }
0x378c   :  { %1912 = vadd.xlane.f32.xlu0 %v1911_v15  ;;  %v2961_v34 = vsel %vm836_vm7, %v5446_v32, 0.0  ;;  %v5448_v2 = vpop.eup %5447 }
0x378d   :  { %v4011_v61 = vsel %vm836_vm7, %v5448_v2, 0.0  ;;  %v5450_v18 = vpop.eup %5449 }
0x378e   :  { %v1386_v28 = vsel %vm836_vm7, %v5450_v18, 0.0  ;;  %v5452_v43 = vpop.eup %5451 }
0x378f   :  { %v2436_v22 = vsel %vm836_vm7, %v5452_v43, 0.0 }
0x3790   :  { %2962 = vadd.xlane.f32.xlu0 %v2961_v34 }
0x3792   :  { %v5454_v40 = vpop.eup %5453 }
0x3794   :  { %4012 = vadd.xlane.f32.xlu0 %v4011_v61 }
0x3798   :  { %847 = vmin.xlane.f32.xlu0 %v6669_v62 }
0x379c   :  { %1898 = vmin.xlane.f32.xlu0 %v6677_v55 }
0x37a0   :  { %2948 = vmin.xlane.f32.xlu0 %v6684_v63 }
0x37a4   :  { %3998 = vmin.xlane.f32.xlu0 %v6688_v25 }
0x380c   :  { %v4509_v51 = vpop.f32.mrb[34].mxu1 }
0x380d   :  { %v6702_v48 = vadd.f32 %v6580_v47, %v4509_v51  ;;  %v4952_v10 = vpop.f32.mrb[35].mxu1  ;;  %v3486_v47 = vsel %vm836_vm7, %v5454_v40, 0.0 }
0x380e   :  { %v2944_v10 = vand.u32 65535, %v6673_v56 }
0x380f   :  { %v4513_v45 = vsel %vm836_vm7, %v6702_v48, -inf }
0x3810   :  { %4514 = vmax.xlane.f32.xlu1 %v4513_v45  ;;  %v2946_v45 = vcvt.s32.f32 %v2944_v10 }
0x3814   :  { %1387 = vadd.xlane.f32.xlu1 %v1386_v28 }
0x3815   :  { %v862_v39 = vpop.xlane.xlu0 %861 }
0x3816   :  { %5455 = vlog2.f32 %v862_v39 }
0x3818   :  { %2437 = vadd.xlane.f32.xlu1 %v2436_v22  ;;  %v1367_v22 = vsel %vm1366_vm0, %v5726_v19, 32  ;;  %vm4568_vm0 = vcmask 56320  }
0x3819   :  { %v1913_v13 = vpop.xlane.xlu0 %1912  ;;  %v6763_v40 = vsel %vm836_vm7, %v1367_v22, 2147483647 }
0x381a   :  { %5457 = vlog2.f32 %v1913_v13  ;;  %v2417_v13 = vsel %vm2416_vm1, %v5726_v19, 32  ;;  %vm4570_vm1 = vcmask 58368  }
0x381c   :  { %3487 = vadd.xlane.f32.xlu1 %v3486_v47 }
0x381d   :  { %v2963_v44 = vpop.xlane.xlu0 %2962 }
0x381e   :  { %5459 = vlog2.f32 %v2963_v44  ;;  %v1370_v44 = vshra.s32 %v6763_v40, 16 }
0x3820   :  { %v5456_v23 = vpop.eup %5455 }
0x3821   :  { %v864_v26 = vmul.f32 0.6931472, %v5456_v23  ;;  %v4013_v29 = vpop.xlane.xlu0 %4012 }
0x3822   :  { %5461 = vlog2.f32 %v4013_v29 }
0x3823   :  { %v865_v50 = vadd.f32 %v864_v26, %v6633_v38  ;;  %v2418_v26 = vsel %vm836_vm7, %v2417_v13, 2147483647 }
0x3824   :  { %v5458_v33 = vpop.eup %5457 }
0x3825   :  { %v1915_v31 = vmul.f32 0.6931472, %v5458_v33  ;;  %v866_v53 = vsub.f32 %v6606_v8, %v865_v50  ;;  %v4632_v8 = vld [vmem:[%s6849_s1 + $0x8] sm:$0x3]  ;;  %v6724_v57 = vpop.xlane.xlu0 %847  ;;  %v3467_v50 = vsel %vm3466_vm2, %v5726_v19, 32  ;;  %v1372_v33 = vcvt.s32.f32 %v1370_v44 }
0x3826   :  { %vm849_vm12 = vcmp.eq.f32.partialorder %v6669_v62, %v6724_v57 }
0x3827   :  { %v1916_v35 = vadd.f32 %v1915_v31, %v6641_v49  ;;  %v867_v15 = vmul.f32 %v866_v53, %v309_v0  ;;  %v2420_v0 = vshra.s32 %v2418_v26, 16  ;;  %v3468_v53 = vsel %vm836_vm7, %v3467_v50, 2147483647 }
0x3828   :  { %v5460_v32 = vpop.eup %5459 }
0x3829   :  { %v2965_v34 = vmul.f32 0.6931472, %v5460_v32  ;;  %v868_v2 = vsel %vm836_vm7, %v867_v15, 0.0  ;;  %v1917_v38 = vsub.f32 %v6610_v12, %v1916_v35  ;;  %v6734_v24 = vpop.xlane.xlu0 %1898  ;;  %v2422_v32 = vcvt.s32.f32 %v2420_v0 }
0x382a   :  { %869 = vadd.xlane.f32.xlu0 %v868_v2  ;;  %vm1900_vm13 = vcmp.eq.f32.partialorder %v6677_v55, %v6734_v24  ;;  %v3996_v55 = vcvt.s32.f32 %v3994_v6 }
0x382b   :  { %v2966_v54 = vadd.f32 %v2965_v34, %v6631_v36  ;;  %v1918_v30 = vmul.f32 %v4618_v14, %v1917_v38  ;;  %v4646_v36 = vld [vmem:[%s6849_s1 + $0xc] sm:$0x3]  ;;  %v3470_v14 = vshra.s32 %v3468_v53, 16 }
0x382c   :  { %v5462_v61 = vpop.eup %5461 }
0x382d   :  { %v4015_v49 = vmul.f32 0.6931472, %v5462_v61  ;;  %v1919_v41 = vsel %vm836_vm7, %v1918_v30, 0.0  ;;  %v2967_v20 = vsub.f32 %v6588_v1, %v2966_v54  ;;  %v6741_v9 = vpop.xlane.xlu0 %2948  ;;  %v3472_v30 = vcvt.s32.f32 %v3470_v14 }
0x382e   :  { %1920 = vadd.xlane.f32.xlu0 %v1919_v41  ;;  %vm2950_vm14 = vcmp.eq.f32.partialorder %v6684_v63, %v6741_v9 }
0x382f   :  { %v4016_v60 = vadd.f32 %v4015_v49, %v6639_v21  ;;  %v2968_v12 = vmul.f32 %v4632_v8, %v2967_v20  ;;  %v845_v21 = vcvt.s32.f32 %v843_v5  ;;  %v2951_v18 = vsel %vm2950_vm14, %v2946_v45, inf }
0x3830   :  { %v1369_v45 = vand.u32 65535, %v6763_v40  ;;  %vm4572_vm14 = vcmask 0  }
0x3831   :  { %v2969_v3 = vsel %vm836_vm7, %v2968_v12, 0.0  ;;  %v4017_v17 = vsub.f32 %v6594_v52, %v4016_v60  ;;  %v850_v51 = vsel %vm849_vm12, %v845_v21, inf  ;;  %v1896_v52 = vcvt.s32.f32 %v1894_v58  ;;  %v6748_v62 = vpop.xlane.xlu0 %3998 }
0x3832   :  { %2970 = vadd.xlane.f32.xlu0 %v2969_v3  ;;  %vm4000_vm15 = vcmp.eq.f32.partialorder %v6688_v25, %v6748_v62  ;;  %vm4562_vm12 = vcmask 31744  }
0x3833   :  { %v4018_v27 = vmul.f32 %v4646_v36, %v4017_v17  ;;  %v1901_v37 = vsel %vm1900_vm13, %v1896_v52, inf  ;;  %v4001_v28 = vsel %vm4000_vm15, %v3996_v55, inf  ;;  %v4625_v36 = vld [vmem:[%s6849_s1 + $0x6] sm:$0x3]  ;;  %v4639_v17 = vld [vmem:[%s6849_s1 + $0xa] sm:$0x3] }
0x3834   :  { %v2419_v55 = vand.u32 65535, %v2418_v26  ;;  %vm4564_vm13 = vcmask 39936   ;;  %vm4566_vm15 = vcmask 48128  }
0x3835   :  { %v4019_v1 = vsel %vm836_vm7, %v4018_v27, 0.0 }
0x3836   :  { %4020 = vadd.xlane.f32.xlu0 %v4019_v1 }
0x383a   :  { %851 = vmin.xlane.f32.xlu0 %v850_v51  ;;  %v4653_v51 = vld [vmem:[%s6849_s1 + $0xe] sm:$0x3] }
0x383e   :  { %1902 = vmin.xlane.f32.xlu0 %v1901_v37 }
0x3842   :  { %2952 = vmin.xlane.f32.xlu0 %v2951_v18  ;;  %v1371_v18 = vcvt.s32.f32 %v1369_v45 }
0x3846   :  { %4002 = vmin.xlane.f32.xlu0 %v4001_v28 }
0x389d   :  { %v6753_v43 = vpop.xlane.xlu1 %4514 }
0x389e   :  { %v4533_v56 = vsub.f32 %v6702_v48, %v6753_v43  ;;  %vm4516_vm3 = vcmp.eq.f32.partialorder %v6702_v48, %v6753_v43 }
0x389f   :  { %v4517_v15 = vsel %vm4516_vm3, %v5726_v19, 32  ;;  %v4611_v19 = vld [vmem:[%s6849_s1 + $0x2] sm:$0x3]  ;;  %s5510_s1 = smov [#allocation3]  }
0x38a0   :  { %v4534_v63 = vmul.f32 1.442695, %v4533_v56  ;;  %v4518_v38 = vsel %vm836_vm7, %v4517_v15, 2147483647  ;;  %v2421_v56 = vcvt.s32.f32 %v2419_v55  ;;  %s4582_s19 = sshll.u32 %s5510_s1, 4  ;;  %s4583_s19 = int_to_ptr.vmem [resolvable:$true] %s4582_s19 }
0x38a1   :  { %v1388_v39 = vpop.xlane.xlu1 %1387  ;;  %v4520_v61 = vshra.s32 %v4518_v38, 16  ;;  %v4519_v22 = vand.u32 65535, %v4518_v38  ;;  %s5477_s6 = scalar_lea.vmem %s4583_s19, 16  ;;  %s5481_s20 = scalar_lea.vmem %s4583_s19, 32 }
0x38a2   :  { %5463 = vpow2.f32 %v4534_v63  ;;  %p5478_p0 = scmp.ne.s32.totalorder %s4583_s19, %s5477_s6  ;;  %p5482_p1 = scmp.lt.s32.totalorder %s4583_s19, %s4583_s19 }
0x38a3   :  { %5465 = vlog2.f32 %v1388_v39  ;;  %v4522_v20 = vcvt.s32.f32 %v4520_v61  ;;  %v4521_v40 = vcvt.s32.f32 %v4519_v22  ;;  %p5483_p2 = scmp.lt.s32.totalorder %s5481_s20, %s5477_s6 }
0x38a5   :  { %v2438_v59 = vpop.xlane.xlu1 %2437  ;;  %p5484_p3 = por %p5483_p2, %p5482_p1 }
0x38a6   :  { %5467 = vlog2.f32 %v2438_v59 }
0x38a7   :  { %p5485_p4 = pnand %p5484_p3, %p5478_p0 }
0x38a9   :  { %v3488_v25 = vpop.xlane.xlu1 %3487 }
0x38aa   :  { %5469 = vlog2.f32 %v3488_v25 }
0x38ac   :  { %v5464_v47 = vpop.eup %5463 }
0x38ad   :  { %v4536_v23 = vsel %vm836_vm7, %v5464_v47, 0.0  ;;  %v5466_v29 = vpop.eup %5465 }
0x38ae   :  { %4537 = vadd.xlane.f32.xlu1 %v4536_v23  ;;  %v1390_v31 = vmul.f32 0.6931472, %v5466_v29 }
0x38b0   :  { %v5468_v35 = vpop.eup %5467  ;;  %v1391_v34 = vadd.f32 %v1390_v31, %v6629_v11 }
0x38b1   :  { %v2440_v2 = vmul.f32 0.6931472, %v5468_v35 }
0x38b2   :  { %1373 = vmin.xlane.f32.xlu1 %v1372_v33  ;;  %v1392_v41 = vsub.f32 %v6584_v46, %v1391_v34 }
0x38b3   :  { %v2441_v8 = vadd.f32 %v2440_v2, %v6691_v4 }
0x38b4   :  { %v5470_v54 = vpop.eup %5469  ;;  %v1393_v60 = vmul.f32 %v4611_v19, %v1392_v41 }
0x38b5   :  { %v3490_v49 = vmul.f32 0.6931472, %v5470_v54  ;;  %v2442_v12 = vsub.f32 %v6616_v16, %v2441_v8 }
0x38b6   :  { %2423 = vmin.xlane.f32.xlu1 %v2422_v32  ;;  %v1394_v4 = vsel %vm836_vm7, %v1393_v60, 0.0 }
0x38b7   :  { %v3491_v11 = vadd.f32 %v3490_v49, %v6697_v7  ;;  %v2443_v3 = vmul.f32 %v4625_v36, %v2442_v12  ;;  %v870_v47 = vpop.xlane.xlu0 %869 }
0x38b8   :  { %v872_v23 = vsel %vm871_vm8, %v870_v47, 0.0 }
0x38b9   :  { %v3492_v46 = vsub.f32 %v6622_v42, %v3491_v11  ;;  %v2444_v7 = vsel %vm836_vm7, %v2443_v3, 0.0  ;;  %v873_v29 = vrot.slane %v872_v23, 4 }
0x38ba   :  { %3473 = vmin.xlane.f32.xlu1 %v3472_v30 }
0x38bb   :  { %v3493_v27 = vmul.f32 %v4639_v17, %v3492_v46  ;;  %v1921_v50 = vpop.xlane.xlu0 %1920  ;;  %v874_v0 = vadd.f32 %v873_v29, %v872_v23  ;;  %v854_v29 = vcvt.f32.s32 %v6724_v57 }
0x38bd   :  { %v3494_v16 = vsel %vm836_vm7, %v3493_v27, 0.0 }
0x38be   :  { %4523 = vmin.xlane.f32.xlu1 %v4522_v20 }
0x38bf   :  { %v2971_v34 = vpop.xlane.xlu0 %2970 }
0x38c0   :  { %v2972_v8 = vsel %vm871_vm8, %v2971_v34, 0.0  ;;  %v855_v34 = vshll.u32 %v854_v29, 16 }
0x38c1   :  { %v2973_v60 = vrot.slane %v2972_v8, 4 }
0x38c2   :  { %1395 = vadd.xlane.f32.xlu1 %v1394_v4 }
0x38c3   :  { %v4021_v12 = vpop.xlane.xlu0 %4020 }
0x38c4   :  { %v4022_v27 = vsel %vm871_vm8, %v4021_v12, 0.0 }
0x38c6   :  { %2445 = vadd.xlane.f32.xlu1 %v2444_v7  ;;  %v2974_v7 = vadd.f32 %v2973_v60, %v2972_v8 }
0x38ca   :  { %3495 = vadd.xlane.f32.xlu1 %v3494_v16 }
0x393b   :  { %v4538_v5 = vpop.xlane.xlu1 %4537 }
0x393c   :  { %5471 = vlog2.f32 %v4538_v5 }
0x393f   :  { %v6795_v58 = vpop.xlane.xlu1 %1373 }
0x3940   :  { %vm1375_vm4 = vcmp.eq.f32.partialorder %v1372_v33, %v6795_v58 }
0x3943   :  { %v6802_v10 = vpop.xlane.xlu1 %2423 }
0x3944   :  { %vm2425_vm5 = vcmp.eq.f32.partialorder %v2422_v32, %v6802_v10  ;;  %v875_v32 = vrot.slane %v874_v0, 2 }
0x3945   :  { %v2426_v63 = vsel %vm2425_vm5, %v2421_v56, inf }
0x3946   :  { %v5472_v1 = vpop.eup %5471  ;;  %v876_v54 = vadd.f32 %v875_v32, %v874_v0 }
0x3947   :  { %v4540_v21 = vmul.f32 0.6931472, %v5472_v1  ;;  %v6807_v28 = vpop.xlane.xlu1 %3473 }
0x3948   :  { %vm3475_vm6 = vcmp.eq.f32.partialorder %v3472_v30, %v6807_v28 }
0x3949   :  { %v4541_v42 = vadd.f32 %v4540_v21, %v6753_v43  ;;  %v1376_v43 = vsel %vm1375_vm4, %v1371_v18, inf  ;;  %v852_v18 = vpop.xlane.xlu0 %851 }
0x394b   :  { %v4542_v52 = vsub.f32 %v6702_v48, %v4541_v42  ;;  %v3469_v48 = vand.u32 65535, %v3468_v53  ;;  %v6811_v39 = vpop.xlane.xlu1 %4523  ;;  %v1922_v53 = vsel %vm871_vm8, %v1921_v50, 0.0 }
0x394c   :  { %v1923_v14 = vrot.slane %v1922_v53, 4 }
0x394d   :  { %v4543_v37 = vmul.f32 %v4653_v51, %v4542_v52  ;;  %v3471_v59 = vcvt.s32.f32 %v3469_v48  ;;  %v2975_v51 = vrot.slane %v2974_v7, 2  ;;  %v4023_v52 = vrot.slane %v4022_v27, 4  ;;  %v1903_v47 = vpop.xlane.xlu0 %1902 }
0x394e   :  { %v1924_v30 = vadd.f32 %v1923_v14, %v1922_v53  ;;  %v1380_v53 = vcvt.f32.s32 %v6795_v58  ;;  %v1904_v57 = vcvt.f32.s32 %v1903_v47 }
0x394f   :  { %v4544_v6 = vsel %vm836_vm7, %v4543_v37, 0.0  ;;  %v3476_v25 = vsel %vm3475_vm6, %v3471_v59, inf  ;;  %vm4525_vm7 = vcmp.eq.f32.partialorder %v4522_v20, %v6811_v39  ;;  %v1396_v44 = vpop.xlane.xlu1 %1395  ;;  %v877_v20 = vrot.slane %v876_v54, 1 }
0x3950   :  { %4545 = vadd.xlane.f32.xlu1 %v4544_v6  ;;  %v4526_v13 = vsel %vm4525_vm7, %v4521_v40, inf  ;;  %v1397_v26 = vsel %vm871_vm8, %v1396_v44, 0.0  ;;  %v1925_v11 = vrot.slane %v1924_v30, 2  ;;  %v2976_v56 = vadd.f32 %v2975_v51, %v2974_v7 }
0x3951   :  { %v1398_v33 = vrot.slane %v1397_v26, 4  ;;  %v878_v46 = vadd.f32 %v877_v20, %v876_v54  ;;  %v4024_v48 = vadd.f32 %v4023_v52, %v4022_v27  ;;  %v2953_v54 = vpop.xlane.xlu0 %2952  ;;  %v4005_v52 = vcvt.f32.s32 %v6748_v62 }
0x3952   :  { %v1926_v17 = vadd.f32 %v1925_v11, %v1924_v30  ;;  %v2977_v40 = vrot.slane %v2976_v56, 1 }
0x3953   :  { %v2446_v31 = vpop.xlane.xlu1 %2445  ;;  %v1399_v35 = vadd.f32 %v1398_v33, %v1397_v26  ;;  %v879_v21 = vmul.f32 0.5, %v878_v46  ;;  %v2954_v46 = vcvt.f32.s32 %v2953_v54  ;;  %v4006_v62 = vshll.u32 %v4005_v52, 16 }
0x3954   :  { %1377 = vmin.xlane.f32.xlu1 %v1376_v43  ;;  %v2447_v15 = vsel %vm871_vm8, %v2446_v31, 0.0  ;;  %v1927_v42 = vrot.slane %v1926_v17, 1  ;;  %v2978_v50 = vadd.f32 %v2977_v40, %v2976_v56  ;;  %v1905_v31 = vcvt.f32.s32 %v6734_v24 }
0x3955   :  { %v1400_v2 = vrot.slane %v1399_v35, 2  ;;  %v2448_v38 = vrot.slane %v2447_v15, 4  ;;  %v880_v55 = vsub.f32 0.0, %v879_v21  ;;  %v2430_v24 = vcvt.f32.s32 %v6802_v10  ;;  %v4003_v27 = vpop.xlane.xlu0 %4002 }
0x3956   :  { %v1928_v43 = vadd.f32 %v1927_v42, %v1926_v17  ;;  %v2979_v30 = vmul.f32 0.5, %v2978_v50 }
0x3957   :  { %v3496_v61 = vpop.xlane.xlu1 %3495  ;;  %v1401_v49 = vadd.f32 %v1400_v2, %v1399_v35  ;;  %v2449_v41 = vadd.f32 %v2448_v38, %v2447_v15  ;;  %v2955_v2 = vcvt.f32.s32 %v6741_v9  ;;  %v853_v38 = vcvt.f32.s32 %v852_v18 }
0x3958   :  { %2427 = vmin.xlane.f32.xlu1 %v2426_v63  ;;  %v3497_v19 = vsel %vm871_vm8, %v3496_v61, 0.0  ;;  %v4004_v18 = vcvt.f32.s32 %v4003_v27 }
0x3959   :  { %v1402_v36 = vrot.slane %v1401_v49, 1  ;;  %v2450_v4 = vrot.slane %v2449_v41, 2  ;;  %v3498_v3 = vrot.slane %v3497_v19, 4  ;;  %v2956_v12 = vshll.u32 %v2955_v2, 16 }
0x395a   :  { %v4007_v29 = vadd.s32 %v4006_v62, %v4004_v18 }
0x395b   :  { %v1403_v16 = vadd.f32 %v1402_v36, %v1401_v49  ;;  %v2451_v5 = vadd.f32 %v2450_v4, %v2449_v41  ;;  %v3499_v1 = vadd.f32 %v3498_v3, %v3497_v19  ;;  %v1906_v41 = vshll.u32 %v1905_v31, 16 }
0x395c   :  { %3477 = vmin.xlane.f32.xlu1 %v3476_v25  ;;  %v1929_v25 = vmul.f32 0.5, %v1928_v43  ;;  %v1381_v19 = vshll.u32 %v1380_v53, 16  ;;  %v856_v36 = vadd.s32 %v855_v34, %v853_v38 }
0x395d   :  { %v1404_v37 = vmul.f32 0.5, %v1403_v16  ;;  %v2452_v45 = vrot.slane %v2451_v5, 1  ;;  %v3500_v6 = vrot.slane %v3499_v1, 2  ;;  %v1907_v3 = vadd.s32 %v1906_v41, %v1904_v57 }
0x395e   :  { %v2431_v16 = vshll.u32 %v2430_v24, 16 }
0x395f   :  { %v1405_v63 = vsub.f32 %v880_v55, %v1404_v37  ;;  %v2453_v59 = vadd.f32 %v2452_v45, %v2451_v5  ;;  %v3501_v22 = vadd.f32 %v3500_v6, %v3499_v1  ;;  %v3480_v5 = vcvt.f32.s32 %v6807_v28 }
0x3960   :  { %4527 = vmin.xlane.f32.xlu1 %v4526_v13  ;;  %v4025_v13 = vrot.slane %v4024_v48, 2  ;;  %v2957_v6 = vadd.s32 %v2956_v12, %v2954_v46 }
0x3961   :  { %v1930_v44 = vsub.f32 %v1405_v63, %v1929_v25  ;;  %v2454_v23 = vmul.f32 0.5, %v2453_v59  ;;  %v3502_v26 = vrot.slane %v3501_v22, 1  ;;  %v3481_v56 = vshll.u32 %v3480_v5, 16 }
0x3962   :  { %v4026_v33 = vadd.f32 %v4025_v13, %v4024_v48  ;;  %v4530_v48 = vcvt.f32.s32 %v6811_v39 }
0x3963   :  { %v2455_v15 = vsub.f32 %v1930_v44, %v2454_v23  ;;  %v3503_v32 = vadd.f32 %v3502_v26, %v3501_v22 }
0x3964   :  { %v4027_v61 = vrot.slane %v4026_v33, 1  ;;  %v4531_v44 = vshll.u32 %v4530_v48, 16 }
0x3965   :  { %v3504_v20 = vmul.f32 0.5, %v3503_v32  ;;  %v2980_v60 = vsub.f32 %v2455_v15, %v2979_v30 }
0x3966   :  { %v4028_v9 = vadd.f32 %v4027_v61, %v4026_v33 }
0x3967   :  { %v3505_v51 = vsub.f32 %v2980_v60, %v3504_v20 }
0x3968   :  { %v4029_v45 = vmul.f32 0.5, %v4028_v9 }
0x396a   :  { %v4030_v22 = vsub.f32 %v3505_v51, %v4029_v45 }
0x39dd   :  { %v4546_v0 = vpop.xlane.xlu1 %4545 }
0x39de   :  { %v4547_v35 = vsel %vm871_vm8, %v4546_v0, 0.0 }
0x39df   :  { %v4548_v14 = vrot.slane %v4547_v35, 4 }
0x39e1   :  { %v4549_v8 = vadd.f32 %v4548_v14, %v4547_v35  ;;  %v1378_v49 = vpop.xlane.xlu1 %1377 }
0x39e2   :  { %v1379_v58 = vcvt.f32.s32 %v1378_v49 }
0x39e3   :  { %v4550_v11 = vrot.slane %v4549_v8, 2 }
0x39e4   :  { %v1382_v4 = vadd.s32 %v1381_v19, %v1379_v58 }
0x39e5   :  { %v4551_v17 = vadd.f32 %v4550_v11, %v4549_v8  ;;  %v2428_v7 = vpop.xlane.xlu1 %2427 }
0x39e6   :  { %v4557_v1 = vsel %vm4556_vm9, %v856_v36, %v1382_v4  ;;  %v2429_v10 = vcvt.f32.s32 %v2428_v7 }
0x39e7   :  { %v4552_v21 = vrot.slane %v4551_v17, 1  ;;  %v4559_v42 = vsel %vm4558_vm10, %v4557_v1, %v1907_v3 }
0x39e8   :  { %v2432_v37 = vadd.s32 %v2431_v16, %v2429_v10 }
0x39e9   :  { %v4553_v55 = vadd.f32 %v4552_v21, %v4551_v17  ;;  %v3478_v43 = vpop.xlane.xlu1 %3477 }
0x39ea   :  { %v4561_v63 = vsel %vm4560_vm11, %v4559_v42, %v2432_v37  ;;  %v3479_v28 = vcvt.f32.s32 %v3478_v43 }
0x39eb   :  { %v4563_v59 = vsel %vm4562_vm12, %v4561_v63, %v2957_v6  ;;  %v4554_v25 = vmul.f32 0.5, %v4553_v55 }
0x39ec   :  { %v3482_v40 = vadd.s32 %v3481_v56, %v3479_v28 }
0x39ed   :  { %v4528_v13 = vpop.xlane.xlu1 %4527  ;;  %v4555_v47 = vsub.f32 %v4030_v22, %v4554_v25 }
0x39ee   :  { %v4565_v23 = vsel %vm4564_vm13, %v4563_v59, %v3482_v40  ;;  %v4529_v26 = vcvt.f32.s32 %v4528_v13 }
0x39ef   :  { %4573 = vst.msk [vmem:[#allocation3] sm:$0x1] %vm4572_vm14, %v4555_v47 }
0x39f0   :  { %v4532_v39 = vadd.s32 %v4531_v44, %v4529_v26 }
0x39f1   :  { %5488 = shalt.err (!%p5485_p4)
}
0x39f2   :  { %s5489_s21 = scalar_lea.hbm %s6864_s16, 16 }
0x39f3   :  { %p5490_p5 = scmp.ne.s32.totalorder %s6864_s16, %s5489_s21  ;;  %p5493_p6 = scmp.lt.u32.totalorder %s5489_s21, %s6864_s16 }
0x39f5   :  { %p5495_p7 = pnand %p5493_p6, %p5490_p5 }
0x39f7   :  { %5498 = shalt.err (!%p5495_p7)
}
0x39f8   :  { %4585 = dma.vmem_to_hbm [thread:$0]  %s4583_s19, 16, %s6864_s16, [#allocation4]   ;;  %v4567_v50 = vsel %vm4566_vm15, %v4565_v23, %v4007_v29 }
0x39f9   :  { %v4569_v33 = vsel %vm4568_vm0, %v4567_v50, %v4532_v39 }
0x39fa   :  { %4571 = vst.msk [vmem:[%s6863_s15] sm:$0x3] %vm4570_vm1, %v4569_v33 }
0x39fb   :  { %5499 = dma.done.wait [#allocation4], 16  }
0x39fc   :  { %5500 = vsyncadd [#allocation4], 4294967280 }
0x39fd   :  { %4591 = vsyncpa [#allocation4], 1 }

</bundles_post_ra>
